<compile_context>
chip_gen: v5e
topology: v5e:2x2
jax: 0.10.0
libtpu: 0.0.40
codegen_flags: <defaults>
</compile_context>

<pallas_src>
import functools
import numpy as np
import jax
import jax.numpy as jnp
from jax import lax
from jax.experimental import pallas as pl
from jax.experimental.pallas import tpu as pltpu

NEG_SLOPE = 0.1
LANE = 128
SUBLANE = 16                       # bf16 native sublane packing
VMEM_LIMIT = 48 * 1024 * 1024      # scoped VMEM: fits v7x 64 MiB/TC, > v5e 16 MiB default
TILE_BUDGET = 32 * 1024 * 1024     # budget for the double-buffered tiles + resident weight


def _round_up(x, m):
    return ((x + m - 1) // m) * m


# ----------------------------- Pallas kernels -----------------------------

def _center_kernel(x_ref, xc_ref, m_ref):
    # x_ref: [tr, H*W] f32  ->  xc = (x - mean_HW(x)) in bf16,  m = mean_HW(x) in f32
    x = x_ref[...]
    m = jnp.mean(x, axis=-1, keepdims=True)
    xc_ref[...] = (x - m).astype(xc_ref.dtype)
    m_ref[...] = m


def _mm_bias_lrelu_kernel(a_ref, w_ref, b_ref, o_ref, *, slope):
    # a: [tm, K] bf16, w: [K, Np] bf16 (lane-padded), b: [1, Np] f32, o: [tm, Np]
    acc = jnp.dot(a_ref[...], w_ref[...], preferred_element_type=jnp.float32)
    acc = acc + b_ref[...]
    o_ref[...] = jnp.where(acc >= 0.0, acc, slope * acc).astype(o_ref.dtype)


def _mm_head_kernel(a_ref, w5_ref, b5_ref, w6_ref, b6_ref, r_ref, o_ref, *, slope):
    # conv5 matmul + LeakyReLU + conv6 (1x1) + bias + per-row mean residual, fused.
    acc = jnp.dot(a_ref[...], w5_ref[...], preferred_element_type=jnp.float32)
    acc = acc + b5_ref[...]
    fea = jnp.where(acc >= 0.0, acc, slope * acc)            # f32, lane-padded nf -> 128
    out = jnp.dot(fea, w6_ref[...], preferred_element_type=jnp.float32)
    o_ref[...] = (out + b6_ref[...] + r_ref[...]).astype(o_ref.dtype)


# ----------------------------- wrappers -----------------------------

def _choose_tm(M, K, Np, out_itemsize):
    """Row-tile size: target 512 rows, >=2 grid steps, 16-row aligned, fits VMEM budget."""
    if M >= 1024:
        tm = 512
    else:
        tm = max(SUBLANE, _round_up(max(1, M // 2), SUBLANE))
    fixed = 2 * K * Np * 2 + 4 * Np * 4            # resident weight (bf16, 2 bufs) + bias
    per_row = 2 * K * 2 + 2 * Np * out_itemsize    # double-buffered a tile + out tile
    while tm > SUBLANE and fixed + tm * per_row > TILE_BUDGET:
        tm = max(SUBLANE, _round_up(tm // 2, SUBLANE))
    return tm


def center_hw(x2, tr=16):
    """x2: [R, HW] f32 -> (bf16 centered rows, f32 per-row mean), tiled over rows."""
    R, L = x2.shape
    Rp = _round_up(R, tr)
    if Rp != R:
        x2 = jnp.pad(x2, ((0, Rp - R), (0, 0)))
    xc, m = pl.pallas_call(
        _center_kernel,
        out_shape=(jax.ShapeDtypeStruct((Rp, L), jnp.bfloat16),
                   jax.ShapeDtypeStruct((Rp, 1), jnp.float32)),
        grid=(pl.cdiv(Rp, tr),),
        in_specs=[pl.BlockSpec((tr, L), lambda i: (i, 0))],
        out_specs=(pl.BlockSpec((tr, L), lambda i: (i, 0)),
                   pl.BlockSpec((tr, 1), lambda i: (i, 0))),
        compiler_params=pltpu.CompilerParams(
            dimension_semantics=("parallel",),
            vmem_limit_bytes=VMEM_LIMIT),
    )(x2)
    return xc[:R], m[:R]


def conv_lrelu(a, w_pt, b_pt, *, slope=NEG_SLOPE, out_dtype=jnp.bfloat16):
    """Fused im2col conv: lrelu(a @ w + b).

    a: [M, K] patch matrix (cast to bf16), w_pt: PyTorch layout [Cout, ...] with
    prod(...)==K.  Output lanes are zero-padded to a multiple of 128 inside the
    kernel (lane-dense stores) and sliced away here (fused by XLA into the next
    layer's patch gather).  Returns [M, Cout] in out_dtype.
    """
    M, K = a.shape
    Cout = int(w_pt.shape[0])
    Np = _round_up(Cout, LANE)

    w = w_pt.reshape(Cout, K).T.astype(jnp.bfloat16)
    w = jnp.pad(w, ((0, 0), (0, Np - Cout)))
    b = jnp.pad(b_pt.astype(jnp.float32), (0, Np - Cout)).reshape(1, Np)

    a = a.astype(jnp.bfloat16)
    tm = _choose_tm(M, K, Np, jnp.dtype(out_dtype).itemsize)
    Mp = _round_up(M, tm)
    if Mp != M:
        a = jnp.pad(a, ((0, Mp - M), (0, 0)))

    out = pl.pallas_call(
        functools.partial(_mm_bias_lrelu_kernel, slope=slope),
        out_shape=jax.ShapeDtypeStruct((Mp, Np), out_dtype),
        grid=(pl.cdiv(Mp, tm),),
        in_specs=[
            pl.BlockSpec((tm, K), lambda i: (i, 0)),
            pl.BlockSpec((K, Np), lambda i: (0, 0)),
            pl.BlockSpec((1, Np), lambda i: (0, 0)),
        ],
        out_specs=pl.BlockSpec((tm, Np), lambda i: (i, 0)),
        compiler_params=pltpu.CompilerParams(
            dimension_semantics=("parallel",),
            vmem_limit_bytes=VMEM_LIMIT,
            allow_input_fusion=[True, False, False],
        ),
    )(a, w, b)
    return out[:M, :Cout]


def conv5_conv6_fused(a, w5_pt, b5_pt, w6_pt, b6_pt, m_rows, *, slope=NEG_SLOPE):
    """conv5 (3x3x3) + LeakyReLU + conv6 (1x1) + bias + '+ m' residual in one kernel."""
    M, K = a.shape
    nf = int(w5_pt.shape[0])
    in_nc = int(w6_pt.shape[0])
    Np5 = _round_up(nf, LANE)

    w5 = jnp.pad(w5_pt.reshape(nf, K).T.astype(jnp.bfloat16), ((0, 0), (0, Np5 - nf)))
    b5 = jnp.pad(b5_pt.astype(jnp.float32), (0, Np5 - nf)).reshape(1, Np5)
    w6 = jnp.pad(w6_pt.reshape(in_nc, nf).T.astype(jnp.float32),
                 ((0, Np5 - nf), (0, 0)))                       # [Np5, in_nc]
    b6 = b6_pt.astype(jnp.float32).reshape(1, in_nc)

    a = a.astype(jnp.bfloat16)
    r = m_rows.astype(jnp.float32)
    tm = _choose_tm(M, K, Np5, 4)
    Mp = _round_up(M, tm)
    if Mp != M:
        a = jnp.pad(a, ((0, Mp - M), (0, 0)))
        r = jnp.pad(r, ((0, Mp - M), (0, 0)))

    out = pl.pallas_call(
        functools.partial(_mm_head_kernel, slope=slope),
        out_shape=jax.ShapeDtypeStruct((Mp, in_nc), jnp.float32),
        grid=(pl.cdiv(Mp, tm),),
        in_specs=[
            pl.BlockSpec((tm, K), lambda i: (i, 0)),
            pl.BlockSpec((K, Np5), lambda i: (0, 0)),
            pl.BlockSpec((1, Np5), lambda i: (0, 0)),
            pl.BlockSpec((Np5, in_nc), lambda i: (0, 0)),
            pl.BlockSpec((1, in_nc), lambda i: (0, 0)),
            pl.BlockSpec((tm, in_nc), lambda i: (i, 0)),
        ],
        out_specs=pl.BlockSpec((tm, in_nc), lambda i: (i, 0)),
        compiler_params=pltpu.CompilerParams(
            dimension_semantics=("parallel",),
            vmem_limit_bytes=VMEM_LIMIT,
            allow_input_fusion=[True, False, False, False, False, False],
        ),
    )(a, w5, b5, w6, b6, r)
    return out[:M]


# ----------------------------- im2col glue -----------------------------

def im2col3d(xpad, T, H, W):
    # xpad: [B, T+2, H+2, W+2, C]  ->  [B*T*H*W, C*27]  (K ordered as (C, kt, kh, kw))
    B = xpad.shape[0]
    C = xpad.shape[-1]
    cols = []
    for kt in range(3):
        for kh in range(3):
            for kw in range(3):
                cols.append(xpad[:, kt:kt + T, kh:kh + H, kw:kw + W, :])
    col = jnp.stack(cols, axis=-1)           # [B, T, H, W, C, 27]
    return col.reshape(B * T * H * W, C * 27)


def im2col2d(xpad, k, stride, Hout, Wout):
    # xpad: [N, Hp, Wp, C]  ->  [N*Hout*Wout, C*k*k]  (K ordered as (C, kh, kw))
    N = xpad.shape[0]
    C = xpad.shape[-1]
    cols = []
    for kh in range(k):
        for kw in range(k):
            cols.append(
                xpad[:, kh:kh + stride * (Hout - 1) + 1:stride,
                        kw:kw + stride * (Wout - 1) + 1:stride, :])
    col = jnp.stack(cols, axis=-1)           # [N, Hout, Wout, C, k*k]
    return col.reshape(N * Hout * Wout, C * k * k)


# ----------------------------- forward -----------------------------

def pallas_forward(x, p, *, nf, in_nc, scale):
    B, C, T, H, W = x.shape
    H2, W2 = H // scale, W // scale

    # mean over (H, W) + centering (row-tiled Pallas reduction; xc stored bf16)
    xc, m = center_hw(x.reshape(B * C * T, H * W))
    xc = xc.reshape(B, C, T, H, W)
    m_bct = m.reshape(B, C, T)

    # channels-last [B, T, H, W, C]
    cur = jnp.transpose(xc, (0, 2, 3, 4, 1))

    # conv0: Conv3d 3x3x3, ReplicationPad3d(1), LeakyReLU
    xp = jnp.pad(cur, ((0, 0), (1, 1), (1, 1), (1, 1), (0, 0)), mode='edge')
    fea = conv_lrelu(im2col3d(xp, T, H, W), p['w0'], p['b0'])

    # conv1: Conv2d 3x3, ReflectionPad2d(1), LeakyReLU   (rows ordered (b, t, h, w))
    fea = fea.reshape(B * T, H, W, nf)
    fp = jnp.pad(fea, ((0, 0), (1, 1), (1, 1), (0, 0)), mode='reflect')
    fea = conv_lrelu(im2col2d(fp, 3, 1, H, W), p['w1'], p['b1'])

    # conv2: Conv2d 4x4 stride 2, ReflectionPad2d(1), LeakyReLU
    fea = fea.reshape(B * T, H, W, nf)
    fp = jnp.pad(fea, ((0, 0), (1, 1), (1, 1), (0, 0)), mode='reflect')
    Hc, Wc = H // 2, W // 2
    fea = conv_lrelu(im2col2d(fp, 4, 2, Hc, Wc), p['w2'], p['b2'])

    # conv3: scale==2 -> 3x3/s1, scale==4 -> 4x4/s2, ReflectionPad2d(1), LeakyReLU
    k3, s3 = (3, 1) if scale == 2 else (4, 2)
    fea = fea.reshape(B * T, Hc, Wc, nf * 2)
    fp = jnp.pad(fea, ((0, 0), (1, 1), (1, 1), (0, 0)), mode='reflect')
    fea = conv_lrelu(im2col2d(fp, k3, s3, H2, W2), p['w3'], p['b3'])

    # conv4: Conv2d 3x3, ReflectionPad2d(1), LeakyReLU
    fea = fea.reshape(B * T, H2, W2, nf)
    fp = jnp.pad(fea, ((0, 0), (1, 1), (1, 1), (0, 0)), mode='reflect')
    fea = conv_lrelu(im2col2d(fp, 3, 1, H2, W2), p['w4'], p['b4'])

    # conv5 (Conv3d 3x3x3, ReplicationPad3d(1), LeakyReLU) + conv6 (1x1) + '+ m',
    # fused into a single Pallas kernel.
    fea = fea.reshape(B, T, H2, W2, nf)
    fp = jnp.pad(fea, ((0, 0), (1, 1), (1, 1), (1, 1), (0, 0)), mode='edge')
    m_rows = jnp.broadcast_to(
        jnp.transpose(m_bct, (0, 2, 1))[:, :, None, None, :],
        (B, T, H2, W2, in_nc)).reshape(B * T * H2 * W2, in_nc)
    out = conv5_conv6_fused(im2col3d(fp, T, H2, W2),
                            p['w5'], p['b5'], p['w6'], p['b6'], m_rows)

    # back to PyTorch layout [B, in_nc, T, H2, W2]
    out = out.reshape(B, T, H2, W2, in_nc)
    return jnp.transpose(out, (0, 4, 1, 2, 3))


# ----------------------------- params + pure-JAX reference -----------------------------

def init_params(key, nf, in_nc, scale):
    keys = jax.random.split(key, 14)

    def conv_init(kw, kb, shape):
        fan_in = int(np.prod(shape[1:]))
        w = jax.random.normal(kw, shape, jnp.float32) / np.sqrt(fan_in)
        b = 0.01 * jax.random.normal(kb, (shape[0],), jnp.float32)
        return w, b

    p = {}
    p['w0'], p['b0'] = conv_init(keys[0], keys[1], (nf, in_nc, 3, 3, 3))
    p['w1'], p['b1'] = conv_init(keys[2], keys[3], (nf, nf, 3, 3))
    p['w2'], p['b2'] = conv_init(keys[4], keys[5], (nf * 2, nf, 4, 4))
    if scale == 2:
        p['w3'], p['b3'] = conv_init(keys[6], keys[7], (nf, nf * 2, 3, 3))
    elif scale == 4:
        p['w3'], p['b3'] = conv_init(keys[6], keys[7], (nf, nf * 2, 4, 4))
    else:
        raise NotImplementedError()
    p['w4'], p['b4'] = conv_init(keys[8], keys[9], (nf, nf, 3, 3))
    p['w5'], p['b5'] = conv_init(keys[10], keys[11], (nf, nf, 3, 3, 3))
    p['w6'], p['b6'] = conv_init(keys[12], keys[13], (in_nc, nf, 1, 1))
    return p


def ref_forward(x, p, nf, in_nc, scale):
    B, C, T, H, W = x.shape

    def lrelu(v):
        return jnp.where(v >= 0, v, NEG_SLOPE * v)

    m = jnp.mean(x, axis=(-2, -1), keepdims=True)
    xc = x - m

    xp = jnp.pad(xc, ((0, 0), (0, 0), (1, 1), (1, 1), (1, 1)), mode='edge')
    y = lax.conv_general_dilated(xp, p['w0'], (1, 1, 1), 'VALID',
                                 dimension_numbers=('NCDHW', 'OIDHW', 'NCDHW'))
    y = lrelu(y + p['b0'].reshape(1, nf, 1, 1, 1))
    fea = jnp.transpose(y, (0, 2, 1, 3, 4)).reshape(B * T, nf, H, W)

    def conv2d(v, w, b, stride=1):
        vp = jnp.pad(v, ((0, 0), (0, 0), (1, 1), (1, 1)), mode='reflect')
        o = lax.conv_general_dilated(vp, w, (stride, stride), 'VALID',
                                     dimension_numbers=('NCHW', 'OIHW', 'NCHW'))
        return o + b.reshape(1, -1, 1, 1)

    fea = lrelu(conv2d(fea, p['w1'], p['b1']))
    fea = lrelu(conv2d(fea, p['w2'], p['b2'], stride=2))
    fea = lrelu(conv2d(fea, p['w3'], p['b3'], stride=1 if scale == 2 else 2))
    fea = lrelu(conv2d(fea, p['w4'], p['b4']))

    H2, W2 = H // scale, W // scale
    fea = fea.reshape(B, T, nf, H2, W2).transpose(0, 2, 1, 3, 4)
    fp = jnp.pad(fea, ((0, 0), (0, 0), (1, 1), (1, 1), (1, 1)), mode='edge')
    fea = lax.conv_general_dilated(fp, p['w5'], (1, 1, 1), 'VALID',
                                   dimension_numbers=('NCDHW', 'OIDHW', 'NCDHW'))
    fea = lrelu(fea + p['b5'].reshape(1, nf, 1, 1, 1))
    fea = jnp.transpose(fea, (0, 2, 1, 3, 4)).reshape(B * T, nf, H2, W2)

    fea = lax.conv_general_dilated(fea, p['w6'], (1, 1), 'VALID',
                                   dimension_numbers=('NCHW', 'OIHW', 'NCHW'))
    fea = fea + p['b6'].reshape(1, in_nc, 1, 1)
    fea = fea.reshape(B, T, in_nc, H2, W2).transpose(0, 2, 1, 3, 4)
    return fea + m


# ----------------------------- main -----------------------------

if __name__ == "__main__":
    B, IN_NC, T, H, W = 2, 3, 4, 16, 16
    NF, SCALE = 8, 2

    key = jax.random.PRNGKey(0)
    kx, kp = jax.random.split(key)
    x = jax.random.normal(kx, (B, IN_NC, T, H, W), jnp.float32)
    params = init_params(kp, NF, IN_NC, SCALE)

    fwd = jax.jit(functools.partial(pallas_forward, nf=NF, in_nc=IN_NC, scale=SCALE))
    out = jax.block_until_ready(fwd(x, params))

    assert out.shape == (B, IN_NC, T, H // SCALE, W // SCALE), out.shape

    ref = jax.block_until_ready(ref_forward(x, params, NF, IN_NC, SCALE))
    max_err = float(jnp.max(jnp.abs(out - ref)))
    assert max_err < 5e-2, f"max abs err {max_err}"

    print("KERNEL_OK")
</pallas_src>

<mosaic_0001>
module attributes {stable_mosaic.version = 11 : i64} {
  func.func @_center_kernel(%arg0: i32, %arg1: memref<16x256xf32, #tpu.memory_space<vmem>>, %arg2: memref<16x256xbf16, #tpu.memory_space<vmem>>, %arg3: memref<16x1xf32, #tpu.memory_space<vmem>>) attributes {dimension_semantics = [#tpu.dimension_semantics<parallel>], iteration_bounds = array<i64: 2>, scalar_prefetch = 0 : i64, scratch_operands = 0 : i64, tpu.core_type = #tpu.core_type<tc>, window_params = [{transform_indices = @transform_0, window_bounds = array<i64: 16, 256>}, {transform_indices = @transform_1, window_bounds = array<i64: 16, 256>}, {transform_indices = @transform_2, window_bounds = array<i64: 16, 1>}]} {
    %c0 = arith.constant 0 : index
    %c0_0 = arith.constant 0 : index
    %0 = vector.load %arg1[%c0, %c0_0] : memref<16x256xf32, #tpu.memory_space<vmem>>, vector<16x256xf32>
    %cst = arith.constant dense<0.000000e+00> : vector<16xf32>
    %1 = vector.multi_reduction <add>, %0, %cst [1] : vector<16x256xf32> to vector<16xf32>
    %2 = vector.shape_cast %1 : vector<16xf32> to vector<16x1xf32>
    %cst_1 = arith.constant 2.560000e+02 : f32
    %3 = vector.broadcast %cst_1 : f32 to vector<16x1xf32>
    %4 = arith.divf %2, %3 : vector<16x1xf32>
    %5 = vector.broadcast %4 : vector<16x1xf32> to vector<16x256xf32>
    %6 = arith.subf %0, %5 : vector<16x256xf32>
    %7 = arith.truncf %6 : vector<16x256xf32> to vector<16x256xbf16>
    %c0_2 = arith.constant 0 : index
    %c0_3 = arith.constant 0 : index
    %8 = vector.load %arg2[%c0_2, %c0_3] : memref<16x256xbf16, #tpu.memory_space<vmem>>, vector<16x256xbf16>
    tpu.vector_store %arg2[%c0_2, %c0_3], %7 {strides = array<i32>} : memref<16x256xbf16, #tpu.memory_space<vmem>>, vector<16x256xbf16>,
    %c0_4 = arith.constant 0 : index
    %c0_5 = arith.constant 0 : index
    %9 = vector.load %arg3[%c0_4, %c0_5] : memref<16x1xf32, #tpu.memory_space<vmem>>, vector<16x1xf32>
    tpu.vector_store %arg3[%c0_4, %c0_5], %4 {strides = array<i32>} : memref<16x1xf32, #tpu.memory_space<vmem>>, vector<16x1xf32>,
    return
  }
  func.func @transform_0(%arg0: i32) -> (i32, i32) {
    %c0_i32 = arith.constant 0 : i32
    %c0_i32_0 = arith.constant 0 : i32
    return %arg0, %c0_i32 : i32, i32
  }
  func.func @transform_1(%arg0: i32) -> (i32, i32) {
    %c0_i32 = arith.constant 0 : i32
    %c0_i32_0 = arith.constant 0 : i32
    return %arg0, %c0_i32 : i32, i32
  }
  func.func @transform_2(%arg0: i32) -> (i32, i32) {
    %c0_i32 = arith.constant 0 : i32
    %c0_i32_0 = arith.constant 0 : i32
    return %arg0, %c0_i32 : i32, i32
  }
}

module attributes {stable_mosaic.version = 11 : i64} {
  func.func @_mm_bias_lrelu_kernel(%arg0: i32, %arg1: memref<512x81xbf16, #tpu.memory_space<vmem>>, %arg2: memref<81x128xbf16, #tpu.memory_space<vmem>>, %arg3: memref<1x128xf32, #tpu.memory_space<vmem>>, %arg4: memref<512x128xbf16, #tpu.memory_space<vmem>>) attributes {dimension_semantics = [#tpu.dimension_semantics<parallel>], iteration_bounds = array<i64: 4>, scalar_prefetch = 0 : i64, scratch_operands = 0 : i64, tpu.core_type = #tpu.core_type<tc>, window_params = [{transform_indices = @transform_0, window_bounds = array<i64: 512, 81>}, {pipeline_mode = #tpu.pipeline_mode<synchronous>, transform_indices = @transform_1, window_bounds = array<i64: 81, 128>}, {pipeline_mode = #tpu.pipeline_mode<synchronous>, transform_indices = @transform_2, window_bounds = array<i64: 1, 128>}, {transform_indices = @transform_3, window_bounds = array<i64: 512, 128>}]} {
    %c0 = arith.constant 0 : index
    %c0_0 = arith.constant 0 : index
    %0 = vector.load %arg1[%c0, %c0_0] : memref<512x81xbf16, #tpu.memory_space<vmem>>, vector<512x81xbf16>
    %c0_1 = arith.constant 0 : index
    %c0_2 = arith.constant 0 : index
    %1 = vector.load %arg2[%c0_1, %c0_2] : memref<81x128xbf16, #tpu.memory_space<vmem>>, vector<81x128xbf16>
    %cst = arith.constant dense<0.000000e+00> : vector<512x128xf32>
    %2 = tpu.matmul %0, %1, %cst {dimension_numbers = #tpu.dot_dimension_numbers<[1], [0], [0], [1], [0, 0, 1, 1], [], []>} : vector<512x81xbf16>, vector<81x128xbf16>, vector<512x128xf32> -> vector<512x128xf32>
    %c0_3 = arith.constant 0 : index
    %c0_4 = arith.constant 0 : index
    %3 = vector.load %arg3[%c0_3, %c0_4] : memref<1x128xf32, #tpu.memory_space<vmem>>, vector<1x128xf32>
    %4 = vector.broadcast %3 : vector<1x128xf32> to vector<512x128xf32>
    %5 = arith.addf %2, %4 : vector<512x128xf32>
    %cst_5 = arith.constant 0.000000e+00 : f32
    %6 = vector.broadcast %cst_5 : f32 to vector<512x128xf32>
    %7 = arith.cmpf oge, %5, %6 : vector<512x128xf32>
    %cst_6 = arith.constant 1.000000e-01 : f32
    %8 = vector.broadcast %cst_6 : f32 to vector<512x128xf32>
    %9 = arith.mulf %8, %5 : vector<512x128xf32>
    %10 = arith.select %7, %5, %9 : vector<512x128xi1>, vector<512x128xf32>
    %11 = arith.truncf %10 : vector<512x128xf32> to vector<512x128xbf16>
    %c0_7 = arith.constant 0 : index
    %c0_8 = arith.constant 0 : index
    %12 = vector.load %arg4[%c0_7, %c0_8] : memref<512x128xbf16, #tpu.memory_space<vmem>>, vector<512x128xbf16>
    tpu.vector_store %arg4[%c0_7, %c0_8], %11 {strides = array<i32>} : memref<512x128xbf16, #tpu.memory_space<vmem>>, vector<512x128xbf16>,
    return
  }
  func.func @transform_0(%arg0: i32) -> (i32, i32) {
    %c0_i32 = arith.constant 0 : i32
    %c0_i32_0 = arith.constant 0 : i32
    return %arg0, %c0_i32 : i32, i32
  }
  func.func @transform_1(%arg0: i32) -> (i32, i32) {
    %c0_i32 = arith.constant 0 : i32
    %c0_i32_0 = arith.constant 0 : i32
    %c0_i32_1 = arith.constant 0 : i32
    return %c0_i32, %c0_i32_0 : i32, i32
  }
  func.func @transform_2(%arg0: i32) -> (i32, i32) {
    %c0_i32 = arith.constant 0 : i32
    %c0_i32_0 = arith.constant 0 : i32
    %c0_i32_1 = arith.constant 0 : i32
    return %c0_i32, %c0_i32_0 : i32, i32
  }
  func.func @transform_3(%arg0: i32) -> (i32, i32) {
    %c0_i32 = arith.constant 0 : i32
    %c0_i32_0 = arith.constant 0 : i32
    return %arg0, %c0_i32 : i32, i32
  }
}

module attributes {stable_mosaic.version = 11 : i64} {
  func.func @_mm_bias_lrelu_kernel(%arg0: i32, %arg1: memref<512x72xbf16, #tpu.memory_space<vmem>>, %arg2: memref<72x128xbf16, #tpu.memory_space<vmem>>, %arg3: memref<1x128xf32, #tpu.memory_space<vmem>>, %arg4: memref<512x128xbf16, #tpu.memory_space<vmem>>) attributes {dimension_semantics = [#tpu.dimension_semantics<parallel>], iteration_bounds = array<i64: 4>, scalar_prefetch = 0 : i64, scratch_operands = 0 : i64, tpu.core_type = #tpu.core_type<tc>, window_params = [{transform_indices = @transform_0, window_bounds = array<i64: 512, 72>}, {pipeline_mode = #tpu.pipeline_mode<synchronous>, transform_indices = @transform_1, window_bounds = array<i64: 72, 128>}, {pipeline_mode = #tpu.pipeline_mode<synchronous>, transform_indices = @transform_2, window_bounds = array<i64: 1, 128>}, {transform_indices = @transform_3, window_bounds = array<i64: 512, 128>}]} {
    %c0 = arith.constant 0 : index
    %c0_0 = arith.constant 0 : index
    %0 = vector.load %arg1[%c0, %c0_0] : memref<512x72xbf16, #tpu.memory_space<vmem>>, vector<512x72xbf16>
    %c0_1 = arith.constant 0 : index
    %c0_2 = arith.constant 0 : index
    %1 = vector.load %arg2[%c0_1, %c0_2] : memref<72x128xbf16, #tpu.memory_space<vmem>>, vector<72x128xbf16>
    %cst = arith.constant dense<0.000000e+00> : vector<512x128xf32>
    %2 = tpu.matmul %0, %1, %cst {dimension_numbers = #tpu.dot_dimension_numbers<[1], [0], [0], [1], [0, 0, 1, 1], [], []>} : vector<512x72xbf16>, vector<72x128xbf16>, vector<512x128xf32> -> vector<512x128xf32>
    %c0_3 = arith.constant 0 : index
    %c0_4 = arith.constant 0 : index
    %3 = vector.load %arg3[%c0_3, %c0_4] : memref<1x128xf32, #tpu.memory_space<vmem>>, vector<1x128xf32>
    %4 = vector.broadcast %3 : vector<1x128xf32> to vector<512x128xf32>
    %5 = arith.addf %2, %4 : vector<512x128xf32>
    %cst_5 = arith.constant 0.000000e+00 : f32
    %6 = vector.broadcast %cst_5 : f32 to vector<512x128xf32>
    %7 = arith.cmpf oge, %5, %6 : vector<512x128xf32>
    %cst_6 = arith.constant 1.000000e-01 : f32
    %8 = vector.broadcast %cst_6 : f32 to vector<512x128xf32>
    %9 = arith.mulf %8, %5 : vector<512x128xf32>
    %10 = arith.select %7, %5, %9 : vector<512x128xi1>, vector<512x128xf32>
    %11 = arith.truncf %10 : vector<512x128xf32> to vector<512x128xbf16>
    %c0_7 = arith.constant 0 : index
    %c0_8 = arith.constant 0 : index
    %12 = vector.load %arg4[%c0_7, %c0_8] : memref<512x128xbf16, #tpu.memory_space<vmem>>, vector<512x128xbf16>
    tpu.vector_store %arg4[%c0_7, %c0_8], %11 {strides = array<i32>} : memref<512x128xbf16, #tpu.memory_space<vmem>>, vector<512x128xbf16>,
    return
  }
  func.func @transform_0(%arg0: i32) -> (i32, i32) {
    %c0_i32 = arith.constant 0 : i32
    %c0_i32_0 = arith.constant 0 : i32
    return %arg0, %c0_i32 : i32, i32
  }
  func.func @transform_1(%arg0: i32) -> (i32, i32) {
    %c0_i32 = arith.constant 0 : i32
    %c0_i32_0 = arith.constant 0 : i32
    %c0_i32_1 = arith.constant 0 : i32
    return %c0_i32, %c0_i32_0 : i32, i32
  }
  func.func @transform_2(%arg0: i32) -> (i32, i32) {
    %c0_i32 = arith.constant 0 : i32
    %c0_i32_0 = arith.constant 0 : i32
    %c0_i32_1 = arith.constant 0 : i32
    return %c0_i32, %c0_i32_0 : i32, i32
  }
  func.func @transform_3(%arg0: i32) -> (i32, i32) {
    %c0_i32 = arith.constant 0 : i32
    %c0_i32_0 = arith.constant 0 : i32
    return %arg0, %c0_i32 : i32, i32
  }
}

module attributes {stable_mosaic.version = 11 : i64} {
  func.func @_mm_bias_lrelu_kernel(%arg0: i32, %arg1: memref<256x128xbf16, #tpu.memory_space<vmem>>, %arg2: memref<128x128xbf16, #tpu.memory_space<vmem>>, %arg3: memref<1x128xf32, #tpu.memory_space<vmem>>, %arg4: memref<256x128xbf16, #tpu.memory_space<vmem>>) attributes {dimension_semantics = [#tpu.dimension_semantics<parallel>], iteration_bounds = array<i64: 2>, scalar_prefetch = 0 : i64, scratch_operands = 0 : i64, tpu.core_type = #tpu.core_type<tc>, window_params = [{transform_indices = @transform_0, window_bounds = array<i64: 256, 128>}, {pipeline_mode = #tpu.pipeline_mode<synchronous>, transform_indices = @transform_1, window_bounds = array<i64: 128, 128>}, {pipeline_mode = #tpu.pipeline_mode<synchronous>, transform_indices = @transform_2, window_bounds = array<i64: 1, 128>}, {transform_indices = @transform_3, window_bounds = array<i64: 256, 128>}]} {
    %c0 = arith.constant 0 : index
    %c0_0 = arith.constant 0 : index
    %0 = vector.load %arg1[%c0, %c0_0] : memref<256x128xbf16, #tpu.memory_space<vmem>>, vector<256x128xbf16>
    %c0_1 = arith.constant 0 : index
    %c0_2 = arith.constant 0 : index
    %1 = vector.load %arg2[%c0_1, %c0_2] : memref<128x128xbf16, #tpu.memory_space<vmem>>, vector<128x128xbf16>
    %cst = arith.constant dense<0.000000e+00> : vector<256x128xf32>
    %2 = tpu.matmul %0, %1, %cst {dimension_numbers = #tpu.dot_dimension_numbers<[1], [0], [0], [1], [0, 0, 1, 1], [], []>} : vector<256x128xbf16>, vector<128x128xbf16>, vector<256x128xf32> -> vector<256x128xf32>
    %c0_3 = arith.constant 0 : index
    %c0_4 = arith.constant 0 : index
    %3 = vector.load %arg3[%c0_3, %c0_4] : memref<1x128xf32, #tpu.memory_space<vmem>>, vector<1x128xf32>
    %4 = vector.broadcast %3 : vector<1x128xf32> to vector<256x128xf32>
    %5 = arith.addf %2, %4 : vector<256x128xf32>
    %cst_5 = arith.constant 0.000000e+00 : f32
    %6 = vector.broadcast %cst_5 : f32 to vector<256x128xf32>
    %7 = arith.cmpf oge, %5, %6 : vector<256x128xf32>
    %cst_6 = arith.constant 1.000000e-01 : f32
    %8 = vector.broadcast %cst_6 : f32 to vector<256x128xf32>
    %9 = arith.mulf %8, %5 : vector<256x128xf32>
    %10 = arith.select %7, %5, %9 : vector<256x128xi1>, vector<256x128xf32>
    %11 = arith.truncf %10 : vector<256x128xf32> to vector<256x128xbf16>
    %c0_7 = arith.constant 0 : index
    %c0_8 = arith.constant 0 : index
    %12 = vector.load %arg4[%c0_7, %c0_8] : memref<256x128xbf16, #tpu.memory_space<vmem>>, vector<256x128xbf16>
    tpu.vector_store %arg4[%c0_7, %c0_8], %11 {strides = array<i32>} : memref<256x128xbf16, #tpu.memory_space<vmem>>, vector<256x128xbf16>,
    return
  }
  func.func @transform_0(%arg0: i32) -> (i32, i32) {
    %c0_i32 = arith.constant 0 : i32
    %c0_i32_0 = arith.constant 0 : i32
    return %arg0, %c0_i32 : i32, i32
  }
  func.func @transform_1(%arg0: i32) -> (i32, i32) {
    %c0_i32 = arith.constant 0 : i32
    %c0_i32_0 = arith.constant 0 : i32
    %c0_i32_1 = arith.constant 0 : i32
    return %c0_i32, %c0_i32_0 : i32, i32
  }
  func.func @transform_2(%arg0: i32) -> (i32, i32) {
    %c0_i32 = arith.constant 0 : i32
    %c0_i32_0 = arith.constant 0 : i32
    %c0_i32_1 = arith.constant 0 : i32
    return %c0_i32, %c0_i32_0 : i32, i32
  }
  func.func @transform_3(%arg0: i32) -> (i32, i32) {
    %c0_i32 = arith.constant 0 : i32
    %c0_i32_0 = arith.constant 0 : i32
    return %arg0, %c0_i32 : i32, i32
  }
}

module attributes {stable_mosaic.version = 11 : i64} {
  func.func @_mm_bias_lrelu_kernel(%arg0: i32, %arg1: memref<256x144xbf16, #tpu.memory_space<vmem>>, %arg2: memref<144x128xbf16, #tpu.memory_space<vmem>>, %arg3: memref<1x128xf32, #tpu.memory_space<vmem>>, %arg4: memref<256x128xbf16, #tpu.memory_space<vmem>>) attributes {dimension_semantics = [#tpu.dimension_semantics<parallel>], iteration_bounds = array<i64: 2>, scalar_prefetch = 0 : i64, scratch_operands = 0 : i64, tpu.core_type = #tpu.core_type<tc>, window_params = [{transform_indices = @transform_0, window_bounds = array<i64: 256, 144>}, {pipeline_mode = #tpu.pipeline_mode<synchronous>, transform_indices = @transform_1, window_bounds = array<i64: 144, 128>}, {pipeline_mode = #tpu.pipeline_mode<synchronous>, transform_indices = @transform_2, window_bounds = array<i64: 1, 128>}, {transform_indices = @transform_3, window_bounds = array<i64: 256, 128>}]} {
    %c0 = arith.constant 0 : index
    %c0_0 = arith.constant 0 : index
    %0 = vector.load %arg1[%c0, %c0_0] : memref<256x144xbf16, #tpu.memory_space<vmem>>, vector<256x144xbf16>
    %c0_1 = arith.constant 0 : index
    %c0_2 = arith.constant 0 : index
    %1 = vector.load %arg2[%c0_1, %c0_2] : memref<144x128xbf16, #tpu.memory_space<vmem>>, vector<144x128xbf16>
    %cst = arith.constant dense<0.000000e+00> : vector<256x128xf32>
    %2 = tpu.matmul %0, %1, %cst {dimension_numbers = #tpu.dot_dimension_numbers<[1], [0], [0], [1], [0, 0, 1, 1], [], []>} : vector<256x144xbf16>, vector<144x128xbf16>, vector<256x128xf32> -> vector<256x128xf32>
    %c0_3 = arith.constant 0 : index
    %c0_4 = arith.constant 0 : index
    %3 = vector.load %arg3[%c0_3, %c0_4] : memref<1x128xf32, #tpu.memory_space<vmem>>, vector<1x128xf32>
    %4 = vector.broadcast %3 : vector<1x128xf32> to vector<256x128xf32>
    %5 = arith.addf %2, %4 : vector<256x128xf32>
    %cst_5 = arith.constant 0.000000e+00 : f32
    %6 = vector.broadcast %cst_5 : f32 to vector<256x128xf32>
    %7 = arith.cmpf oge, %5, %6 : vector<256x128xf32>
    %cst_6 = arith.constant 1.000000e-01 : f32
    %8 = vector.broadcast %cst_6 : f32 to vector<256x128xf32>
    %9 = arith.mulf %8, %5 : vector<256x128xf32>
    %10 = arith.select %7, %5, %9 : vector<256x128xi1>, vector<256x128xf32>
    %11 = arith.truncf %10 : vector<256x128xf32> to vector<256x128xbf16>
    %c0_7 = arith.constant 0 : index
    %c0_8 = arith.constant 0 : index
    %12 = vector.load %arg4[%c0_7, %c0_8] : memref<256x128xbf16, #tpu.memory_space<vmem>>, vector<256x128xbf16>
    tpu.vector_store %arg4[%c0_7, %c0_8], %11 {strides = array<i32>} : memref<256x128xbf16, #tpu.memory_space<vmem>>, vector<256x128xbf16>,
    return
  }
  func.func @transform_0(%arg0: i32) -> (i32, i32) {
    %c0_i32 = arith.constant 0 : i32
    %c0_i32_0 = arith.constant 0 : i32
    return %arg0, %c0_i32 : i32, i32
  }
  func.func @transform_1(%arg0: i32) -> (i32, i32) {
    %c0_i32 = arith.constant 0 : i32
    %c0_i32_0 = arith.constant 0 : i32
    %c0_i32_1 = arith.constant 0 : i32
    return %c0_i32, %c0_i32_0 : i32, i32
  }
  func.func @transform_2(%arg0: i32) -> (i32, i32) {
    %c0_i32 = arith.constant 0 : i32
    %c0_i32_0 = arith.constant 0 : i32
    %c0_i32_1 = arith.constant 0 : i32
    return %c0_i32, %c0_i32_0 : i32, i32
  }
  func.func @transform_3(%arg0: i32) -> (i32, i32) {
    %c0_i32 = arith.constant 0 : i32
    %c0_i32_0 = arith.constant 0 : i32
    return %arg0, %c0_i32 : i32, i32
  }
}

module attributes {stable_mosaic.version = 11 : i64} {
  func.func @_mm_bias_lrelu_kernel(%arg0: i32, %arg1: memref<256x72xbf16, #tpu.memory_space<vmem>>, %arg2: memref<72x128xbf16, #tpu.memory_space<vmem>>, %arg3: memref<1x128xf32, #tpu.memory_space<vmem>>, %arg4: memref<256x128xbf16, #tpu.memory_space<vmem>>) attributes {dimension_semantics = [#tpu.dimension_semantics<parallel>], iteration_bounds = array<i64: 2>, scalar_prefetch = 0 : i64, scratch_operands = 0 : i64, tpu.core_type = #tpu.core_type<tc>, window_params = [{transform_indices = @transform_0, window_bounds = array<i64: 256, 72>}, {pipeline_mode = #tpu.pipeline_mode<synchronous>, transform_indices = @transform_1, window_bounds = array<i64: 72, 128>}, {pipeline_mode = #tpu.pipeline_mode<synchronous>, transform_indices = @transform_2, window_bounds = array<i64: 1, 128>}, {transform_indices = @transform_3, window_bounds = array<i64: 256, 128>}]} {
    %c0 = arith.constant 0 : index
    %c0_0 = arith.constant 0 : index
    %0 = vector.load %arg1[%c0, %c0_0] : memref<256x72xbf16, #tpu.memory_space<vmem>>, vector<256x72xbf16>
    %c0_1 = arith.constant 0 : index
    %c0_2 = arith.constant 0 : index
    %1 = vector.load %arg2[%c0_1, %c0_2] : memref<72x128xbf16, #tpu.memory_space<vmem>>, vector<72x128xbf16>
    %cst = arith.constant dense<0.000000e+00> : vector<256x128xf32>
    %2 = tpu.matmul %0, %1, %cst {dimension_numbers = #tpu.dot_dimension_numbers<[1], [0], [0], [1], [0, 0, 1, 1], [], []>} : vector<256x72xbf16>, vector<72x128xbf16>, vector<256x128xf32> -> vector<256x128xf32>
    %c0_3 = arith.constant 0 : index
    %c0_4 = arith.constant 0 : index
    %3 = vector.load %arg3[%c0_3, %c0_4] : memref<1x128xf32, #tpu.memory_space<vmem>>, vector<1x128xf32>
    %4 = vector.broadcast %3 : vector<1x128xf32> to vector<256x128xf32>
    %5 = arith.addf %2, %4 : vector<256x128xf32>
    %cst_5 = arith.constant 0.000000e+00 : f32
    %6 = vector.broadcast %cst_5 : f32 to vector<256x128xf32>
    %7 = arith.cmpf oge, %5, %6 : vector<256x128xf32>
    %cst_6 = arith.constant 1.000000e-01 : f32
    %8 = vector.broadcast %cst_6 : f32 to vector<256x128xf32>
    %9 = arith.mulf %8, %5 : vector<256x128xf32>
    %10 = arith.select %7, %5, %9 : vector<256x128xi1>, vector<256x128xf32>
    %11 = arith.truncf %10 : vector<256x128xf32> to vector<256x128xbf16>
    %c0_7 = arith.constant 0 : index
    %c0_8 = arith.constant 0 : index
    %12 = vector.load %arg4[%c0_7, %c0_8] : memref<256x128xbf16, #tpu.memory_space<vmem>>, vector<256x128xbf16>
    tpu.vector_store %arg4[%c0_7, %c0_8], %11 {strides = array<i32>} : memref<256x128xbf16, #tpu.memory_space<vmem>>, vector<256x128xbf16>,
    return
  }
  func.func @transform_0(%arg0: i32) -> (i32, i32) {
    %c0_i32 = arith.constant 0 : i32
    %c0_i32_0 = arith.constant 0 : i32
    return %arg0, %c0_i32 : i32, i32
  }
  func.func @transform_1(%arg0: i32) -> (i32, i32) {
    %c0_i32 = arith.constant 0 : i32
    %c0_i32_0 = arith.constant 0 : i32
    %c0_i32_1 = arith.constant 0 : i32
    return %c0_i32, %c0_i32_0 : i32, i32
  }
  func.func @transform_2(%arg0: i32) -> (i32, i32) {
    %c0_i32 = arith.constant 0 : i32
    %c0_i32_0 = arith.constant 0 : i32
    %c0_i32_1 = arith.constant 0 : i32
    return %c0_i32, %c0_i32_0 : i32, i32
  }
  func.func @transform_3(%arg0: i32) -> (i32, i32) {
    %c0_i32 = arith.constant 0 : i32
    %c0_i32_0 = arith.constant 0 : i32
    return %arg0, %c0_i32 : i32, i32
  }
}

module attributes {stable_mosaic.version = 11 : i64} {
  func.func @_mm_head_kernel(%arg0: i32, %arg1: memref<256x216xbf16, #tpu.memory_space<vmem>>, %arg2: memref<216x128xbf16, #tpu.memory_space<vmem>>, %arg3: memref<1x128xf32, #tpu.memory_space<vmem>>, %arg4: memref<128x3xf32, #tpu.memory_space<vmem>>, %arg5: memref<1x3xf32, #tpu.memory_space<vmem>>, %arg6: memref<256x3xf32, #tpu.memory_space<vmem>>, %arg7: memref<256x3xf32, #tpu.memory_space<vmem>>) attributes {dimension_semantics = [#tpu.dimension_semantics<parallel>], iteration_bounds = array<i64: 2>, scalar_prefetch = 0 : i64, scratch_operands = 0 : i64, tpu.core_type = #tpu.core_type<tc>, window_params = [{transform_indices = @transform_0, window_bounds = array<i64: 256, 216>}, {pipeline_mode = #tpu.pipeline_mode<synchronous>, transform_indices = @transform_1, window_bounds = array<i64: 216, 128>}, {pipeline_mode = #tpu.pipeline_mode<synchronous>, transform_indices = @transform_2, window_bounds = array<i64: 1, 128>}, {pipeline_mode = #tpu.pipeline_mode<synchronous>, transform_indices = @transform_3, window_bounds = array<i64: 128, 3>}, {pipeline_mode = #tpu.pipeline_mode<synchronous>, transform_indices = @transform_4, window_bounds = array<i64: 1, 3>}, {transform_indices = @transform_5, window_bounds = array<i64: 256, 3>}, {transform_indices = @transform_6, window_bounds = array<i64: 256, 3>}]} {
    %c0 = arith.constant 0 : index
    %c0_0 = arith.constant 0 : index
    %0 = vector.load %arg1[%c0, %c0_0] : memref<256x216xbf16, #tpu.memory_space<vmem>>, vector<256x216xbf16>
    %c0_1 = arith.constant 0 : index
    %c0_2 = arith.constant 0 : index
    %1 = vector.load %arg2[%c0_1, %c0_2] : memref<216x128xbf16, #tpu.memory_space<vmem>>, vector<216x128xbf16>
    %cst = arith.constant dense<0.000000e+00> : vector<256x128xf32>
    %2 = tpu.matmul %0, %1, %cst {dimension_numbers = #tpu.dot_dimension_numbers<[1], [0], [0], [1], [0, 0, 1, 1], [], []>} : vector<256x216xbf16>, vector<216x128xbf16>, vector<256x128xf32> -> vector<256x128xf32>
    %c0_3 = arith.constant 0 : index
    %c0_4 = arith.constant 0 : index
    %3 = vector.load %arg3[%c0_3, %c0_4] : memref<1x128xf32, #tpu.memory_space<vmem>>, vector<1x128xf32>
    %4 = vector.broadcast %3 : vector<1x128xf32> to vector<256x128xf32>
    %5 = arith.addf %2, %4 : vector<256x128xf32>
    %cst_5 = arith.constant 0.000000e+00 : f32
    %6 = vector.broadcast %cst_5 : f32 to vector<256x128xf32>
    %7 = arith.cmpf oge, %5, %6 : vector<256x128xf32>
    %cst_6 = arith.constant 1.000000e-01 : f32
    %8 = vector.broadcast %cst_6 : f32 to vector<256x128xf32>
    %9 = arith.mulf %8, %5 : vector<256x128xf32>
    %10 = arith.select %7, %5, %9 : vector<256x128xi1>, vector<256x128xf32>
    %c0_7 = arith.constant 0 : index
    %c0_8 = arith.constant 0 : index
    %11 = vector.load %arg4[%c0_7, %c0_8] : memref<128x3xf32, #tpu.memory_space<vmem>>, vector<128x3xf32>
    %cst_9 = arith.constant dense<0.000000e+00> : vector<256x3xf32>
    %12 = tpu.matmul %10, %11, %cst_9 {dimension_numbers = #tpu.dot_dimension_numbers<[1], [0], [0], [1], [0, 0, 1, 1], [], []>} : vector<256x128xf32>, vector<128x3xf32>, vector<256x3xf32> -> vector<256x3xf32>
    %c0_10 = arith.constant 0 : index
    %c0_11 = arith.constant 0 : index
    %13 = vector.load %arg5[%c0_10, %c0_11] : memref<1x3xf32, #tpu.memory_space<vmem>>, vector<1x3xf32>
    %14 = vector.broadcast %13 : vector<1x3xf32> to vector<256x3xf32>
    %15 = arith.addf %12, %14 : vector<256x3xf32>
    %c0_12 = arith.constant 0 : index
    %c0_13 = arith.constant 0 : index
    %16 = vector.load %arg6[%c0_12, %c0_13] : memref<256x3xf32, #tpu.memory_space<vmem>>, vector<256x3xf32>
    %17 = arith.addf %15, %16 : vector<256x3xf32>
    %c0_14 = arith.constant 0 : index
    %c0_15 = arith.constant 0 : index
    %18 = vector.load %arg7[%c0_14, %c0_15] : memref<256x3xf32, #tpu.memory_space<vmem>>, vector<256x3xf32>
    tpu.vector_store %arg7[%c0_14, %c0_15], %17 {strides = array<i32>} : memref<256x3xf32, #tpu.memory_space<vmem>>, vector<256x3xf32>,
    return
  }
  func.func @transform_0(%arg0: i32) -> (i32, i32) {
    %c0_i32 = arith.constant 0 : i32
    %c0_i32_0 = arith.constant 0 : i32
    return %arg0, %c0_i32 : i32, i32
  }
  func.func @transform_1(%arg0: i32) -> (i32, i32) {
    %c0_i32 = arith.constant 0 : i32
    %c0_i32_0 = arith.constant 0 : i32
    %c0_i32_1 = arith.constant 0 : i32
    return %c0_i32, %c0_i32_0 : i32, i32
  }
  func.func @transform_2(%arg0: i32) -> (i32, i32) {
    %c0_i32 = arith.constant 0 : i32
    %c0_i32_0 = arith.constant 0 : i32
    %c0_i32_1 = arith.constant 0 : i32
    return %c0_i32, %c0_i32_0 : i32, i32
  }
  func.func @transform_3(%arg0: i32) -> (i32, i32) {
    %c0_i32 = arith.constant 0 : i32
    %c0_i32_0 = arith.constant 0 : i32
    %c0_i32_1 = arith.constant 0 : i32
    return %c0_i32, %c0_i32_0 : i32, i32
  }
  func.func @transform_4(%arg0: i32) -> (i32, i32) {
    %c0_i32 = arith.constant 0 : i32
    %c0_i32_0 = arith.constant 0 : i32
    %c0_i32_1 = arith.constant 0 : i32
    return %c0_i32, %c0_i32_0 : i32, i32
  }
  func.func @transform_5(%arg0: i32) -> (i32, i32) {
    %c0_i32 = arith.constant 0 : i32
    %c0_i32_0 = arith.constant 0 : i32
    return %arg0, %c0_i32 : i32, i32
  }
  func.func @transform_6(%arg0: i32) -> (i32, i32) {
    %c0_i32 = arith.constant 0 : i32
    %c0_i32_0 = arith.constant 0 : i32
    return %arg0, %c0_i32 : i32, i32
  }
}

</mosaic_0001>

<bundles_post_ra>
// kernel: pallas_forward.7
= control target key start
LH: loop header
LB: loop body
LE: loop exit
PB: predicated region body
PF: predicated region fallthrough
CT: control target
= control target key end

     0   :  { %s340_s9 = smov 0   ;;  %s364_s0 = inlined_call_operand.vmem [shape: f32[32,256], index: 0, kind: input, shape index: {}]   ;;  %s365_s1 = inlined_call_operand.vmem [shape: bf16[32,256], index: 1, kind: output, shape index: {0}]   ;;  %s366_s2 = inlined_call_operand.vmem [shape: f32[32,1], index: 2, kind: output, shape index: {1}]  }
   0x1 LB: > { %s288_s10 = sadd.s32 4294967295, %s322_s9   ;;  %p292_p0 = scmp.ge.s32.totalorder %s322_s9, 1  ;;  %s322_s9 = sphi %s340_s9, %s13_s9  }
   0x2   : > { %p117_p1 = scmp.lt.s32.totalorder %s322_s9, 3 }
   0x4   : > { %p118_p2 = pnand %p292_p0, %p117_p1 }
   0x5   : > { %s293_s11 = sshll.u32 (!%p118_p2), %s288_s10, 1 }
   0x6   : > { %121 = sbr.rel (%p118_p2) target bundleno = 148 (0x94), region = 24  ;;  %p147_p3 = scmp.lt.s32.totalorder (!%p118_p2), %s293_s11, 3 }
   0xb   : > { %s368_s11 = smov (!%p147_p3, %s293_s11), 3  ;;  %v324_v6 = vmov 256.0   ;;  %vm193_vm1 = vcmask 7168  }
   0xc   : > { %s303_s12 = sshll.u32 %s368_s11, 4  ;;  %314 = vrcp.f32 %v324_v6  ;;  %s304_s16 = sshll.u32 %s368_s11, 3 }
   0xd   : > { %s151_s15 = scalar_lea.vmem %s364_s0, %s303_s12  ;;  %s164_s19 = scalar_lea.vmem %s366_s2, %s304_s16 }
   0xe   : > { %v166_v0 = vld [vmem:[%s151_s15] sm:$0xff]  ;;  %v167_v1 = vld [vmem:[%s151_s15 + $0x8] sm:$0xff]  ;;  %v168_v3 = vld [vmem:[%s151_s15 + $0x10] sm:$0xff]  ;;  %s158_s22 = scalar_lea.vmem %s365_s1, %s304_s16 }
   0xf   : > { %v170_v2 = vadd.f32 %v167_v1, %v166_v0  ;;  %v169_v4 = vld [vmem:[%s151_s15 + $0x18] sm:$0xff] }
  0x10   : > { %v173_v5 = vadd.f32 %v169_v4, %v168_v3 }
  0x11   : > { %171 = vadd.xlane.f32.xlu0 %v170_v2 }
  0x12   : > { %v315_v7 = vpop.eup %314 }
  0x13   : > { %v177_v8 = vmul.f32 256.0, %v315_v7  ;;  %vm181_vm0 = vweird.f32 %v315_v7 }
  0x15   : > { %v178_v9 = vsub.f32 1.0, %v177_v8 }
  0x17   : > { %v179_v10 = vmul.f32 %v315_v7, %v178_v9 }
  0x19   : > { %174 = vadd.xlane.f32.xlu0 %v173_v5  ;;  %v180_v11 = vadd.f32 %v315_v7, %v179_v10 }
  0x1b   : > { %v182_v12 = vsel %vm181_vm0, %v315_v7, %v180_v11 }
  0x84   : > { %v172_v13 = vpop.xlane.xlu0 %171 }
  0x85   : > { %v183_v14 = vmul.f32 %v182_v12, %v172_v13 }
  0x87   : > { %v185_v15 = vsub.f32 %v166_v0, %v183_v14  ;;  %v186_v16 = vsub.f32 %v167_v1, %v183_v14  ;;  %194 = vst.msk [vmem:[%s164_s19] sm:$0xff] %vm193_vm1, %v183_v14 }
  0x89   : > { %v189_v17 = vpack.c.bf16 %v186_v16, %v185_v15 }
  0x8b   : > { %191 = vst [vmem:[%s158_s22] sm:$0xff] %v189_v17 }
  0x8c   : > { %v175_v18 = vpop.xlane.xlu0 %174 }
  0x8d   : > { %v184_v19 = vmul.f32 %v182_v12, %v175_v18 }
  0x8f   : > { %v187_v20 = vsub.f32 %v168_v3, %v184_v19  ;;  %v188_v21 = vsub.f32 %v169_v4, %v184_v19  ;;  %195 = vst.msk [vmem:[%s164_s19 + $0x8] sm:$0xff] %vm193_vm1, %v184_v19 }
  0x91   : > { %v190_v22 = vpack.c.bf16 %v188_v21, %v187_v20 }
  0x93   : > { %192 = vst [vmem:[%s158_s22 + $0x8] sm:$0xff] %v190_v22 }
  0x94 PF: > { %s13_s9 = sadd.s32 1, %s322_s9  }
  0x95   : > { %p10_p4 = scmp.ge.s32.totalorder %s13_s9, 4  }
  0x97   :  { %12 = sbr.rel (!%p10_p4) target bundleno = 1 (0x1), region = 66 }

// kernel: pallas_forward.8
= control target key start
LH: loop header
LB: loop body
LE: loop exit
PB: predicated region body
PF: predicated region fallthrough
CT: control target
= control target key end

     0   :  { %s1571_s12 = smov 0   ;;  %s1782_s0 = inlined_call_operand.vmem [shape: bf16[2048,81], index: 0, kind: input, shape index: {}]   ;;  %s1783_s1 = inlined_call_operand.vmem [shape: bf16[81,128], index: 1, kind: input, shape index: {}]   ;;  %s1784_s2 = inlined_call_operand.vmem [shape: f32[1,128], index: 2, kind: input, shape index: {}]   ;;  %s1785_s3 = inlined_call_operand.vmem [shape: bf16[2048,128], index: 3, kind: output, shape index: {}]  }
   0x1 LB: > { %s1095_s13 = sadd.s32 4294967295, %s1548_s12   ;;  %p1099_p0 = scmp.ge.s32.totalorder %s1548_s12, 1  ;;  %s1548_s12 = sphi %s1571_s12, %s13_s12  }
   0x2   : > { %p138_p1 = scmp.lt.s32.totalorder %s1548_s12, 5 }
   0x4   : > { %p139_p2 = pnand %p1099_p0, %p138_p1 }
   0x5   : > { %s1100_s18 = sshll.u32 (!%p139_p2), %s1095_s13, 6 }
   0x6   : > { %142 = sbr.rel (%p139_p2) target bundleno = 303 (0x12f), region = 32  ;;  %p163_p3 = scmp.lt.s32.totalorder (!%p139_p2), %s1100_s18, 255 }
   0xb   : > { %v249_v0 = vld [vmem:[%s1783_s1 + $0x28] sm:$0x1]  ;;  %vm544_vm0 = vcmask 1040384   ;;  %v1550_v2 = vmov 0   ;;  %v1322_v6 = vld [vmem:[%s1783_s1 + $0x20] sm:$0xff]  ;;  %v1321_v7 = vld [vmem:[%s1783_s1 + $0x18] sm:$0xff] }
   0xc   : > { %v435_v1 = vunpack.c.l.b16 %v249_v0  ;;  %v546_v3 = vsel %vm544_vm0, 65535, %v1550_v2  ;;  %v1320_v8 = vld [vmem:[%s1783_s1 + $0x10] sm:$0xff]  ;;  %s1787_s18 = smov (!%p163_p3, %s1100_s18), 255  ;;  %v1319_v9 = vld [vmem:[%s1783_s1 + $0x8] sm:$0xff]  ;;  %v1318_v10 = vld [vmem:[%s1783_s1] sm:$0xff]  ;;  %vm447_vm1 = vcmask 662528  }
   0xd   : > { %s1101_s25 = sshll.u32 %s1787_s18, 2  ;;  %v1674_v45 = vld [vmem:[%s1784_s2] ss:$0 sm:$0xff] }
   0xe   : > { %v441_v4 = vpack.c.b16 %v435_v1, %v435_v1  ;;  %s1605_s30 = scalar_lea.vmem %s1782_s0, %s1101_s25  ;;  %s1687_s8 = scalar_lea.vmem %s1785_s3, %s1101_s25 }
   0xf   : > { %v1286_v11 = vld [vmem:[%s1605_s30] sm:$0xff]  ;;  %v1287_v15 = vld [vmem:[%s1605_s30 + $0x8] sm:$0xff]  ;;  %v1288_v19 = vld [vmem:[%s1605_s30 + $0x10] sm:$0xff] }
  0x10   : > { %v548_v5 = vand.u32 %v546_v3, %v441_v4  ;;  %v1294_v12 = vld [vmem:[%s1605_s30 + $0x40] sm:$0xff]  ;;  %v1295_v16 = vld [vmem:[%s1605_s30 + $0x48] sm:$0xff]  ;;  %v1296_v20 = vld [vmem:[%s1605_s30 + $0x50] sm:$0xff] }
  0x11   : > { %v1302_v13 = vld [vmem:[%s1605_s30 + $0x80] sm:$0xff]  ;;  %v1303_v17 = vld [vmem:[%s1605_s30 + $0x88] sm:$0xff]  ;;  %v1304_v21 = vld [vmem:[%s1605_s30 + $0x90] sm:$0xff] }
  0x12   : > { %552 = vmatpush.bf16.msra.mxu0 %v548_v5  ;;  %1514 = vmatpush.bf16.msra.mxu1 %v548_v5  ;;  %v1310_v14 = vld [vmem:[%s1605_s30 + $0xc0] sm:$0xff]  ;;  %v1311_v18 = vld [vmem:[%s1605_s30 + $0xc8] sm:$0xff]  ;;  %v1312_v22 = vld [vmem:[%s1605_s30 + $0xd0] sm:$0xff] }
  0x13   : > { %1515 = vmatpush.bf16.msra.mxu2 %v548_v5  ;;  %1516 = vmatpush.bf16.msra.mxu3 %v548_v5  ;;  %v1289_v23 = vld [vmem:[%s1605_s30 + $0x18] sm:$0xff]  ;;  %v1290_v27 = vld [vmem:[%s1605_s30 + $0x20] sm:$0xff]  ;;  %v1291_v31 = vld [vmem:[%s1605_s30 + $0x28] sm:$0xff] }
  0x14   : > { %v1297_v24 = vld [vmem:[%s1605_s30 + $0x58] sm:$0xff]  ;;  %v1298_v28 = vld [vmem:[%s1605_s30 + $0x60] sm:$0xff]  ;;  %v1299_v32 = vld [vmem:[%s1605_s30 + $0x68] sm:$0xff] }
  0x15   : > { %v1305_v25 = vld [vmem:[%s1605_s30 + $0x98] sm:$0xff]  ;;  %v1306_v29 = vld [vmem:[%s1605_s30 + $0xa0] sm:$0xff]  ;;  %v1307_v33 = vld [vmem:[%s1605_s30 + $0xa8] sm:$0xff] }
  0x16   : > { %553 = vmatpush.bf16.msra.mxu0 %v1322_v6  ;;  %1517 = vmatpush.bf16.msra.mxu1 %v1322_v6  ;;  %v1313_v26 = vld [vmem:[%s1605_s30 + $0xd8] sm:$0xff]  ;;  %v1314_v30 = vld [vmem:[%s1605_s30 + $0xe0] sm:$0xff]  ;;  %v1315_v34 = vld [vmem:[%s1605_s30 + $0xe8] sm:$0xff] }
  0x17   : > { %1518 = vmatpush.bf16.msra.mxu2 %v1322_v6  ;;  %1519 = vmatpush.bf16.msra.mxu3 %v1322_v6  ;;  %v1292_v35 = vld [vmem:[%s1605_s30 + $0x30] sm:$0xff]  ;;  %v1293_v39 = vld [vmem:[%s1605_s30 + $0x38] sm:$0xff] }
  0x18   : > { %v1300_v36 = vld [vmem:[%s1605_s30 + $0x70] sm:$0xff]  ;;  %v1301_v40 = vld [vmem:[%s1605_s30 + $0x78] sm:$0xff] }
  0x19   : > { %v1308_v37 = vld [vmem:[%s1605_s30 + $0xb0] sm:$0xff]  ;;  %v1309_v41 = vld [vmem:[%s1605_s30 + $0xb8] sm:$0xff] }
  0x1a   : > { %554 = vmatpush.bf16.msra.mxu0 %v1321_v7  ;;  %1520 = vmatpush.bf16.msra.mxu1 %v1321_v7  ;;  %v1316_v38 = vld [vmem:[%s1605_s30 + $0xf0] sm:$0xff]  ;;  %v1317_v42 = vld [vmem:[%s1605_s30 + $0xf8] sm:$0xff] }
  0x1b   : > { %1521 = vmatpush.bf16.msra.mxu2 %v1321_v7  ;;  %1522 = vmatpush.bf16.msra.mxu3 %v1321_v7 }
  0x1e   : > { %555 = vmatpush.bf16.msra.mxu0 %v1320_v8  ;;  %1523 = vmatpush.bf16.msra.mxu1 %v1320_v8 }
  0x1f   : > { %1524 = vmatpush.bf16.msra.mxu2 %v1320_v8  ;;  %1525 = vmatpush.bf16.msra.mxu3 %v1320_v8 }
  0x22   : > { %556 = vmatpush.bf16.msra.mxu0 %v1319_v9  ;;  %1526 = vmatpush.bf16.msra.mxu1 %v1319_v9 }
  0x23   : > { %1527 = vmatpush.bf16.msra.mxu2 %v1319_v9  ;;  %1528 = vmatpush.bf16.msra.mxu3 %v1319_v9 }
  0x26   : > { %557 = vmatpush.bf16.msra.mxu0 %v1318_v10  ;;  %1529 = vmatpush.bf16.msra.mxu1 %v1318_v10 }
  0x27   : > { %1530 = vmatpush.bf16.msra.mxu2 %v1318_v10  ;;  %1531 = vmatpush.bf16.msra.mxu3 %v1318_v10 }
  0x29   : > { %1252 = vmatmul.msk.bf16.vlgmr.msra.gmra.mxu0 %vm447_vm1, %v1286_v11  ;;  %1260 = vmatmul.msk.bf16.vlgmr.msra.gmra.mxu1 %vm447_vm1, %v1294_v12 }
  0x2a   : > { %1268 = vmatmul.msk.bf16.vlgmr.msra.gmra.mxu2 %vm447_vm1, %v1302_v13  ;;  %1276 = vmatmul.msk.bf16.vlgmr.msra.gmra.mxu3 %vm447_vm1, %v1310_v14 }
  0x39   : > { %1253 = vmatmul.msk.bf16.gmra.mxu0 %vm447_vm1, %v1287_v15  ;;  %1261 = vmatmul.msk.bf16.gmra.mxu1 %vm447_vm1, %v1295_v16 }
  0x3a   : > { %1269 = vmatmul.msk.bf16.gmra.mxu2 %vm447_vm1, %v1303_v17  ;;  %1277 = vmatmul.msk.bf16.gmra.mxu3 %vm447_vm1, %v1311_v18 }
  0x49   : > { %1254 = vmatmul.msk.bf16.gmra.mxu0 %vm447_vm1, %v1288_v19  ;;  %1262 = vmatmul.msk.bf16.gmra.mxu1 %vm447_vm1, %v1296_v20 }
  0x4a   : > { %1270 = vmatmul.msk.bf16.gmra.mxu2 %vm447_vm1, %v1304_v21  ;;  %1278 = vmatmul.msk.bf16.gmra.mxu3 %vm447_vm1, %v1312_v22 }
  0x59   : > { %1255 = vmatmul.msk.bf16.gmra.mxu0 %vm447_vm1, %v1289_v23  ;;  %1263 = vmatmul.msk.bf16.gmra.mxu1 %vm447_vm1, %v1297_v24 }
  0x5a   : > { %1271 = vmatmul.msk.bf16.gmra.mxu2 %vm447_vm1, %v1305_v25  ;;  %1279 = vmatmul.msk.bf16.gmra.mxu3 %vm447_vm1, %v1313_v26 }
  0x69   : > { %1256 = vmatmul.msk.bf16.gmra.mxu0 %vm447_vm1, %v1290_v27  ;;  %1264 = vmatmul.msk.bf16.gmra.mxu1 %vm447_vm1, %v1298_v28 }
  0x6a   : > { %1272 = vmatmul.msk.bf16.gmra.mxu2 %vm447_vm1, %v1306_v29  ;;  %1280 = vmatmul.msk.bf16.gmra.mxu3 %vm447_vm1, %v1314_v30 }
  0x79   : > { %1257 = vmatmul.msk.bf16.gmra.mxu0 %vm447_vm1, %v1291_v31  ;;  %1265 = vmatmul.msk.bf16.gmra.mxu1 %vm447_vm1, %v1299_v32 }
  0x7a   : > { %1273 = vmatmul.msk.bf16.gmra.mxu2 %vm447_vm1, %v1307_v33  ;;  %1281 = vmatmul.msk.bf16.gmra.mxu3 %vm447_vm1, %v1315_v34 }
  0x89   : > { %1258 = vmatmul.msk.bf16.gmra.mxu0 %vm447_vm1, %v1292_v35  ;;  %1266 = vmatmul.msk.bf16.gmra.mxu1 %vm447_vm1, %v1300_v36 }
  0x8a   : > { %1274 = vmatmul.msk.bf16.gmra.mxu2 %vm447_vm1, %v1308_v37  ;;  %1282 = vmatmul.msk.bf16.gmra.mxu3 %vm447_vm1, %v1316_v38 }
  0x99   : > { %1259 = vmatmul.msk.bf16.gmra.mxu0 %vm447_vm1, %v1293_v39  ;;  %1267 = vmatmul.msk.bf16.gmra.mxu1 %vm447_vm1, %v1301_v40 }
  0x9a   : > { %1275 = vmatmul.msk.bf16.gmra.mxu2 %vm447_vm1, %v1309_v41  ;;  %1283 = vmatmul.msk.bf16.gmra.mxu3 %vm447_vm1, %v1317_v42 }
  0xa6   : > { %v559_v43 = vpop.f32.mrf.mxu0  ;;  %v599_v44 = vpop.f32.mrf.mxu1 }
  0xa7   : > { %v560_v46 = vadd.f32 %v1674_v45, %v559_v43  ;;  %v600_v47 = vadd.f32 %v1674_v45, %v599_v44 }
  0xa9   : > { %v783_v52 = vmul.f32 0.1, %v560_v46  ;;  %v799_v53 = vmul.f32 0.1, %v600_v47  ;;  %vm719_vm2 = vcmp.ge.f32.partialorder %v560_v46, 0.0  ;;  %vm735_vm3 = vcmp.ge.f32.partialorder %v600_v47, 0.0 }
  0xab   : > { %v847_v60 = vsel %vm719_vm2, %v560_v46, %v783_v52  ;;  %v863_v61 = vsel %vm735_vm3, %v600_v47, %v799_v53 }
  0xad   : > { %v639_v48 = vpop.f32.mrf.mxu2  ;;  %v679_v49 = vpop.f32.mrf.mxu3 }
  0xae   : > { %v561_v50 = vpop.f32.mrf.mxu0  ;;  %v601_v51 = vpop.f32.mrf.mxu1  ;;  %v640_v58 = vadd.f32 %v1674_v45, %v639_v48  ;;  %v680_v59 = vadd.f32 %v1674_v45, %v679_v49 }
  0xaf   : > { %v562_v54 = vadd.f32 %v1674_v45, %v561_v50  ;;  %v602_v55 = vadd.f32 %v1674_v45, %v601_v51 }
  0xb0   : > { %v815_v4 = vmul.f32 0.1, %v640_v58  ;;  %v831_v5 = vmul.f32 0.1, %v680_v59  ;;  %vm751_vm6 = vcmp.ge.f32.partialorder %v640_v58, 0.0  ;;  %vm767_vm7 = vcmp.ge.f32.partialorder %v680_v59, 0.0 }
  0xb1   : > { %vm720_vm4 = vcmp.ge.f32.partialorder %v562_v54, 0.0  ;;  %v784_v56 = vmul.f32 0.1, %v562_v54  ;;  %vm736_vm5 = vcmp.ge.f32.partialorder %v602_v55, 0.0  ;;  %v800_v57 = vmul.f32 0.1, %v602_v55 }
  0xb2   : > { %v879_v12 = vsel %vm751_vm6, %v640_v58, %v815_v4  ;;  %v895_v13 = vsel %vm767_vm7, %v680_v59, %v831_v5 }
  0xb3   : > { %v848_v62 = vsel %vm720_vm4, %v562_v54, %v784_v56  ;;  %v864_v63 = vsel %vm736_vm5, %v602_v55, %v800_v57 }
  0xb4   : > { %v1326_v0 = vpack.c.bf16 %v848_v62, %v847_v60  ;;  %v1366_v1 = vpack.c.bf16 %v864_v63, %v863_v61 }
  0xb5   : > { %v641_v2 = vpop.f32.mrf.mxu2  ;;  %v681_v3 = vpop.f32.mrf.mxu3 }
  0xb6   : > { %1327 = vst [vmem:[%s1687_s8] sm:$0xff] %v1326_v0   ;;  %v642_v6 = vadd.f32 %v1674_v45, %v641_v2  ;;  %v682_v7 = vadd.f32 %v1674_v45, %v681_v3  ;;  %v564_v8 = vpop.f32.mrf.mxu0  ;;  %v604_v9 = vpop.f32.mrf.mxu1 }
  0xb7   : > { %1490 = vst [vmem:[%s1687_s8 + $0x40] sm:$0xff] %v1366_v1   ;;  %v565_v18 = vadd.f32 %v1674_v45, %v564_v8  ;;  %v605_v19 = vadd.f32 %v1674_v45, %v604_v9 }
  0xb8   : > { %vm752_vm8 = vcmp.ge.f32.partialorder %v642_v6, 0.0  ;;  %v816_v10 = vmul.f32 0.1, %v642_v6  ;;  %vm768_vm9 = vcmp.ge.f32.partialorder %v682_v7, 0.0  ;;  %v832_v11 = vmul.f32 0.1, %v682_v7 }
  0xb9   : > { %v785_v24 = vmul.f32 0.1, %v565_v18  ;;  %v801_v25 = vmul.f32 0.1, %v605_v19  ;;  %vm721_vm10 = vcmp.ge.f32.partialorder %v565_v18, 0.0  ;;  %vm737_vm11 = vcmp.ge.f32.partialorder %v605_v19, 0.0 }
  0xba   : > { %v880_v14 = vsel %vm752_vm8, %v642_v6, %v816_v10  ;;  %v896_v15 = vsel %vm768_vm9, %v682_v7, %v832_v11 }
  0xbb   : > { %v1406_v16 = vpack.c.bf16 %v880_v14, %v879_v12  ;;  %v1446_v17 = vpack.c.bf16 %v896_v15, %v895_v13  ;;  %v849_v32 = vsel %vm721_vm10, %v565_v18, %v785_v24  ;;  %v865_v33 = vsel %vm737_vm11, %v605_v19, %v801_v25 }
  0xbd   : > { %1498 = vst [vmem:[%s1687_s8 + $0x80] sm:$0xff] %v1406_v16   ;;  %v644_v20 = vpop.f32.mrf.mxu2  ;;  %v684_v21 = vpop.f32.mrf.mxu3 }
  0xbe   : > { %1506 = vst [vmem:[%s1687_s8 + $0xc0] sm:$0xff] %v1446_v17   ;;  %v566_v22 = vpop.f32.mrf.mxu0  ;;  %v606_v23 = vpop.f32.mrf.mxu1  ;;  %v645_v30 = vadd.f32 %v1674_v45, %v644_v20  ;;  %v685_v31 = vadd.f32 %v1674_v45, %v684_v21 }
  0xbf   : > { %v567_v26 = vadd.f32 %v1674_v45, %v566_v22  ;;  %v607_v27 = vadd.f32 %v1674_v45, %v606_v23 }
  0xc0   : > { %v817_v40 = vmul.f32 0.1, %v645_v30  ;;  %v833_v41 = vmul.f32 0.1, %v685_v31  ;;  %vm753_vm14 = vcmp.ge.f32.partialorder %v645_v30, 0.0  ;;  %vm769_vm15 = vcmp.ge.f32.partialorder %v685_v31, 0.0 }
  0xc1   : > { %vm722_vm12 = vcmp.ge.f32.partialorder %v567_v26, 0.0  ;;  %v786_v28 = vmul.f32 0.1, %v567_v26  ;;  %vm738_vm13 = vcmp.ge.f32.partialorder %v607_v27, 0.0  ;;  %v802_v29 = vmul.f32 0.1, %v607_v27 }
  0xc2   : > { %v881_v49 = vsel %vm753_vm14, %v645_v30, %v817_v40  ;;  %v897_v50 = vsel %vm769_vm15, %v685_v31, %v833_v41 }
  0xc3   : > { %v850_v34 = vsel %vm722_vm12, %v567_v26, %v786_v28  ;;  %v866_v35 = vsel %vm738_vm13, %v607_v27, %v802_v29 }
  0xc4   : > { %v1331_v36 = vpack.c.bf16 %v850_v34, %v849_v32  ;;  %v1371_v37 = vpack.c.bf16 %v866_v35, %v865_v33 }
  0xc5   : > { %v646_v38 = vpop.f32.mrf.mxu2  ;;  %v686_v39 = vpop.f32.mrf.mxu3 }
  0xc6   : > { %1483 = vst [vmem:[%s1687_s8 + $0x8] sm:$0xff] %v1331_v36   ;;  %v647_v42 = vadd.f32 %v1674_v45, %v646_v38  ;;  %v687_v43 = vadd.f32 %v1674_v45, %v686_v39  ;;  %v569_v44 = vpop.f32.mrf.mxu0  ;;  %v609_v46 = vpop.f32.mrf.mxu1 }
  0xc7   : > { %1491 = vst [vmem:[%s1687_s8 + $0x48] sm:$0xff] %v1371_v37   ;;  %v570_v55 = vadd.f32 %v1674_v45, %v569_v44  ;;  %v610_v56 = vadd.f32 %v1674_v45, %v609_v46 }
  0xc8   : > { %vm754_vm0 = vcmp.ge.f32.partialorder %v647_v42, 0.0  ;;  %v818_v47 = vmul.f32 0.1, %v647_v42  ;;  %vm770_vm1 = vcmp.ge.f32.partialorder %v687_v43, 0.0  ;;  %v834_v48 = vmul.f32 0.1, %v687_v43 }
  0xc9   : > { %v787_v61 = vmul.f32 0.1, %v570_v55  ;;  %v803_v62 = vmul.f32 0.1, %v610_v56  ;;  %vm723_vm2 = vcmp.ge.f32.partialorder %v570_v55, 0.0  ;;  %vm739_vm3 = vcmp.ge.f32.partialorder %v610_v56, 0.0 }
  0xca   : > { %v882_v51 = vsel %vm754_vm0, %v647_v42, %v818_v47  ;;  %v898_v52 = vsel %vm770_vm1, %v687_v43, %v834_v48 }
  0xcb   : > { %v1411_v53 = vpack.c.bf16 %v882_v51, %v881_v49  ;;  %v1451_v54 = vpack.c.bf16 %v898_v52, %v897_v50  ;;  %v851_v5 = vsel %vm723_vm2, %v570_v55, %v787_v61  ;;  %v867_v6 = vsel %vm739_vm3, %v610_v56, %v803_v62 }
  0xcd   : > { %1499 = vst [vmem:[%s1687_s8 + $0x88] sm:$0xff] %v1411_v53   ;;  %v649_v57 = vpop.f32.mrf.mxu2  ;;  %v689_v58 = vpop.f32.mrf.mxu3 }
  0xce   : > { %1507 = vst [vmem:[%s1687_s8 + $0xc8] sm:$0xff] %v1451_v54   ;;  %v571_v59 = vpop.f32.mrf.mxu0  ;;  %v611_v60 = vpop.f32.mrf.mxu1  ;;  %v650_v3 = vadd.f32 %v1674_v45, %v649_v57  ;;  %v690_v4 = vadd.f32 %v1674_v45, %v689_v58 }
  0xcf   : > { %v572_v63 = vadd.f32 %v1674_v45, %v571_v59  ;;  %v612_v0 = vadd.f32 %v1674_v45, %v611_v60 }
  0xd0   : > { %v819_v13 = vmul.f32 0.1, %v650_v3  ;;  %v835_v14 = vmul.f32 0.1, %v690_v4  ;;  %vm755_vm6 = vcmp.ge.f32.partialorder %v650_v3, 0.0  ;;  %vm771_vm7 = vcmp.ge.f32.partialorder %v690_v4, 0.0 }
  0xd1   : > { %vm724_vm4 = vcmp.ge.f32.partialorder %v572_v63, 0.0  ;;  %v788_v1 = vmul.f32 0.1, %v572_v63  ;;  %vm740_vm5 = vcmp.ge.f32.partialorder %v612_v0, 0.0  ;;  %v804_v2 = vmul.f32 0.1, %v612_v0 }
  0xd2   : > { %v883_v21 = vsel %vm755_vm6, %v650_v3, %v819_v13  ;;  %v899_v22 = vsel %vm771_vm7, %v690_v4, %v835_v14 }
  0xd3   : > { %v852_v7 = vsel %vm724_vm4, %v572_v63, %v788_v1  ;;  %v868_v8 = vsel %vm740_vm5, %v612_v0, %v804_v2 }
  0xd4   : > { %v1336_v9 = vpack.c.bf16 %v852_v7, %v851_v5  ;;  %v1376_v10 = vpack.c.bf16 %v868_v8, %v867_v6 }
  0xd5   : > { %v651_v11 = vpop.f32.mrf.mxu2  ;;  %v691_v12 = vpop.f32.mrf.mxu3 }
  0xd6   : > { %1484 = vst [vmem:[%s1687_s8 + $0x10] sm:$0xff] %v1336_v9   ;;  %v652_v15 = vadd.f32 %v1674_v45, %v651_v11  ;;  %v692_v16 = vadd.f32 %v1674_v45, %v691_v12  ;;  %v574_v17 = vpop.f32.mrf.mxu0  ;;  %v614_v18 = vpop.f32.mrf.mxu1 }
  0xd7   : > { %1492 = vst [vmem:[%s1687_s8 + $0x50] sm:$0xff] %v1376_v10   ;;  %v575_v27 = vadd.f32 %v1674_v45, %v574_v17  ;;  %v615_v28 = vadd.f32 %v1674_v45, %v614_v18 }
  0xd8   : > { %vm756_vm8 = vcmp.ge.f32.partialorder %v652_v15, 0.0  ;;  %v820_v19 = vmul.f32 0.1, %v652_v15  ;;  %vm772_vm9 = vcmp.ge.f32.partialorder %v692_v16, 0.0  ;;  %v836_v20 = vmul.f32 0.1, %v692_v16 }
  0xd9   : > { %v789_v33 = vmul.f32 0.1, %v575_v27  ;;  %v805_v34 = vmul.f32 0.1, %v615_v28  ;;  %vm725_vm10 = vcmp.ge.f32.partialorder %v575_v27, 0.0  ;;  %vm741_vm11 = vcmp.ge.f32.partialorder %v615_v28, 0.0 }
  0xda   : > { %v884_v23 = vsel %vm756_vm8, %v652_v15, %v820_v19  ;;  %v900_v24 = vsel %vm772_vm9, %v692_v16, %v836_v20 }
  0xdb   : > { %v1416_v25 = vpack.c.bf16 %v884_v23, %v883_v21  ;;  %v1456_v26 = vpack.c.bf16 %v900_v24, %v899_v22  ;;  %v853_v41 = vsel %vm725_vm10, %v575_v27, %v789_v33  ;;  %v869_v42 = vsel %vm741_vm11, %v615_v28, %v805_v34 }
  0xdd   : > { %1500 = vst [vmem:[%s1687_s8 + $0x90] sm:$0xff] %v1416_v25   ;;  %v654_v29 = vpop.f32.mrf.mxu2  ;;  %v694_v30 = vpop.f32.mrf.mxu3 }
  0xde   : > { %1508 = vst [vmem:[%s1687_s8 + $0xd0] sm:$0xff] %v1456_v26   ;;  %v576_v31 = vpop.f32.mrf.mxu0  ;;  %v616_v32 = vpop.f32.mrf.mxu1  ;;  %v655_v39 = vadd.f32 %v1674_v45, %v654_v29  ;;  %v695_v40 = vadd.f32 %v1674_v45, %v694_v30 }
  0xdf   : > { %v577_v35 = vadd.f32 %v1674_v45, %v576_v31  ;;  %v617_v36 = vadd.f32 %v1674_v45, %v616_v32 }
  0xe0   : > { %v821_v50 = vmul.f32 0.1, %v655_v39  ;;  %v837_v51 = vmul.f32 0.1, %v695_v40  ;;  %vm757_vm14 = vcmp.ge.f32.partialorder %v655_v39, 0.0  ;;  %vm773_vm15 = vcmp.ge.f32.partialorder %v695_v40, 0.0 }
  0xe1   : > { %vm726_vm12 = vcmp.ge.f32.partialorder %v577_v35, 0.0  ;;  %v790_v37 = vmul.f32 0.1, %v577_v35  ;;  %vm742_vm13 = vcmp.ge.f32.partialorder %v617_v36, 0.0  ;;  %v806_v38 = vmul.f32 0.1, %v617_v36 }
  0xe2   : > { %v885_v58 = vsel %vm757_vm14, %v655_v39, %v821_v50  ;;  %v901_v59 = vsel %vm773_vm15, %v695_v40, %v837_v51 }
  0xe3   : > { %v854_v43 = vsel %vm726_vm12, %v577_v35, %v790_v37  ;;  %v870_v44 = vsel %vm742_vm13, %v617_v36, %v806_v38 }
  0xe4   : > { %v1341_v46 = vpack.c.bf16 %v854_v43, %v853_v41  ;;  %v1381_v47 = vpack.c.bf16 %v870_v44, %v869_v42 }
  0xe5   : > { %v656_v48 = vpop.f32.mrf.mxu2  ;;  %v696_v49 = vpop.f32.mrf.mxu3 }
  0xe6   : > { %1485 = vst [vmem:[%s1687_s8 + $0x18] sm:$0xff] %v1341_v46   ;;  %v657_v52 = vadd.f32 %v1674_v45, %v656_v48  ;;  %v697_v53 = vadd.f32 %v1674_v45, %v696_v49  ;;  %v579_v54 = vpop.f32.mrf.mxu0  ;;  %v619_v55 = vpop.f32.mrf.mxu1 }
  0xe7   : > { %1493 = vst [vmem:[%s1687_s8 + $0x58] sm:$0xff] %v1381_v47   ;;  %v580_v0 = vadd.f32 %v1674_v45, %v579_v54  ;;  %v620_v1 = vadd.f32 %v1674_v45, %v619_v55 }
  0xe8   : > { %vm758_vm0 = vcmp.ge.f32.partialorder %v657_v52, 0.0  ;;  %v822_v56 = vmul.f32 0.1, %v657_v52  ;;  %vm774_vm1 = vcmp.ge.f32.partialorder %v697_v53, 0.0  ;;  %v838_v57 = vmul.f32 0.1, %v697_v53 }
  0xe9   : > { %v791_v6 = vmul.f32 0.1, %v580_v0  ;;  %v807_v7 = vmul.f32 0.1, %v620_v1  ;;  %vm727_vm2 = vcmp.ge.f32.partialorder %v580_v0, 0.0  ;;  %vm743_vm3 = vcmp.ge.f32.partialorder %v620_v1, 0.0 }
  0xea   : > { %v886_v60 = vsel %vm758_vm0, %v657_v52, %v822_v56  ;;  %v902_v61 = vsel %vm774_vm1, %v697_v53, %v838_v57 }
  0xeb   : > { %v1421_v62 = vpack.c.bf16 %v886_v60, %v885_v58  ;;  %v1461_v63 = vpack.c.bf16 %v902_v61, %v901_v59  ;;  %v855_v14 = vsel %vm727_vm2, %v580_v0, %v791_v6  ;;  %v871_v15 = vsel %vm743_vm3, %v620_v1, %v807_v7 }
  0xed   : > { %1501 = vst [vmem:[%s1687_s8 + $0x98] sm:$0xff] %v1421_v62   ;;  %v659_v2 = vpop.f32.mrf.mxu2  ;;  %v699_v3 = vpop.f32.mrf.mxu3 }
  0xee   : > { %1509 = vst [vmem:[%s1687_s8 + $0xd8] sm:$0xff] %v1461_v63   ;;  %v581_v4 = vpop.f32.mrf.mxu0  ;;  %v621_v5 = vpop.f32.mrf.mxu1  ;;  %v660_v12 = vadd.f32 %v1674_v45, %v659_v2  ;;  %v700_v13 = vadd.f32 %v1674_v45, %v699_v3 }
  0xef   : > { %v582_v8 = vadd.f32 %v1674_v45, %v581_v4  ;;  %v622_v9 = vadd.f32 %v1674_v45, %v621_v5 }
  0xf0   : > { %v823_v22 = vmul.f32 0.1, %v660_v12  ;;  %v839_v23 = vmul.f32 0.1, %v700_v13  ;;  %vm759_vm6 = vcmp.ge.f32.partialorder %v660_v12, 0.0  ;;  %vm775_vm7 = vcmp.ge.f32.partialorder %v700_v13, 0.0 }
  0xf1   : > { %vm728_vm4 = vcmp.ge.f32.partialorder %v582_v8, 0.0  ;;  %v792_v10 = vmul.f32 0.1, %v582_v8  ;;  %vm744_vm5 = vcmp.ge.f32.partialorder %v622_v9, 0.0  ;;  %v808_v11 = vmul.f32 0.1, %v622_v9 }
  0xf2   : > { %v887_v30 = vsel %vm759_vm6, %v660_v12, %v823_v22  ;;  %v903_v31 = vsel %vm775_vm7, %v700_v13, %v839_v23 }
  0xf3   : > { %v856_v16 = vsel %vm728_vm4, %v582_v8, %v792_v10  ;;  %v872_v17 = vsel %vm744_vm5, %v622_v9, %v808_v11 }
  0xf4   : > { %v1346_v18 = vpack.c.bf16 %v856_v16, %v855_v14  ;;  %v1386_v19 = vpack.c.bf16 %v872_v17, %v871_v15 }
  0xf5   : > { %v661_v20 = vpop.f32.mrf.mxu2  ;;  %v701_v21 = vpop.f32.mrf.mxu3 }
  0xf6   : > { %1486 = vst [vmem:[%s1687_s8 + $0x20] sm:$0xff] %v1346_v18   ;;  %v662_v24 = vadd.f32 %v1674_v45, %v661_v20  ;;  %v702_v25 = vadd.f32 %v1674_v45, %v701_v21  ;;  %v584_v26 = vpop.f32.mrf.mxu0  ;;  %v624_v27 = vpop.f32.mrf.mxu1 }
  0xf7   : > { %1494 = vst [vmem:[%s1687_s8 + $0x60] sm:$0xff] %v1386_v19   ;;  %v585_v36 = vadd.f32 %v1674_v45, %v584_v26  ;;  %v625_v37 = vadd.f32 %v1674_v45, %v624_v27 }
  0xf8   : > { %vm760_vm8 = vcmp.ge.f32.partialorder %v662_v24, 0.0  ;;  %v824_v28 = vmul.f32 0.1, %v662_v24  ;;  %vm776_vm9 = vcmp.ge.f32.partialorder %v702_v25, 0.0  ;;  %v840_v29 = vmul.f32 0.1, %v702_v25 }
  0xf9   : > { %v793_v42 = vmul.f32 0.1, %v585_v36  ;;  %v809_v43 = vmul.f32 0.1, %v625_v37  ;;  %vm729_vm10 = vcmp.ge.f32.partialorder %v585_v36, 0.0  ;;  %vm745_vm11 = vcmp.ge.f32.partialorder %v625_v37, 0.0 }
  0xfa   : > { %v888_v32 = vsel %vm760_vm8, %v662_v24, %v824_v28  ;;  %v904_v33 = vsel %vm776_vm9, %v702_v25, %v840_v29 }
  0xfb   : > { %v1426_v34 = vpack.c.bf16 %v888_v32, %v887_v30  ;;  %v1466_v35 = vpack.c.bf16 %v904_v33, %v903_v31  ;;  %v857_v51 = vsel %vm729_vm10, %v585_v36, %v793_v42  ;;  %v873_v52 = vsel %vm745_vm11, %v625_v37, %v809_v43 }
  0xfd   : > { %1502 = vst [vmem:[%s1687_s8 + $0xa0] sm:$0xff] %v1426_v34   ;;  %v664_v38 = vpop.f32.mrf.mxu2  ;;  %v704_v39 = vpop.f32.mrf.mxu3 }
  0xfe   : > { %1510 = vst [vmem:[%s1687_s8 + $0xe0] sm:$0xff] %v1466_v35   ;;  %v586_v40 = vpop.f32.mrf.mxu0  ;;  %v626_v41 = vpop.f32.mrf.mxu1  ;;  %v665_v49 = vadd.f32 %v1674_v45, %v664_v38  ;;  %v705_v50 = vadd.f32 %v1674_v45, %v704_v39 }
  0xff   : > { %v587_v44 = vadd.f32 %v1674_v45, %v586_v40  ;;  %v627_v46 = vadd.f32 %v1674_v45, %v626_v41 }
 0x100   : > { %v825_v59 = vmul.f32 0.1, %v665_v49  ;;  %v841_v60 = vmul.f32 0.1, %v705_v50  ;;  %vm761_vm14 = vcmp.ge.f32.partialorder %v665_v49, 0.0  ;;  %vm777_vm15 = vcmp.ge.f32.partialorder %v705_v50, 0.0 }
 0x101   : > { %vm730_vm12 = vcmp.ge.f32.partialorder %v587_v44, 0.0  ;;  %v794_v47 = vmul.f32 0.1, %v587_v44  ;;  %vm746_vm13 = vcmp.ge.f32.partialorder %v627_v46, 0.0  ;;  %v810_v48 = vmul.f32 0.1, %v627_v46 }
 0x102   : > { %v889_v3 = vsel %vm761_vm14, %v665_v49, %v825_v59  ;;  %v905_v4 = vsel %vm777_vm15, %v705_v50, %v841_v60 }
 0x103   : > { %v858_v53 = vsel %vm730_vm12, %v587_v44, %v794_v47  ;;  %v874_v54 = vsel %vm746_vm13, %v627_v46, %v810_v48 }
 0x104   : > { %v1351_v55 = vpack.c.bf16 %v858_v53, %v857_v51  ;;  %v1391_v56 = vpack.c.bf16 %v874_v54, %v873_v52 }
 0x105   : > { %v666_v57 = vpop.f32.mrf.mxu2  ;;  %v706_v58 = vpop.f32.mrf.mxu3 }
 0x106   : > { %1487 = vst [vmem:[%s1687_s8 + $0x28] sm:$0xff] %v1351_v55   ;;  %v667_v61 = vadd.f32 %v1674_v45, %v666_v57  ;;  %v707_v62 = vadd.f32 %v1674_v45, %v706_v58  ;;  %v589_v63 = vpop.f32.mrf.mxu0  ;;  %v629_v0 = vpop.f32.mrf.mxu1 }
 0x107   : > { %1495 = vst [vmem:[%s1687_s8 + $0x68] sm:$0xff] %v1391_v56   ;;  %v590_v9 = vadd.f32 %v1674_v45, %v589_v63  ;;  %v630_v10 = vadd.f32 %v1674_v45, %v629_v0 }
 0x108   : > { %vm762_vm0 = vcmp.ge.f32.partialorder %v667_v61, 0.0  ;;  %v826_v1 = vmul.f32 0.1, %v667_v61  ;;  %vm778_vm1 = vcmp.ge.f32.partialorder %v707_v62, 0.0  ;;  %v842_v2 = vmul.f32 0.1, %v707_v62 }
 0x109   : > { %v795_v15 = vmul.f32 0.1, %v590_v9  ;;  %v811_v16 = vmul.f32 0.1, %v630_v10  ;;  %vm731_vm2 = vcmp.ge.f32.partialorder %v590_v9, 0.0  ;;  %vm747_vm3 = vcmp.ge.f32.partialorder %v630_v10, 0.0 }
 0x10a   : > { %v890_v5 = vsel %vm762_vm0, %v667_v61, %v826_v1  ;;  %v906_v6 = vsel %vm778_vm1, %v707_v62, %v842_v2 }
 0x10b   : > { %v1431_v7 = vpack.c.bf16 %v890_v5, %v889_v3  ;;  %v1471_v8 = vpack.c.bf16 %v906_v6, %v905_v4  ;;  %v859_v23 = vsel %vm731_vm2, %v590_v9, %v795_v15  ;;  %v875_v24 = vsel %vm747_vm3, %v630_v10, %v811_v16 }
 0x10d   : > { %1503 = vst [vmem:[%s1687_s8 + $0xa8] sm:$0xff] %v1431_v7   ;;  %v669_v11 = vpop.f32.mrf.mxu2  ;;  %v709_v12 = vpop.f32.mrf.mxu3 }
 0x10e   : > { %1511 = vst [vmem:[%s1687_s8 + $0xe8] sm:$0xff] %v1471_v8   ;;  %v591_v13 = vpop.f32.mrf.mxu0  ;;  %v631_v14 = vpop.f32.mrf.mxu1  ;;  %v670_v21 = vadd.f32 %v1674_v45, %v669_v11  ;;  %v710_v22 = vadd.f32 %v1674_v45, %v709_v12 }
 0x10f   : > { %v592_v17 = vadd.f32 %v1674_v45, %v591_v13  ;;  %v632_v18 = vadd.f32 %v1674_v45, %v631_v14 }
 0x110   : > { %v827_v31 = vmul.f32 0.1, %v670_v21  ;;  %v843_v32 = vmul.f32 0.1, %v710_v22  ;;  %vm763_vm6 = vcmp.ge.f32.partialorder %v670_v21, 0.0  ;;  %vm779_vm7 = vcmp.ge.f32.partialorder %v710_v22, 0.0 }
 0x111   : > { %vm732_vm4 = vcmp.ge.f32.partialorder %v592_v17, 0.0  ;;  %v796_v19 = vmul.f32 0.1, %v592_v17  ;;  %vm748_vm5 = vcmp.ge.f32.partialorder %v632_v18, 0.0  ;;  %v812_v20 = vmul.f32 0.1, %v632_v18 }
 0x112   : > { %v891_v39 = vsel %vm763_vm6, %v670_v21, %v827_v31  ;;  %v907_v40 = vsel %vm779_vm7, %v710_v22, %v843_v32 }
 0x113   : > { %v860_v25 = vsel %vm732_vm4, %v592_v17, %v796_v19  ;;  %v876_v26 = vsel %vm748_vm5, %v632_v18, %v812_v20 }
 0x114   : > { %v1356_v27 = vpack.c.bf16 %v860_v25, %v859_v23  ;;  %v1396_v28 = vpack.c.bf16 %v876_v26, %v875_v24 }
 0x115   : > { %v671_v29 = vpop.f32.mrf.mxu2  ;;  %v711_v30 = vpop.f32.mrf.mxu3 }
 0x116   : > { %1488 = vst [vmem:[%s1687_s8 + $0x30] sm:$0xff] %v1356_v27   ;;  %v672_v33 = vadd.f32 %v1674_v45, %v671_v29  ;;  %v712_v34 = vadd.f32 %v1674_v45, %v711_v30  ;;  %v594_v35 = vpop.f32.mrf.mxu0  ;;  %v634_v36 = vpop.f32.mrf.mxu1 }
 0x117   : > { %1496 = vst [vmem:[%s1687_s8 + $0x70] sm:$0xff] %v1396_v28   ;;  %v595_v46 = vadd.f32 %v1674_v45, %v594_v35  ;;  %v635_v47 = vadd.f32 %v1674_v45, %v634_v36 }
 0x118   : > { %vm764_vm8 = vcmp.ge.f32.partialorder %v672_v33, 0.0  ;;  %v828_v37 = vmul.f32 0.1, %v672_v33  ;;  %vm780_vm9 = vcmp.ge.f32.partialorder %v712_v34, 0.0  ;;  %v844_v38 = vmul.f32 0.1, %v712_v34 }
 0x119   : > { %v797_v52 = vmul.f32 0.1, %v595_v46  ;;  %v813_v53 = vmul.f32 0.1, %v635_v47  ;;  %vm733_vm10 = vcmp.ge.f32.partialorder %v595_v46, 0.0  ;;  %vm749_vm11 = vcmp.ge.f32.partialorder %v635_v47, 0.0 }
 0x11a   : > { %v892_v41 = vsel %vm764_vm8, %v672_v33, %v828_v37  ;;  %v908_v42 = vsel %vm780_vm9, %v712_v34, %v844_v38 }
 0x11b   : > { %v1436_v43 = vpack.c.bf16 %v892_v41, %v891_v39  ;;  %v1476_v44 = vpack.c.bf16 %v908_v42, %v907_v40  ;;  %v861_v60 = vsel %vm733_vm10, %v595_v46, %v797_v52  ;;  %v877_v61 = vsel %vm749_vm11, %v635_v47, %v813_v53 }
 0x11d   : > { %1504 = vst [vmem:[%s1687_s8 + $0xb0] sm:$0xff] %v1436_v43   ;;  %v674_v48 = vpop.f32.mrf.mxu2  ;;  %v714_v49 = vpop.f32.mrf.mxu3 }
 0x11e   : > { %1512 = vst [vmem:[%s1687_s8 + $0xf0] sm:$0xff] %v1476_v44   ;;  %v596_v50 = vpop.f32.mrf.mxu0  ;;  %v636_v51 = vpop.f32.mrf.mxu1  ;;  %v675_v58 = vadd.f32 %v1674_v45, %v674_v48  ;;  %v715_v59 = vadd.f32 %v1674_v45, %v714_v49 }
 0x11f   : > { %v597_v54 = vadd.f32 %v1674_v45, %v596_v50  ;;  %v637_v55 = vadd.f32 %v1674_v45, %v636_v51 }
 0x120   : > { %v829_v4 = vmul.f32 0.1, %v675_v58  ;;  %v845_v5 = vmul.f32 0.1, %v715_v59  ;;  %vm765_vm14 = vcmp.ge.f32.partialorder %v675_v58, 0.0  ;;  %vm781_vm15 = vcmp.ge.f32.partialorder %v715_v59, 0.0 }
 0x121   : > { %vm734_vm12 = vcmp.ge.f32.partialorder %v597_v54, 0.0  ;;  %v798_v56 = vmul.f32 0.1, %v597_v54  ;;  %vm750_vm13 = vcmp.ge.f32.partialorder %v637_v55, 0.0  ;;  %v814_v57 = vmul.f32 0.1, %v637_v55 }
 0x122   : > { %v893_v10 = vsel %vm765_vm14, %v675_v58, %v829_v4  ;;  %v909_v11 = vsel %vm781_vm15, %v715_v59, %v845_v5 }
 0x123   : > { %v862_v62 = vsel %vm734_vm12, %v597_v54, %v798_v56  ;;  %v878_v63 = vsel %vm750_vm13, %v637_v55, %v814_v57 }
 0x124   : > { %v1361_v0 = vpack.c.bf16 %v862_v62, %v861_v60  ;;  %v1401_v1 = vpack.c.bf16 %v878_v63, %v877_v61 }
 0x125   : > { %v676_v2 = vpop.f32.mrf.mxu2  ;;  %v716_v3 = vpop.f32.mrf.mxu3 }
 0x126   : > { %1489 = vst [vmem:[%s1687_s8 + $0x38] sm:$0xff] %v1361_v0   ;;  %v677_v6 = vadd.f32 %v1674_v45, %v676_v2  ;;  %v717_v7 = vadd.f32 %v1674_v45, %v716_v3 }
 0x127   : > { %1497 = vst [vmem:[%s1687_s8 + $0x78] sm:$0xff] %v1401_v1  }
 0x128   : > { %vm766_vm0 = vcmp.ge.f32.partialorder %v677_v6, 0.0  ;;  %v830_v8 = vmul.f32 0.1, %v677_v6  ;;  %vm782_vm1 = vcmp.ge.f32.partialorder %v717_v7, 0.0  ;;  %v846_v9 = vmul.f32 0.1, %v717_v7 }
 0x12a   : > { %v894_v12 = vsel %vm766_vm0, %v677_v6, %v830_v8  ;;  %v910_v13 = vsel %vm782_vm1, %v717_v7, %v846_v9 }
 0x12b   : > { %v1441_v14 = vpack.c.bf16 %v894_v12, %v893_v10  ;;  %v1481_v15 = vpack.c.bf16 %v910_v13, %v909_v11 }
 0x12d   : > { %1505 = vst [vmem:[%s1687_s8 + $0xb8] sm:$0xff] %v1441_v14  }
 0x12e   : > { %1513 = vst [vmem:[%s1687_s8 + $0xf8] sm:$0xff] %v1481_v15  }
 0x12f PF: > { %s13_s12 = sadd.s32 1, %s1548_s12  }
 0x130   : > { %p10_p4 = scmp.ge.s32.totalorder %s13_s12, 6  }
 0x132   :  { %12 = sbr.rel (!%p10_p4) target bundleno = 1 (0x1), region = 62 }

// kernel: pallas_forward.9
= control target key start
LH: loop header
LB: loop body
LE: loop exit
PB: predicated region body
PF: predicated region fallthrough
CT: control target
= control target key end

     0   :  { %s1551_s12 = smov 0   ;;  %s1759_s0 = inlined_call_operand.vmem [shape: bf16[2048,72], index: 0, kind: input, shape index: {}]   ;;  %s1760_s1 = inlined_call_operand.vmem [shape: bf16[72,128], index: 1, kind: input, shape index: {}]   ;;  %s1761_s2 = inlined_call_operand.vmem [shape: f32[1,128], index: 2, kind: input, shape index: {}]   ;;  %s1762_s3 = inlined_call_operand.vmem [shape: bf16[2048,128], index: 3, kind: output, shape index: {}]  }
   0x1 LB: > { %s1085_s13 = sadd.s32 4294967295, %s1529_s12   ;;  %p1089_p0 = scmp.ge.s32.totalorder %s1529_s12, 1  ;;  %s1529_s12 = sphi %s1551_s12, %s13_s12  }
   0x2   : > { %p138_p1 = scmp.lt.s32.totalorder %s1529_s12, 5 }
   0x4   : > { %p139_p2 = pnand %p1089_p0, %p138_p1 }
   0x5   : > { %s1090_s16 = sshll.u32 (!%p139_p2), %s1085_s13, 6 }
   0x6   : > { %142 = sbr.rel (%p139_p2) target bundleno = 298 (0x12a), region = 32  ;;  %p163_p3 = scmp.lt.s32.totalorder (!%p139_p2), %s1090_s16, 255 }
   0xb   : > { %v247_v0 = vld [vmem:[%s1760_s1 + $0x20] sm:$0xf]  ;;  %vm536_vm0 = vcmask 1043456   ;;  %v1307_v4 = vld [vmem:[%s1760_s1 + $0x18] sm:$0xff]  ;;  %v1306_v5 = vld [vmem:[%s1760_s1 + $0x10] sm:$0xff]  ;;  %s1764_s16 = smov (!%p163_p3, %s1090_s16), 255 }
   0xc   : > { %v429_v1 = vunpack.c.l.b16 %v247_v0  ;;  %v1305_v6 = vld [vmem:[%s1760_s1 + $0x8] sm:$0xff]  ;;  %s1091_s23 = sshll.u32 %s1764_s16, 2  ;;  %v1304_v7 = vld [vmem:[%s1760_s1] sm:$0xff]  ;;  %vm439_vm1 = vcmask 588800  }
   0xd   : > { %s1582_s28 = scalar_lea.vmem %s1759_s0, %s1091_s23  ;;  %v1651_v42 = vld [vmem:[%s1761_s2] ss:$0 sm:$0xff]  ;;  %s1664_s6 = scalar_lea.vmem %s1762_s3, %s1091_s23 }
   0xe   : > { %v434_v2 = vpack.c.b16 %v429_v1, %v429_v1  ;;  %v1272_v8 = vld [vmem:[%s1582_s28] sm:$0xff]  ;;  %v1273_v12 = vld [vmem:[%s1582_s28 + $0x8] sm:$0xff]  ;;  %v1274_v16 = vld [vmem:[%s1582_s28 + $0x10] sm:$0xff] }
   0xf   : > { %v1280_v9 = vld [vmem:[%s1582_s28 + $0x40] sm:$0xff]  ;;  %v1281_v13 = vld [vmem:[%s1582_s28 + $0x48] sm:$0xff]  ;;  %v1282_v17 = vld [vmem:[%s1582_s28 + $0x50] sm:$0xff] }
  0x10   : > { %v538_v3 = vsel %vm536_vm0, %v434_v2, 0  ;;  %v1288_v10 = vld [vmem:[%s1582_s28 + $0x80] sm:$0xff]  ;;  %v1289_v14 = vld [vmem:[%s1582_s28 + $0x88] sm:$0xff]  ;;  %v1290_v18 = vld [vmem:[%s1582_s28 + $0x90] sm:$0xff] }
  0x11   : > { %543 = vmatpush.bf16.msra.mxu0 %v538_v3  ;;  %1499 = vmatpush.bf16.msra.mxu1 %v538_v3  ;;  %v1296_v11 = vld [vmem:[%s1582_s28 + $0xc0] sm:$0xff]  ;;  %v1297_v15 = vld [vmem:[%s1582_s28 + $0xc8] sm:$0xff]  ;;  %v1298_v19 = vld [vmem:[%s1582_s28 + $0xd0] sm:$0xff] }
  0x12   : > { %1500 = vmatpush.bf16.msra.mxu2 %v538_v3  ;;  %1501 = vmatpush.bf16.msra.mxu3 %v538_v3  ;;  %v1275_v20 = vld [vmem:[%s1582_s28 + $0x18] sm:$0xff]  ;;  %v1276_v24 = vld [vmem:[%s1582_s28 + $0x20] sm:$0xff]  ;;  %v1277_v28 = vld [vmem:[%s1582_s28 + $0x28] sm:$0xff] }
  0x13   : > { %v1283_v21 = vld [vmem:[%s1582_s28 + $0x58] sm:$0xff]  ;;  %v1284_v25 = vld [vmem:[%s1582_s28 + $0x60] sm:$0xff]  ;;  %v1285_v29 = vld [vmem:[%s1582_s28 + $0x68] sm:$0xff] }
  0x14   : > { %v1291_v22 = vld [vmem:[%s1582_s28 + $0x98] sm:$0xff]  ;;  %v1292_v26 = vld [vmem:[%s1582_s28 + $0xa0] sm:$0xff]  ;;  %v1293_v30 = vld [vmem:[%s1582_s28 + $0xa8] sm:$0xff] }
  0x15   : > { %544 = vmatpush.bf16.msra.mxu0 %v1307_v4  ;;  %1502 = vmatpush.bf16.msra.mxu1 %v1307_v4  ;;  %v1299_v23 = vld [vmem:[%s1582_s28 + $0xd8] sm:$0xff]  ;;  %v1300_v27 = vld [vmem:[%s1582_s28 + $0xe0] sm:$0xff]  ;;  %v1301_v31 = vld [vmem:[%s1582_s28 + $0xe8] sm:$0xff] }
  0x16   : > { %1503 = vmatpush.bf16.msra.mxu2 %v1307_v4  ;;  %1504 = vmatpush.bf16.msra.mxu3 %v1307_v4  ;;  %v1278_v32 = vld [vmem:[%s1582_s28 + $0x30] sm:$0xff]  ;;  %v1279_v36 = vld [vmem:[%s1582_s28 + $0x38] sm:$0xff] }
  0x17   : > { %v1286_v33 = vld [vmem:[%s1582_s28 + $0x70] sm:$0xff]  ;;  %v1287_v37 = vld [vmem:[%s1582_s28 + $0x78] sm:$0xff] }
  0x18   : > { %v1294_v34 = vld [vmem:[%s1582_s28 + $0xb0] sm:$0xff]  ;;  %v1295_v38 = vld [vmem:[%s1582_s28 + $0xb8] sm:$0xff] }
  0x19   : > { %545 = vmatpush.bf16.msra.mxu0 %v1306_v5  ;;  %1505 = vmatpush.bf16.msra.mxu1 %v1306_v5  ;;  %v1302_v35 = vld [vmem:[%s1582_s28 + $0xf0] sm:$0xff]  ;;  %v1303_v39 = vld [vmem:[%s1582_s28 + $0xf8] sm:$0xff] }
  0x1a   : > { %1506 = vmatpush.bf16.msra.mxu2 %v1306_v5  ;;  %1507 = vmatpush.bf16.msra.mxu3 %v1306_v5 }
  0x1d   : > { %546 = vmatpush.bf16.msra.mxu0 %v1305_v6  ;;  %1508 = vmatpush.bf16.msra.mxu1 %v1305_v6 }
  0x1e   : > { %1509 = vmatpush.bf16.msra.mxu2 %v1305_v6  ;;  %1510 = vmatpush.bf16.msra.mxu3 %v1305_v6 }
  0x21   : > { %547 = vmatpush.bf16.msra.mxu0 %v1304_v7  ;;  %1511 = vmatpush.bf16.msra.mxu1 %v1304_v7 }
  0x22   : > { %1512 = vmatpush.bf16.msra.mxu2 %v1304_v7  ;;  %1513 = vmatpush.bf16.msra.mxu3 %v1304_v7 }
  0x24   : > { %1238 = vmatmul.msk.bf16.vlgmr.msra.gmra.mxu0 %vm439_vm1, %v1272_v8  ;;  %1246 = vmatmul.msk.bf16.vlgmr.msra.gmra.mxu1 %vm439_vm1, %v1280_v9 }
  0x25   : > { %1254 = vmatmul.msk.bf16.vlgmr.msra.gmra.mxu2 %vm439_vm1, %v1288_v10  ;;  %1262 = vmatmul.msk.bf16.vlgmr.msra.gmra.mxu3 %vm439_vm1, %v1296_v11 }
  0x34   : > { %1239 = vmatmul.msk.bf16.gmra.mxu0 %vm439_vm1, %v1273_v12  ;;  %1247 = vmatmul.msk.bf16.gmra.mxu1 %vm439_vm1, %v1281_v13 }
  0x35   : > { %1255 = vmatmul.msk.bf16.gmra.mxu2 %vm439_vm1, %v1289_v14  ;;  %1263 = vmatmul.msk.bf16.gmra.mxu3 %vm439_vm1, %v1297_v15 }
  0x44   : > { %1240 = vmatmul.msk.bf16.gmra.mxu0 %vm439_vm1, %v1274_v16  ;;  %1248 = vmatmul.msk.bf16.gmra.mxu1 %vm439_vm1, %v1282_v17 }
  0x45   : > { %1256 = vmatmul.msk.bf16.gmra.mxu2 %vm439_vm1, %v1290_v18  ;;  %1264 = vmatmul.msk.bf16.gmra.mxu3 %vm439_vm1, %v1298_v19 }
  0x54   : > { %1241 = vmatmul.msk.bf16.gmra.mxu0 %vm439_vm1, %v1275_v20  ;;  %1249 = vmatmul.msk.bf16.gmra.mxu1 %vm439_vm1, %v1283_v21 }
  0x55   : > { %1257 = vmatmul.msk.bf16.gmra.mxu2 %vm439_vm1, %v1291_v22  ;;  %1265 = vmatmul.msk.bf16.gmra.mxu3 %vm439_vm1, %v1299_v23 }
  0x64   : > { %1242 = vmatmul.msk.bf16.gmra.mxu0 %vm439_vm1, %v1276_v24  ;;  %1250 = vmatmul.msk.bf16.gmra.mxu1 %vm439_vm1, %v1284_v25 }
  0x65   : > { %1258 = vmatmul.msk.bf16.gmra.mxu2 %vm439_vm1, %v1292_v26  ;;  %1266 = vmatmul.msk.bf16.gmra.mxu3 %vm439_vm1, %v1300_v27 }
  0x74   : > { %1243 = vmatmul.msk.bf16.gmra.mxu0 %vm439_vm1, %v1277_v28  ;;  %1251 = vmatmul.msk.bf16.gmra.mxu1 %vm439_vm1, %v1285_v29 }
  0x75   : > { %1259 = vmatmul.msk.bf16.gmra.mxu2 %vm439_vm1, %v1293_v30  ;;  %1267 = vmatmul.msk.bf16.gmra.mxu3 %vm439_vm1, %v1301_v31 }
  0x84   : > { %1244 = vmatmul.msk.bf16.gmra.mxu0 %vm439_vm1, %v1278_v32  ;;  %1252 = vmatmul.msk.bf16.gmra.mxu1 %vm439_vm1, %v1286_v33 }
  0x85   : > { %1260 = vmatmul.msk.bf16.gmra.mxu2 %vm439_vm1, %v1294_v34  ;;  %1268 = vmatmul.msk.bf16.gmra.mxu3 %vm439_vm1, %v1302_v35 }
  0x94   : > { %1245 = vmatmul.msk.bf16.gmra.mxu0 %vm439_vm1, %v1279_v36  ;;  %1253 = vmatmul.msk.bf16.gmra.mxu1 %vm439_vm1, %v1287_v37 }
  0x95   : > { %1261 = vmatmul.msk.bf16.gmra.mxu2 %vm439_vm1, %v1295_v38  ;;  %1269 = vmatmul.msk.bf16.gmra.mxu3 %vm439_vm1, %v1303_v39 }
  0xa1   : > { %v549_v40 = vpop.f32.mrf.mxu0  ;;  %v589_v41 = vpop.f32.mrf.mxu1 }
  0xa2   : > { %v550_v43 = vadd.f32 %v1651_v42, %v549_v40  ;;  %v590_v44 = vadd.f32 %v1651_v42, %v589_v41 }
  0xa4   : > { %v773_v49 = vmul.f32 0.1, %v550_v43  ;;  %v789_v50 = vmul.f32 0.1, %v590_v44  ;;  %vm709_vm2 = vcmp.ge.f32.partialorder %v550_v43, 0.0  ;;  %vm725_vm3 = vcmp.ge.f32.partialorder %v590_v44, 0.0 }
  0xa6   : > { %v837_v57 = vsel %vm709_vm2, %v550_v43, %v773_v49  ;;  %v853_v58 = vsel %vm725_vm3, %v590_v44, %v789_v50 }
  0xa8   : > { %v629_v45 = vpop.f32.mrf.mxu2  ;;  %v669_v46 = vpop.f32.mrf.mxu3 }
  0xa9   : > { %v551_v47 = vpop.f32.mrf.mxu0  ;;  %v591_v48 = vpop.f32.mrf.mxu1  ;;  %v630_v55 = vadd.f32 %v1651_v42, %v629_v45  ;;  %v670_v56 = vadd.f32 %v1651_v42, %v669_v46 }
  0xaa   : > { %v552_v51 = vadd.f32 %v1651_v42, %v551_v47  ;;  %v592_v52 = vadd.f32 %v1651_v42, %v591_v48 }
  0xab   : > { %v805_v1 = vmul.f32 0.1, %v630_v55  ;;  %v821_v2 = vmul.f32 0.1, %v670_v56  ;;  %vm741_vm6 = vcmp.ge.f32.partialorder %v630_v55, 0.0  ;;  %vm757_vm7 = vcmp.ge.f32.partialorder %v670_v56, 0.0 }
  0xac   : > { %vm710_vm4 = vcmp.ge.f32.partialorder %v552_v51, 0.0  ;;  %v774_v53 = vmul.f32 0.1, %v552_v51  ;;  %vm726_vm5 = vcmp.ge.f32.partialorder %v592_v52, 0.0  ;;  %v790_v54 = vmul.f32 0.1, %v592_v52 }
  0xad   : > { %v869_v9 = vsel %vm741_vm6, %v630_v55, %v805_v1  ;;  %v885_v10 = vsel %vm757_vm7, %v670_v56, %v821_v2 }
  0xae   : > { %v838_v59 = vsel %vm710_vm4, %v552_v51, %v774_v53  ;;  %v854_v60 = vsel %vm726_vm5, %v592_v52, %v790_v54 }
  0xaf   : > { %v1311_v61 = vpack.c.bf16 %v838_v59, %v837_v57  ;;  %v1351_v62 = vpack.c.bf16 %v854_v60, %v853_v58 }
  0xb0   : > { %v631_v63 = vpop.f32.mrf.mxu2  ;;  %v671_v0 = vpop.f32.mrf.mxu3 }
  0xb1   : > { %1312 = vst [vmem:[%s1664_s6] sm:$0xff] %v1311_v61   ;;  %v632_v3 = vadd.f32 %v1651_v42, %v631_v63  ;;  %v672_v4 = vadd.f32 %v1651_v42, %v671_v0  ;;  %v554_v5 = vpop.f32.mrf.mxu0  ;;  %v594_v6 = vpop.f32.mrf.mxu1 }
  0xb2   : > { %1475 = vst [vmem:[%s1664_s6 + $0x40] sm:$0xff] %v1351_v62   ;;  %v555_v15 = vadd.f32 %v1651_v42, %v554_v5  ;;  %v595_v16 = vadd.f32 %v1651_v42, %v594_v6 }
  0xb3   : > { %vm742_vm8 = vcmp.ge.f32.partialorder %v632_v3, 0.0  ;;  %v806_v7 = vmul.f32 0.1, %v632_v3  ;;  %vm758_vm9 = vcmp.ge.f32.partialorder %v672_v4, 0.0  ;;  %v822_v8 = vmul.f32 0.1, %v672_v4 }
  0xb4   : > { %v775_v21 = vmul.f32 0.1, %v555_v15  ;;  %v791_v22 = vmul.f32 0.1, %v595_v16  ;;  %vm711_vm10 = vcmp.ge.f32.partialorder %v555_v15, 0.0  ;;  %vm727_vm11 = vcmp.ge.f32.partialorder %v595_v16, 0.0 }
  0xb5   : > { %v870_v11 = vsel %vm742_vm8, %v632_v3, %v806_v7  ;;  %v886_v12 = vsel %vm758_vm9, %v672_v4, %v822_v8 }
  0xb6   : > { %v1391_v13 = vpack.c.bf16 %v870_v11, %v869_v9  ;;  %v1431_v14 = vpack.c.bf16 %v886_v12, %v885_v10  ;;  %v839_v29 = vsel %vm711_vm10, %v555_v15, %v775_v21  ;;  %v855_v30 = vsel %vm727_vm11, %v595_v16, %v791_v22 }
  0xb8   : > { %1483 = vst [vmem:[%s1664_s6 + $0x80] sm:$0xff] %v1391_v13   ;;  %v634_v17 = vpop.f32.mrf.mxu2  ;;  %v674_v18 = vpop.f32.mrf.mxu3 }
  0xb9   : > { %1491 = vst [vmem:[%s1664_s6 + $0xc0] sm:$0xff] %v1431_v14   ;;  %v556_v19 = vpop.f32.mrf.mxu0  ;;  %v596_v20 = vpop.f32.mrf.mxu1  ;;  %v635_v27 = vadd.f32 %v1651_v42, %v634_v17  ;;  %v675_v28 = vadd.f32 %v1651_v42, %v674_v18 }
  0xba   : > { %v557_v23 = vadd.f32 %v1651_v42, %v556_v19  ;;  %v597_v24 = vadd.f32 %v1651_v42, %v596_v20 }
  0xbb   : > { %v807_v37 = vmul.f32 0.1, %v635_v27  ;;  %v823_v38 = vmul.f32 0.1, %v675_v28  ;;  %vm743_vm14 = vcmp.ge.f32.partialorder %v635_v27, 0.0  ;;  %vm759_vm15 = vcmp.ge.f32.partialorder %v675_v28, 0.0 }
  0xbc   : > { %vm712_vm12 = vcmp.ge.f32.partialorder %v557_v23, 0.0  ;;  %v776_v25 = vmul.f32 0.1, %v557_v23  ;;  %vm728_vm13 = vcmp.ge.f32.partialorder %v597_v24, 0.0  ;;  %v792_v26 = vmul.f32 0.1, %v597_v24 }
  0xbd   : > { %v871_v46 = vsel %vm743_vm14, %v635_v27, %v807_v37  ;;  %v887_v47 = vsel %vm759_vm15, %v675_v28, %v823_v38 }
  0xbe   : > { %v840_v31 = vsel %vm712_vm12, %v557_v23, %v776_v25  ;;  %v856_v32 = vsel %vm728_vm13, %v597_v24, %v792_v26 }
  0xbf   : > { %v1316_v33 = vpack.c.bf16 %v840_v31, %v839_v29  ;;  %v1356_v34 = vpack.c.bf16 %v856_v32, %v855_v30 }
  0xc0   : > { %v636_v35 = vpop.f32.mrf.mxu2  ;;  %v676_v36 = vpop.f32.mrf.mxu3 }
  0xc1   : > { %1468 = vst [vmem:[%s1664_s6 + $0x8] sm:$0xff] %v1316_v33   ;;  %v637_v39 = vadd.f32 %v1651_v42, %v636_v35  ;;  %v677_v40 = vadd.f32 %v1651_v42, %v676_v36  ;;  %v559_v41 = vpop.f32.mrf.mxu0  ;;  %v599_v43 = vpop.f32.mrf.mxu1 }
  0xc2   : > { %1476 = vst [vmem:[%s1664_s6 + $0x48] sm:$0xff] %v1356_v34   ;;  %v560_v52 = vadd.f32 %v1651_v42, %v559_v41  ;;  %v600_v53 = vadd.f32 %v1651_v42, %v599_v43 }
  0xc3   : > { %vm744_vm0 = vcmp.ge.f32.partialorder %v637_v39, 0.0  ;;  %v808_v44 = vmul.f32 0.1, %v637_v39  ;;  %vm760_vm1 = vcmp.ge.f32.partialorder %v677_v40, 0.0  ;;  %v824_v45 = vmul.f32 0.1, %v677_v40 }
  0xc4   : > { %v777_v58 = vmul.f32 0.1, %v560_v52  ;;  %v793_v59 = vmul.f32 0.1, %v600_v53  ;;  %vm713_vm2 = vcmp.ge.f32.partialorder %v560_v52, 0.0  ;;  %vm729_vm3 = vcmp.ge.f32.partialorder %v600_v53, 0.0 }
  0xc5   : > { %v872_v48 = vsel %vm744_vm0, %v637_v39, %v808_v44  ;;  %v888_v49 = vsel %vm760_vm1, %v677_v40, %v824_v45 }
  0xc6   : > { %v1396_v50 = vpack.c.bf16 %v872_v48, %v871_v46  ;;  %v1436_v51 = vpack.c.bf16 %v888_v49, %v887_v47  ;;  %v841_v2 = vsel %vm713_vm2, %v560_v52, %v777_v58  ;;  %v857_v3 = vsel %vm729_vm3, %v600_v53, %v793_v59 }
  0xc8   : > { %1484 = vst [vmem:[%s1664_s6 + $0x88] sm:$0xff] %v1396_v50   ;;  %v639_v54 = vpop.f32.mrf.mxu2  ;;  %v679_v55 = vpop.f32.mrf.mxu3 }
  0xc9   : > { %1492 = vst [vmem:[%s1664_s6 + $0xc8] sm:$0xff] %v1436_v51   ;;  %v561_v56 = vpop.f32.mrf.mxu0  ;;  %v601_v57 = vpop.f32.mrf.mxu1  ;;  %v640_v0 = vadd.f32 %v1651_v42, %v639_v54  ;;  %v680_v1 = vadd.f32 %v1651_v42, %v679_v55 }
  0xca   : > { %v562_v60 = vadd.f32 %v1651_v42, %v561_v56  ;;  %v602_v61 = vadd.f32 %v1651_v42, %v601_v57 }
  0xcb   : > { %v809_v10 = vmul.f32 0.1, %v640_v0  ;;  %v825_v11 = vmul.f32 0.1, %v680_v1  ;;  %vm745_vm6 = vcmp.ge.f32.partialorder %v640_v0, 0.0  ;;  %vm761_vm7 = vcmp.ge.f32.partialorder %v680_v1, 0.0 }
  0xcc   : > { %vm714_vm4 = vcmp.ge.f32.partialorder %v562_v60, 0.0  ;;  %v778_v62 = vmul.f32 0.1, %v562_v60  ;;  %vm730_vm5 = vcmp.ge.f32.partialorder %v602_v61, 0.0  ;;  %v794_v63 = vmul.f32 0.1, %v602_v61 }
  0xcd   : > { %v873_v18 = vsel %vm745_vm6, %v640_v0, %v809_v10  ;;  %v889_v19 = vsel %vm761_vm7, %v680_v1, %v825_v11 }
  0xce   : > { %v842_v4 = vsel %vm714_vm4, %v562_v60, %v778_v62  ;;  %v858_v5 = vsel %vm730_vm5, %v602_v61, %v794_v63 }
  0xcf   : > { %v1321_v6 = vpack.c.bf16 %v842_v4, %v841_v2  ;;  %v1361_v7 = vpack.c.bf16 %v858_v5, %v857_v3 }
  0xd0   : > { %v641_v8 = vpop.f32.mrf.mxu2  ;;  %v681_v9 = vpop.f32.mrf.mxu3 }
  0xd1   : > { %1469 = vst [vmem:[%s1664_s6 + $0x10] sm:$0xff] %v1321_v6   ;;  %v642_v12 = vadd.f32 %v1651_v42, %v641_v8  ;;  %v682_v13 = vadd.f32 %v1651_v42, %v681_v9  ;;  %v564_v14 = vpop.f32.mrf.mxu0  ;;  %v604_v15 = vpop.f32.mrf.mxu1 }
  0xd2   : > { %1477 = vst [vmem:[%s1664_s6 + $0x50] sm:$0xff] %v1361_v7   ;;  %v565_v24 = vadd.f32 %v1651_v42, %v564_v14  ;;  %v605_v25 = vadd.f32 %v1651_v42, %v604_v15 }
  0xd3   : > { %vm746_vm8 = vcmp.ge.f32.partialorder %v642_v12, 0.0  ;;  %v810_v16 = vmul.f32 0.1, %v642_v12  ;;  %vm762_vm9 = vcmp.ge.f32.partialorder %v682_v13, 0.0  ;;  %v826_v17 = vmul.f32 0.1, %v682_v13 }
  0xd4   : > { %v779_v30 = vmul.f32 0.1, %v565_v24  ;;  %v795_v31 = vmul.f32 0.1, %v605_v25  ;;  %vm715_vm10 = vcmp.ge.f32.partialorder %v565_v24, 0.0  ;;  %vm731_vm11 = vcmp.ge.f32.partialorder %v605_v25, 0.0 }
  0xd5   : > { %v874_v20 = vsel %vm746_vm8, %v642_v12, %v810_v16  ;;  %v890_v21 = vsel %vm762_vm9, %v682_v13, %v826_v17 }
  0xd6   : > { %v1401_v22 = vpack.c.bf16 %v874_v20, %v873_v18  ;;  %v1441_v23 = vpack.c.bf16 %v890_v21, %v889_v19  ;;  %v843_v38 = vsel %vm715_vm10, %v565_v24, %v779_v30  ;;  %v859_v39 = vsel %vm731_vm11, %v605_v25, %v795_v31 }
  0xd8   : > { %1485 = vst [vmem:[%s1664_s6 + $0x90] sm:$0xff] %v1401_v22   ;;  %v644_v26 = vpop.f32.mrf.mxu2  ;;  %v684_v27 = vpop.f32.mrf.mxu3 }
  0xd9   : > { %1493 = vst [vmem:[%s1664_s6 + $0xd0] sm:$0xff] %v1441_v23   ;;  %v566_v28 = vpop.f32.mrf.mxu0  ;;  %v606_v29 = vpop.f32.mrf.mxu1  ;;  %v645_v36 = vadd.f32 %v1651_v42, %v644_v26  ;;  %v685_v37 = vadd.f32 %v1651_v42, %v684_v27 }
  0xda   : > { %v567_v32 = vadd.f32 %v1651_v42, %v566_v28  ;;  %v607_v33 = vadd.f32 %v1651_v42, %v606_v29 }
  0xdb   : > { %v811_v47 = vmul.f32 0.1, %v645_v36  ;;  %v827_v48 = vmul.f32 0.1, %v685_v37  ;;  %vm747_vm14 = vcmp.ge.f32.partialorder %v645_v36, 0.0  ;;  %vm763_vm15 = vcmp.ge.f32.partialorder %v685_v37, 0.0 }
  0xdc   : > { %vm716_vm12 = vcmp.ge.f32.partialorder %v567_v32, 0.0  ;;  %v780_v34 = vmul.f32 0.1, %v567_v32  ;;  %vm732_vm13 = vcmp.ge.f32.partialorder %v607_v33, 0.0  ;;  %v796_v35 = vmul.f32 0.1, %v607_v33 }
  0xdd   : > { %v875_v55 = vsel %vm747_vm14, %v645_v36, %v811_v47  ;;  %v891_v56 = vsel %vm763_vm15, %v685_v37, %v827_v48 }
  0xde   : > { %v844_v40 = vsel %vm716_vm12, %v567_v32, %v780_v34  ;;  %v860_v41 = vsel %vm732_vm13, %v607_v33, %v796_v35 }
  0xdf   : > { %v1326_v43 = vpack.c.bf16 %v844_v40, %v843_v38  ;;  %v1366_v44 = vpack.c.bf16 %v860_v41, %v859_v39 }
  0xe0   : > { %v646_v45 = vpop.f32.mrf.mxu2  ;;  %v686_v46 = vpop.f32.mrf.mxu3 }
  0xe1   : > { %1470 = vst [vmem:[%s1664_s6 + $0x18] sm:$0xff] %v1326_v43   ;;  %v647_v49 = vadd.f32 %v1651_v42, %v646_v45  ;;  %v687_v50 = vadd.f32 %v1651_v42, %v686_v46  ;;  %v569_v51 = vpop.f32.mrf.mxu0  ;;  %v609_v52 = vpop.f32.mrf.mxu1 }
  0xe2   : > { %1478 = vst [vmem:[%s1664_s6 + $0x58] sm:$0xff] %v1366_v44   ;;  %v570_v61 = vadd.f32 %v1651_v42, %v569_v51  ;;  %v610_v62 = vadd.f32 %v1651_v42, %v609_v52 }
  0xe3   : > { %vm748_vm0 = vcmp.ge.f32.partialorder %v647_v49, 0.0  ;;  %v812_v53 = vmul.f32 0.1, %v647_v49  ;;  %vm764_vm1 = vcmp.ge.f32.partialorder %v687_v50, 0.0  ;;  %v828_v54 = vmul.f32 0.1, %v687_v50 }
  0xe4   : > { %v781_v3 = vmul.f32 0.1, %v570_v61  ;;  %v797_v4 = vmul.f32 0.1, %v610_v62  ;;  %vm717_vm2 = vcmp.ge.f32.partialorder %v570_v61, 0.0  ;;  %vm733_vm3 = vcmp.ge.f32.partialorder %v610_v62, 0.0 }
  0xe5   : > { %v876_v57 = vsel %vm748_vm0, %v647_v49, %v812_v53  ;;  %v892_v58 = vsel %vm764_vm1, %v687_v50, %v828_v54 }
  0xe6   : > { %v1406_v59 = vpack.c.bf16 %v876_v57, %v875_v55  ;;  %v1446_v60 = vpack.c.bf16 %v892_v58, %v891_v56  ;;  %v845_v11 = vsel %vm717_vm2, %v570_v61, %v781_v3  ;;  %v861_v12 = vsel %vm733_vm3, %v610_v62, %v797_v4 }
  0xe8   : > { %1486 = vst [vmem:[%s1664_s6 + $0x98] sm:$0xff] %v1406_v59   ;;  %v649_v63 = vpop.f32.mrf.mxu2  ;;  %v689_v0 = vpop.f32.mrf.mxu3 }
  0xe9   : > { %1494 = vst [vmem:[%s1664_s6 + $0xd8] sm:$0xff] %v1446_v60   ;;  %v571_v1 = vpop.f32.mrf.mxu0  ;;  %v611_v2 = vpop.f32.mrf.mxu1  ;;  %v650_v9 = vadd.f32 %v1651_v42, %v649_v63  ;;  %v690_v10 = vadd.f32 %v1651_v42, %v689_v0 }
  0xea   : > { %v572_v5 = vadd.f32 %v1651_v42, %v571_v1  ;;  %v612_v6 = vadd.f32 %v1651_v42, %v611_v2 }
  0xeb   : > { %v813_v19 = vmul.f32 0.1, %v650_v9  ;;  %v829_v20 = vmul.f32 0.1, %v690_v10  ;;  %vm749_vm6 = vcmp.ge.f32.partialorder %v650_v9, 0.0  ;;  %vm765_vm7 = vcmp.ge.f32.partialorder %v690_v10, 0.0 }
  0xec   : > { %vm718_vm4 = vcmp.ge.f32.partialorder %v572_v5, 0.0  ;;  %v782_v7 = vmul.f32 0.1, %v572_v5  ;;  %vm734_vm5 = vcmp.ge.f32.partialorder %v612_v6, 0.0  ;;  %v798_v8 = vmul.f32 0.1, %v612_v6 }
  0xed   : > { %v877_v27 = vsel %vm749_vm6, %v650_v9, %v813_v19  ;;  %v893_v28 = vsel %vm765_vm7, %v690_v10, %v829_v20 }
  0xee   : > { %v846_v13 = vsel %vm718_vm4, %v572_v5, %v782_v7  ;;  %v862_v14 = vsel %vm734_vm5, %v612_v6, %v798_v8 }
  0xef   : > { %v1331_v15 = vpack.c.bf16 %v846_v13, %v845_v11  ;;  %v1371_v16 = vpack.c.bf16 %v862_v14, %v861_v12 }
  0xf0   : > { %v651_v17 = vpop.f32.mrf.mxu2  ;;  %v691_v18 = vpop.f32.mrf.mxu3 }
  0xf1   : > { %1471 = vst [vmem:[%s1664_s6 + $0x20] sm:$0xff] %v1331_v15   ;;  %v652_v21 = vadd.f32 %v1651_v42, %v651_v17  ;;  %v692_v22 = vadd.f32 %v1651_v42, %v691_v18  ;;  %v574_v23 = vpop.f32.mrf.mxu0  ;;  %v614_v24 = vpop.f32.mrf.mxu1 }
  0xf2   : > { %1479 = vst [vmem:[%s1664_s6 + $0x60] sm:$0xff] %v1371_v16   ;;  %v575_v33 = vadd.f32 %v1651_v42, %v574_v23  ;;  %v615_v34 = vadd.f32 %v1651_v42, %v614_v24 }
  0xf3   : > { %vm750_vm8 = vcmp.ge.f32.partialorder %v652_v21, 0.0  ;;  %v814_v25 = vmul.f32 0.1, %v652_v21  ;;  %vm766_vm9 = vcmp.ge.f32.partialorder %v692_v22, 0.0  ;;  %v830_v26 = vmul.f32 0.1, %v692_v22 }
  0xf4   : > { %v783_v39 = vmul.f32 0.1, %v575_v33  ;;  %v799_v40 = vmul.f32 0.1, %v615_v34  ;;  %vm719_vm10 = vcmp.ge.f32.partialorder %v575_v33, 0.0  ;;  %vm735_vm11 = vcmp.ge.f32.partialorder %v615_v34, 0.0 }
  0xf5   : > { %v878_v29 = vsel %vm750_vm8, %v652_v21, %v814_v25  ;;  %v894_v30 = vsel %vm766_vm9, %v692_v22, %v830_v26 }
  0xf6   : > { %v1411_v31 = vpack.c.bf16 %v878_v29, %v877_v27  ;;  %v1451_v32 = vpack.c.bf16 %v894_v30, %v893_v28  ;;  %v847_v48 = vsel %vm719_vm10, %v575_v33, %v783_v39  ;;  %v863_v49 = vsel %vm735_vm11, %v615_v34, %v799_v40 }
  0xf8   : > { %1487 = vst [vmem:[%s1664_s6 + $0xa0] sm:$0xff] %v1411_v31   ;;  %v654_v35 = vpop.f32.mrf.mxu2  ;;  %v694_v36 = vpop.f32.mrf.mxu3 }
  0xf9   : > { %1495 = vst [vmem:[%s1664_s6 + $0xe0] sm:$0xff] %v1451_v32   ;;  %v576_v37 = vpop.f32.mrf.mxu0  ;;  %v616_v38 = vpop.f32.mrf.mxu1  ;;  %v655_v46 = vadd.f32 %v1651_v42, %v654_v35  ;;  %v695_v47 = vadd.f32 %v1651_v42, %v694_v36 }
  0xfa   : > { %v577_v41 = vadd.f32 %v1651_v42, %v576_v37  ;;  %v617_v43 = vadd.f32 %v1651_v42, %v616_v38 }
  0xfb   : > { %v815_v56 = vmul.f32 0.1, %v655_v46  ;;  %v831_v57 = vmul.f32 0.1, %v695_v47  ;;  %vm751_vm14 = vcmp.ge.f32.partialorder %v655_v46, 0.0  ;;  %vm767_vm15 = vcmp.ge.f32.partialorder %v695_v47, 0.0 }
  0xfc   : > { %vm720_vm12 = vcmp.ge.f32.partialorder %v577_v41, 0.0  ;;  %v784_v44 = vmul.f32 0.1, %v577_v41  ;;  %vm736_vm13 = vcmp.ge.f32.partialorder %v617_v43, 0.0  ;;  %v800_v45 = vmul.f32 0.1, %v617_v43 }
  0xfd   : > { %v879_v0 = vsel %vm751_vm14, %v655_v46, %v815_v56  ;;  %v895_v1 = vsel %vm767_vm15, %v695_v47, %v831_v57 }
  0xfe   : > { %v848_v50 = vsel %vm720_vm12, %v577_v41, %v784_v44  ;;  %v864_v51 = vsel %vm736_vm13, %v617_v43, %v800_v45 }
  0xff   : > { %v1336_v52 = vpack.c.bf16 %v848_v50, %v847_v48  ;;  %v1376_v53 = vpack.c.bf16 %v864_v51, %v863_v49 }
 0x100   : > { %v656_v54 = vpop.f32.mrf.mxu2  ;;  %v696_v55 = vpop.f32.mrf.mxu3 }
 0x101   : > { %1472 = vst [vmem:[%s1664_s6 + $0x28] sm:$0xff] %v1336_v52   ;;  %v657_v58 = vadd.f32 %v1651_v42, %v656_v54  ;;  %v697_v59 = vadd.f32 %v1651_v42, %v696_v55  ;;  %v579_v60 = vpop.f32.mrf.mxu0  ;;  %v619_v61 = vpop.f32.mrf.mxu1 }
 0x102   : > { %1480 = vst [vmem:[%s1664_s6 + $0x68] sm:$0xff] %v1376_v53   ;;  %v580_v6 = vadd.f32 %v1651_v42, %v579_v60  ;;  %v620_v7 = vadd.f32 %v1651_v42, %v619_v61 }
 0x103   : > { %vm752_vm0 = vcmp.ge.f32.partialorder %v657_v58, 0.0  ;;  %v816_v62 = vmul.f32 0.1, %v657_v58  ;;  %vm768_vm1 = vcmp.ge.f32.partialorder %v697_v59, 0.0  ;;  %v832_v63 = vmul.f32 0.1, %v697_v59 }
 0x104   : > { %v785_v12 = vmul.f32 0.1, %v580_v6  ;;  %v801_v13 = vmul.f32 0.1, %v620_v7  ;;  %vm721_vm2 = vcmp.ge.f32.partialorder %v580_v6, 0.0  ;;  %vm737_vm3 = vcmp.ge.f32.partialorder %v620_v7, 0.0 }
 0x105   : > { %v880_v2 = vsel %vm752_vm0, %v657_v58, %v816_v62  ;;  %v896_v3 = vsel %vm768_vm1, %v697_v59, %v832_v63 }
 0x106   : > { %v1416_v4 = vpack.c.bf16 %v880_v2, %v879_v0  ;;  %v1456_v5 = vpack.c.bf16 %v896_v3, %v895_v1  ;;  %v849_v20 = vsel %vm721_vm2, %v580_v6, %v785_v12  ;;  %v865_v21 = vsel %vm737_vm3, %v620_v7, %v801_v13 }
 0x108   : > { %1488 = vst [vmem:[%s1664_s6 + $0xa8] sm:$0xff] %v1416_v4   ;;  %v659_v8 = vpop.f32.mrf.mxu2  ;;  %v699_v9 = vpop.f32.mrf.mxu3 }
 0x109   : > { %1496 = vst [vmem:[%s1664_s6 + $0xe8] sm:$0xff] %v1456_v5   ;;  %v581_v10 = vpop.f32.mrf.mxu0  ;;  %v621_v11 = vpop.f32.mrf.mxu1  ;;  %v660_v18 = vadd.f32 %v1651_v42, %v659_v8  ;;  %v700_v19 = vadd.f32 %v1651_v42, %v699_v9 }
 0x10a   : > { %v582_v14 = vadd.f32 %v1651_v42, %v581_v10  ;;  %v622_v15 = vadd.f32 %v1651_v42, %v621_v11 }
 0x10b   : > { %v817_v28 = vmul.f32 0.1, %v660_v18  ;;  %v833_v29 = vmul.f32 0.1, %v700_v19  ;;  %vm753_vm6 = vcmp.ge.f32.partialorder %v660_v18, 0.0  ;;  %vm769_vm7 = vcmp.ge.f32.partialorder %v700_v19, 0.0 }
 0x10c   : > { %vm722_vm4 = vcmp.ge.f32.partialorder %v582_v14, 0.0  ;;  %v786_v16 = vmul.f32 0.1, %v582_v14  ;;  %vm738_vm5 = vcmp.ge.f32.partialorder %v622_v15, 0.0  ;;  %v802_v17 = vmul.f32 0.1, %v622_v15 }
 0x10d   : > { %v881_v36 = vsel %vm753_vm6, %v660_v18, %v817_v28  ;;  %v897_v37 = vsel %vm769_vm7, %v700_v19, %v833_v29 }
 0x10e   : > { %v850_v22 = vsel %vm722_vm4, %v582_v14, %v786_v16  ;;  %v866_v23 = vsel %vm738_vm5, %v622_v15, %v802_v17 }
 0x10f   : > { %v1341_v24 = vpack.c.bf16 %v850_v22, %v849_v20  ;;  %v1381_v25 = vpack.c.bf16 %v866_v23, %v865_v21 }
 0x110   : > { %v661_v26 = vpop.f32.mrf.mxu2  ;;  %v701_v27 = vpop.f32.mrf.mxu3 }
 0x111   : > { %1473 = vst [vmem:[%s1664_s6 + $0x30] sm:$0xff] %v1341_v24   ;;  %v662_v30 = vadd.f32 %v1651_v42, %v661_v26  ;;  %v702_v31 = vadd.f32 %v1651_v42, %v701_v27  ;;  %v584_v32 = vpop.f32.mrf.mxu0  ;;  %v624_v33 = vpop.f32.mrf.mxu1 }
 0x112   : > { %1481 = vst [vmem:[%s1664_s6 + $0x70] sm:$0xff] %v1381_v25   ;;  %v585_v43 = vadd.f32 %v1651_v42, %v584_v32  ;;  %v625_v44 = vadd.f32 %v1651_v42, %v624_v33 }
 0x113   : > { %vm754_vm8 = vcmp.ge.f32.partialorder %v662_v30, 0.0  ;;  %v818_v34 = vmul.f32 0.1, %v662_v30  ;;  %vm770_vm9 = vcmp.ge.f32.partialorder %v702_v31, 0.0  ;;  %v834_v35 = vmul.f32 0.1, %v702_v31 }
 0x114   : > { %v787_v49 = vmul.f32 0.1, %v585_v43  ;;  %v803_v50 = vmul.f32 0.1, %v625_v44  ;;  %vm723_vm10 = vcmp.ge.f32.partialorder %v585_v43, 0.0  ;;  %vm739_vm11 = vcmp.ge.f32.partialorder %v625_v44, 0.0 }
 0x115   : > { %v882_v38 = vsel %vm754_vm8, %v662_v30, %v818_v34  ;;  %v898_v39 = vsel %vm770_vm9, %v702_v31, %v834_v35 }
 0x116   : > { %v1421_v40 = vpack.c.bf16 %v882_v38, %v881_v36  ;;  %v1461_v41 = vpack.c.bf16 %v898_v39, %v897_v37  ;;  %v851_v57 = vsel %vm723_vm10, %v585_v43, %v787_v49  ;;  %v867_v58 = vsel %vm739_vm11, %v625_v44, %v803_v50 }
 0x118   : > { %1489 = vst [vmem:[%s1664_s6 + $0xb0] sm:$0xff] %v1421_v40   ;;  %v664_v45 = vpop.f32.mrf.mxu2  ;;  %v704_v46 = vpop.f32.mrf.mxu3 }
 0x119   : > { %1497 = vst [vmem:[%s1664_s6 + $0xf0] sm:$0xff] %v1461_v41   ;;  %v586_v47 = vpop.f32.mrf.mxu0  ;;  %v626_v48 = vpop.f32.mrf.mxu1  ;;  %v665_v55 = vadd.f32 %v1651_v42, %v664_v45  ;;  %v705_v56 = vadd.f32 %v1651_v42, %v704_v46 }
 0x11a   : > { %v587_v51 = vadd.f32 %v1651_v42, %v586_v47  ;;  %v627_v52 = vadd.f32 %v1651_v42, %v626_v48 }
 0x11b   : > { %v819_v1 = vmul.f32 0.1, %v665_v55  ;;  %v835_v2 = vmul.f32 0.1, %v705_v56  ;;  %vm755_vm14 = vcmp.ge.f32.partialorder %v665_v55, 0.0  ;;  %vm771_vm15 = vcmp.ge.f32.partialorder %v705_v56, 0.0 }
 0x11c   : > { %vm724_vm12 = vcmp.ge.f32.partialorder %v587_v51, 0.0  ;;  %v788_v53 = vmul.f32 0.1, %v587_v51  ;;  %vm740_vm13 = vcmp.ge.f32.partialorder %v627_v52, 0.0  ;;  %v804_v54 = vmul.f32 0.1, %v627_v52 }
 0x11d   : > { %v883_v7 = vsel %vm755_vm14, %v665_v55, %v819_v1  ;;  %v899_v8 = vsel %vm771_vm15, %v705_v56, %v835_v2 }
 0x11e   : > { %v852_v59 = vsel %vm724_vm12, %v587_v51, %v788_v53  ;;  %v868_v60 = vsel %vm740_vm13, %v627_v52, %v804_v54 }
 0x11f   : > { %v1346_v61 = vpack.c.bf16 %v852_v59, %v851_v57  ;;  %v1386_v62 = vpack.c.bf16 %v868_v60, %v867_v58 }
 0x120   : > { %v666_v63 = vpop.f32.mrf.mxu2  ;;  %v706_v0 = vpop.f32.mrf.mxu3 }
 0x121   : > { %1474 = vst [vmem:[%s1664_s6 + $0x38] sm:$0xff] %v1346_v61   ;;  %v667_v3 = vadd.f32 %v1651_v42, %v666_v63  ;;  %v707_v4 = vadd.f32 %v1651_v42, %v706_v0 }
 0x122   : > { %1482 = vst [vmem:[%s1664_s6 + $0x78] sm:$0xff] %v1386_v62  }
 0x123   : > { %vm756_vm0 = vcmp.ge.f32.partialorder %v667_v3, 0.0  ;;  %v820_v5 = vmul.f32 0.1, %v667_v3  ;;  %vm772_vm1 = vcmp.ge.f32.partialorder %v707_v4, 0.0  ;;  %v836_v6 = vmul.f32 0.1, %v707_v4 }
 0x125   : > { %v884_v9 = vsel %vm756_vm0, %v667_v3, %v820_v5  ;;  %v900_v10 = vsel %vm772_vm1, %v707_v4, %v836_v6 }
 0x126   : > { %v1426_v11 = vpack.c.bf16 %v884_v9, %v883_v7  ;;  %v1466_v12 = vpack.c.bf16 %v900_v10, %v899_v8 }
 0x128   : > { %1490 = vst [vmem:[%s1664_s6 + $0xb8] sm:$0xff] %v1426_v11  }
 0x129   : > { %1498 = vst [vmem:[%s1664_s6 + $0xf8] sm:$0xff] %v1466_v12  }
 0x12a PF: > { %s13_s12 = sadd.s32 1, %s1529_s12  }
 0x12b   : > { %p10_p4 = scmp.ge.s32.totalorder %s13_s12, 6  }
 0x12d   :  { %12 = sbr.rel (!%p10_p4) target bundleno = 1 (0x1), region = 62 }

// kernel: pallas_forward.10
= control target key start
LH: loop header
LB: loop body
LE: loop exit
PB: predicated region body
PF: predicated region fallthrough
CT: control target
= control target key end

     0   :  { %s962_s12 = smov 0   ;;  %s1083_s0 = inlined_call_operand.vmem [shape: bf16[512,128], index: 0, kind: input, shape index: {}]   ;;  %s1084_s1 = inlined_call_operand.vmem [shape: bf16[128,128], index: 1, kind: input, shape index: {}]   ;;  %s1085_s2 = inlined_call_operand.vmem [shape: f32[1,128], index: 2, kind: input, shape index: {}]   ;;  %s1086_s3 = inlined_call_operand.vmem [shape: bf16[512,128], index: 3, kind: output, shape index: {}]  }
   0x1 LB: > { %s675_s13 = sadd.s32 4294967295, %s940_s12   ;;  %p679_p0 = scmp.ge.s32.totalorder %s940_s12, 1  ;;  %s940_s12 = sphi %s962_s12, %s13_s12  }
   0x2   : > { %p138_p1 = scmp.lt.s32.totalorder %s940_s12, 3 }
   0x4   : > { %p139_p2 = pnand %p679_p0, %p138_p1 }
   0x5   : > { %s680_s22 = sshll.u32 (!%p139_p2), %s675_s13, 5 }
   0x6   : > { %142 = sbr.rel (%p139_p2) target bundleno = 241 (0xf1), region = 32  ;;  %p163_p3 = scmp.lt.s32.totalorder (!%p139_p2), %s680_s22, 63 }
   0xb   : > { %v805_v0 = vld [vmem:[%s1084_s1 + $0x38] sm:$0xff]  ;;  %v804_v1 = vld [vmem:[%s1084_s1 + $0x30] sm:$0xff]  ;;  %v803_v2 = vld [vmem:[%s1084_s1 + $0x28] sm:$0xff]  ;;  %s1088_s22 = smov (!%p163_p3, %s680_s22), 63 }
   0xc   : > { %370 = vmatpush.bf16.msra.mxu0 %v805_v0  ;;  %901 = vmatpush.bf16.msra.mxu1 %v805_v0  ;;  %v802_v3 = vld [vmem:[%s1084_s1 + $0x20] sm:$0xff]  ;;  %v801_v4 = vld [vmem:[%s1084_s1 + $0x18] sm:$0xff]  ;;  %v800_v5 = vld [vmem:[%s1084_s1 + $0x10] sm:$0xff]  ;;  %s681_s29 = sshll.u32 %s1088_s22, 2 }
   0xd   : > { %902 = vmatpush.bf16.msra.mxu2 %v805_v0  ;;  %903 = vmatpush.bf16.msra.mxu3 %v805_v0  ;;  %v799_v6 = vld [vmem:[%s1084_s1 + $0x8] sm:$0xff]  ;;  %v798_v7 = vld [vmem:[%s1084_s1] sm:$0xff]  ;;  %s1002_s7 = scalar_lea.vmem %s1083_s0, %s681_s29  ;;  %s1036_s13 = scalar_lea.vmem %s1086_s3, %s681_s29 }
   0xe   : > { %v782_v8 = vld [vmem:[%s1002_s7] sm:$0xff]  ;;  %v783_v12 = vld [vmem:[%s1002_s7 + $0x8] sm:$0xff]  ;;  %v784_v16 = vld [vmem:[%s1002_s7 + $0x10] sm:$0xff] }
   0xf   : > { %v786_v9 = vld [vmem:[%s1002_s7 + $0x20] sm:$0xff]  ;;  %v787_v13 = vld [vmem:[%s1002_s7 + $0x28] sm:$0xff]  ;;  %v788_v17 = vld [vmem:[%s1002_s7 + $0x30] sm:$0xff] }
  0x10   : > { %371 = vmatpush.bf16.msra.mxu0 %v804_v1  ;;  %904 = vmatpush.bf16.msra.mxu1 %v804_v1  ;;  %v790_v10 = vld [vmem:[%s1002_s7 + $0x40] sm:$0xff]  ;;  %v791_v14 = vld [vmem:[%s1002_s7 + $0x48] sm:$0xff]  ;;  %v792_v18 = vld [vmem:[%s1002_s7 + $0x50] sm:$0xff] }
  0x11   : > { %905 = vmatpush.bf16.msra.mxu2 %v804_v1  ;;  %906 = vmatpush.bf16.msra.mxu3 %v804_v1  ;;  %v794_v11 = vld [vmem:[%s1002_s7 + $0x60] sm:$0xff]  ;;  %v795_v15 = vld [vmem:[%s1002_s7 + $0x68] sm:$0xff]  ;;  %v796_v19 = vld [vmem:[%s1002_s7 + $0x70] sm:$0xff] }
  0x12   : > { %v785_v20 = vld [vmem:[%s1002_s7 + $0x18] sm:$0xff]  ;;  %v1023_v26 = vld [vmem:[%s1085_s2] ss:$0 sm:$0xff] }
  0x13   : > { %v789_v21 = vld [vmem:[%s1002_s7 + $0x38] sm:$0xff] }
  0x14   : > { %372 = vmatpush.bf16.msra.mxu0 %v803_v2  ;;  %907 = vmatpush.bf16.msra.mxu1 %v803_v2  ;;  %v793_v22 = vld [vmem:[%s1002_s7 + $0x58] sm:$0xff] }
  0x15   : > { %908 = vmatpush.bf16.msra.mxu2 %v803_v2  ;;  %909 = vmatpush.bf16.msra.mxu3 %v803_v2  ;;  %v797_v23 = vld [vmem:[%s1002_s7 + $0x78] sm:$0xff] }
  0x18   : > { %373 = vmatpush.bf16.msra.mxu0 %v802_v3  ;;  %910 = vmatpush.bf16.msra.mxu1 %v802_v3 }
  0x19   : > { %911 = vmatpush.bf16.msra.mxu2 %v802_v3  ;;  %912 = vmatpush.bf16.msra.mxu3 %v802_v3 }
  0x1c   : > { %374 = vmatpush.bf16.msra.mxu0 %v801_v4  ;;  %913 = vmatpush.bf16.msra.mxu1 %v801_v4 }
  0x1d   : > { %914 = vmatpush.bf16.msra.mxu2 %v801_v4  ;;  %915 = vmatpush.bf16.msra.mxu3 %v801_v4 }
  0x20   : > { %375 = vmatpush.bf16.msra.mxu0 %v800_v5  ;;  %916 = vmatpush.bf16.msra.mxu1 %v800_v5 }
  0x21   : > { %917 = vmatpush.bf16.msra.mxu2 %v800_v5  ;;  %918 = vmatpush.bf16.msra.mxu3 %v800_v5 }
  0x24   : > { %376 = vmatpush.bf16.msra.mxu0 %v799_v6  ;;  %919 = vmatpush.bf16.msra.mxu1 %v799_v6 }
  0x25   : > { %920 = vmatpush.bf16.msra.mxu2 %v799_v6  ;;  %921 = vmatpush.bf16.msra.mxu3 %v799_v6 }
  0x28   : > { %377 = vmatpush.bf16.msra.mxu0 %v798_v7  ;;  %922 = vmatpush.bf16.msra.mxu1 %v798_v7 }
  0x29   : > { %923 = vmatpush.bf16.msra.mxu2 %v798_v7  ;;  %924 = vmatpush.bf16.msra.mxu3 %v798_v7 }
  0x2b   : > { %378 = vmatmul.bf16.vlgmr.msra.gmra.mxu0 %v782_v8  ;;  %398 = vmatmul.bf16.vlgmr.msra.gmra.mxu1 %v786_v9 }
  0x2c   : > { %418 = vmatmul.bf16.vlgmr.msra.gmra.mxu2 %v790_v10  ;;  %438 = vmatmul.bf16.vlgmr.msra.gmra.mxu3 %v794_v11 }
  0x3b   : > { %383 = vmatmul.bf16.gmra.mxu0 %v783_v12  ;;  %403 = vmatmul.bf16.gmra.mxu1 %v787_v13 }
  0x3c   : > { %423 = vmatmul.bf16.gmra.mxu2 %v791_v14  ;;  %443 = vmatmul.bf16.gmra.mxu3 %v795_v15 }
  0x4b   : > { %388 = vmatmul.bf16.gmra.mxu0 %v784_v16  ;;  %408 = vmatmul.bf16.gmra.mxu1 %v788_v17 }
  0x4c   : > { %428 = vmatmul.bf16.gmra.mxu2 %v792_v18  ;;  %448 = vmatmul.bf16.gmra.mxu3 %v796_v19 }
  0x5b   : > { %393 = vmatmul.bf16.gmra.mxu0 %v785_v20  ;;  %413 = vmatmul.bf16.gmra.mxu1 %v789_v21 }
  0x5c   : > { %433 = vmatmul.bf16.gmra.mxu2 %v793_v22  ;;  %453 = vmatmul.bf16.gmra.mxu3 %v797_v23 }
  0xa8   : > { %v379_v24 = vpop.f32.mrf.mxu0  ;;  %v399_v25 = vpop.f32.mrf.mxu1 }
  0xa9   : > { %v380_v27 = vadd.f32 %v1023_v26, %v379_v24  ;;  %v400_v28 = vadd.f32 %v1023_v26, %v399_v25 }
  0xab   : > { %v491_v33 = vmul.f32 0.1, %v380_v27  ;;  %v499_v34 = vmul.f32 0.1, %v400_v28  ;;  %vm459_vm0 = vcmp.ge.f32.partialorder %v380_v27, 0.0  ;;  %vm467_vm1 = vcmp.ge.f32.partialorder %v400_v28, 0.0 }
  0xad   : > { %v523_v41 = vsel %vm459_vm0, %v380_v27, %v491_v33  ;;  %v531_v42 = vsel %vm467_vm1, %v400_v28, %v499_v34 }
  0xaf   : > { %v419_v29 = vpop.f32.mrf.mxu2  ;;  %v439_v30 = vpop.f32.mrf.mxu3 }
  0xb0   : > { %v381_v31 = vpop.f32.mrf.mxu0  ;;  %v401_v32 = vpop.f32.mrf.mxu1  ;;  %v420_v39 = vadd.f32 %v1023_v26, %v419_v29  ;;  %v440_v40 = vadd.f32 %v1023_v26, %v439_v30 }
  0xb1   : > { %v382_v35 = vadd.f32 %v1023_v26, %v381_v31  ;;  %v402_v36 = vadd.f32 %v1023_v26, %v401_v32 }
  0xb2   : > { %v507_v49 = vmul.f32 0.1, %v420_v39  ;;  %v515_v50 = vmul.f32 0.1, %v440_v40  ;;  %vm475_vm4 = vcmp.ge.f32.partialorder %v420_v39, 0.0  ;;  %vm483_vm5 = vcmp.ge.f32.partialorder %v440_v40, 0.0 }
  0xb3   : > { %vm460_vm2 = vcmp.ge.f32.partialorder %v382_v35, 0.0  ;;  %v492_v37 = vmul.f32 0.1, %v382_v35  ;;  %vm468_vm3 = vcmp.ge.f32.partialorder %v402_v36, 0.0  ;;  %v500_v38 = vmul.f32 0.1, %v402_v36 }
  0xb4   : > { %v539_v57 = vsel %vm475_vm4, %v420_v39, %v507_v49  ;;  %v547_v58 = vsel %vm483_vm5, %v440_v40, %v515_v50 }
  0xb5   : > { %v524_v43 = vsel %vm460_vm2, %v382_v35, %v492_v37  ;;  %v532_v44 = vsel %vm468_vm3, %v402_v36, %v500_v38 }
  0xb6   : > { %v809_v45 = vpack.c.bf16 %v524_v43, %v523_v41  ;;  %v829_v46 = vpack.c.bf16 %v532_v44, %v531_v42 }
  0xb7   : > { %v421_v47 = vpop.f32.mrf.mxu2  ;;  %v441_v48 = vpop.f32.mrf.mxu3 }
  0xb8   : > { %810 = vst [vmem:[%s1036_s13] sm:$0xff] %v809_v45   ;;  %v422_v51 = vadd.f32 %v1023_v26, %v421_v47  ;;  %v442_v52 = vadd.f32 %v1023_v26, %v441_v48  ;;  %v384_v53 = vpop.f32.mrf.mxu0  ;;  %v404_v54 = vpop.f32.mrf.mxu1 }
  0xb9   : > { %889 = vst [vmem:[%s1036_s13 + $0x20] sm:$0xff] %v829_v46   ;;  %v385_v63 = vadd.f32 %v1023_v26, %v384_v53  ;;  %v405_v0 = vadd.f32 %v1023_v26, %v404_v54 }
  0xba   : > { %vm476_vm6 = vcmp.ge.f32.partialorder %v422_v51, 0.0  ;;  %v508_v55 = vmul.f32 0.1, %v422_v51  ;;  %vm484_vm7 = vcmp.ge.f32.partialorder %v442_v52, 0.0  ;;  %v516_v56 = vmul.f32 0.1, %v442_v52 }
  0xbb   : > { %v493_v5 = vmul.f32 0.1, %v385_v63  ;;  %v501_v6 = vmul.f32 0.1, %v405_v0  ;;  %vm461_vm8 = vcmp.ge.f32.partialorder %v385_v63, 0.0  ;;  %vm469_vm9 = vcmp.ge.f32.partialorder %v405_v0, 0.0 }
  0xbc   : > { %v540_v59 = vsel %vm476_vm6, %v422_v51, %v508_v55  ;;  %v548_v60 = vsel %vm484_vm7, %v442_v52, %v516_v56 }
  0xbd   : > { %v849_v61 = vpack.c.bf16 %v540_v59, %v539_v57  ;;  %v869_v62 = vpack.c.bf16 %v548_v60, %v547_v58  ;;  %v525_v13 = vsel %vm461_vm8, %v385_v63, %v493_v5  ;;  %v533_v14 = vsel %vm469_vm9, %v405_v0, %v501_v6 }
  0xbf   : > { %893 = vst [vmem:[%s1036_s13 + $0x40] sm:$0xff] %v849_v61   ;;  %v424_v1 = vpop.f32.mrf.mxu2  ;;  %v444_v2 = vpop.f32.mrf.mxu3 }
  0xc0   : > { %897 = vst [vmem:[%s1036_s13 + $0x60] sm:$0xff] %v869_v62   ;;  %v386_v3 = vpop.f32.mrf.mxu0  ;;  %v406_v4 = vpop.f32.mrf.mxu1  ;;  %v425_v11 = vadd.f32 %v1023_v26, %v424_v1  ;;  %v445_v12 = vadd.f32 %v1023_v26, %v444_v2 }
  0xc1   : > { %v387_v7 = vadd.f32 %v1023_v26, %v386_v3  ;;  %v407_v8 = vadd.f32 %v1023_v26, %v406_v4 }
  0xc2   : > { %v509_v21 = vmul.f32 0.1, %v425_v11  ;;  %v517_v22 = vmul.f32 0.1, %v445_v12  ;;  %vm477_vm12 = vcmp.ge.f32.partialorder %v425_v11, 0.0  ;;  %vm485_vm13 = vcmp.ge.f32.partialorder %v445_v12, 0.0 }
  0xc3   : > { %vm462_vm10 = vcmp.ge.f32.partialorder %v387_v7, 0.0  ;;  %v494_v9 = vmul.f32 0.1, %v387_v7  ;;  %vm470_vm11 = vcmp.ge.f32.partialorder %v407_v8, 0.0  ;;  %v502_v10 = vmul.f32 0.1, %v407_v8 }
  0xc4   : > { %v541_v30 = vsel %vm477_vm12, %v425_v11, %v509_v21  ;;  %v549_v31 = vsel %vm485_vm13, %v445_v12, %v517_v22 }
  0xc5   : > { %v526_v15 = vsel %vm462_vm10, %v387_v7, %v494_v9  ;;  %v534_v16 = vsel %vm470_vm11, %v407_v8, %v502_v10 }
  0xc6   : > { %v814_v17 = vpack.c.bf16 %v526_v15, %v525_v13  ;;  %v834_v18 = vpack.c.bf16 %v534_v16, %v533_v14 }
  0xc7   : > { %v426_v19 = vpop.f32.mrf.mxu2  ;;  %v446_v20 = vpop.f32.mrf.mxu3 }
  0xc8   : > { %886 = vst [vmem:[%s1036_s13 + $0x8] sm:$0xff] %v814_v17   ;;  %v427_v23 = vadd.f32 %v1023_v26, %v426_v19  ;;  %v447_v24 = vadd.f32 %v1023_v26, %v446_v20  ;;  %v389_v25 = vpop.f32.mrf.mxu0  ;;  %v409_v27 = vpop.f32.mrf.mxu1 }
  0xc9   : > { %890 = vst [vmem:[%s1036_s13 + $0x28] sm:$0xff] %v834_v18   ;;  %v390_v36 = vadd.f32 %v1023_v26, %v389_v25  ;;  %v410_v37 = vadd.f32 %v1023_v26, %v409_v27 }
  0xca   : > { %vm478_vm14 = vcmp.ge.f32.partialorder %v427_v23, 0.0  ;;  %v510_v28 = vmul.f32 0.1, %v427_v23  ;;  %vm486_vm15 = vcmp.ge.f32.partialorder %v447_v24, 0.0  ;;  %v518_v29 = vmul.f32 0.1, %v447_v24 }
  0xcb   : > { %v495_v42 = vmul.f32 0.1, %v390_v36  ;;  %v503_v43 = vmul.f32 0.1, %v410_v37  ;;  %vm463_vm0 = vcmp.ge.f32.partialorder %v390_v36, 0.0  ;;  %vm471_vm1 = vcmp.ge.f32.partialorder %v410_v37, 0.0 }
  0xcc   : > { %v542_v32 = vsel %vm478_vm14, %v427_v23, %v510_v28  ;;  %v550_v33 = vsel %vm486_vm15, %v447_v24, %v518_v29 }
  0xcd   : > { %v854_v34 = vpack.c.bf16 %v542_v32, %v541_v30  ;;  %v874_v35 = vpack.c.bf16 %v550_v33, %v549_v31  ;;  %v527_v50 = vsel %vm463_vm0, %v390_v36, %v495_v42  ;;  %v535_v51 = vsel %vm471_vm1, %v410_v37, %v503_v43 }
  0xcf   : > { %894 = vst [vmem:[%s1036_s13 + $0x48] sm:$0xff] %v854_v34   ;;  %v429_v38 = vpop.f32.mrf.mxu2  ;;  %v449_v39 = vpop.f32.mrf.mxu3 }
  0xd0   : > { %898 = vst [vmem:[%s1036_s13 + $0x68] sm:$0xff] %v874_v35   ;;  %v391_v40 = vpop.f32.mrf.mxu0  ;;  %v411_v41 = vpop.f32.mrf.mxu1  ;;  %v430_v48 = vadd.f32 %v1023_v26, %v429_v38  ;;  %v450_v49 = vadd.f32 %v1023_v26, %v449_v39 }
  0xd1   : > { %v392_v44 = vadd.f32 %v1023_v26, %v391_v40  ;;  %v412_v45 = vadd.f32 %v1023_v26, %v411_v41 }
  0xd2   : > { %v511_v58 = vmul.f32 0.1, %v430_v48  ;;  %v519_v59 = vmul.f32 0.1, %v450_v49  ;;  %vm479_vm4 = vcmp.ge.f32.partialorder %v430_v48, 0.0  ;;  %vm487_vm5 = vcmp.ge.f32.partialorder %v450_v49, 0.0 }
  0xd3   : > { %vm464_vm2 = vcmp.ge.f32.partialorder %v392_v44, 0.0  ;;  %v496_v46 = vmul.f32 0.1, %v392_v44  ;;  %vm472_vm3 = vcmp.ge.f32.partialorder %v412_v45, 0.0  ;;  %v504_v47 = vmul.f32 0.1, %v412_v45 }
  0xd4   : > { %v543_v2 = vsel %vm479_vm4, %v430_v48, %v511_v58  ;;  %v551_v3 = vsel %vm487_vm5, %v450_v49, %v519_v59 }
  0xd5   : > { %v528_v52 = vsel %vm464_vm2, %v392_v44, %v496_v46  ;;  %v536_v53 = vsel %vm472_vm3, %v412_v45, %v504_v47 }
  0xd6   : > { %v819_v54 = vpack.c.bf16 %v528_v52, %v527_v50  ;;  %v839_v55 = vpack.c.bf16 %v536_v53, %v535_v51 }
  0xd7   : > { %v431_v56 = vpop.f32.mrf.mxu2  ;;  %v451_v57 = vpop.f32.mrf.mxu3 }
  0xd8   : > { %887 = vst [vmem:[%s1036_s13 + $0x10] sm:$0xff] %v819_v54   ;;  %v432_v60 = vadd.f32 %v1023_v26, %v431_v56  ;;  %v452_v61 = vadd.f32 %v1023_v26, %v451_v57  ;;  %v394_v62 = vpop.f32.mrf.mxu0  ;;  %v414_v63 = vpop.f32.mrf.mxu1 }
  0xd9   : > { %891 = vst [vmem:[%s1036_s13 + $0x30] sm:$0xff] %v839_v55   ;;  %v395_v8 = vadd.f32 %v1023_v26, %v394_v62  ;;  %v415_v9 = vadd.f32 %v1023_v26, %v414_v63 }
  0xda   : > { %vm480_vm6 = vcmp.ge.f32.partialorder %v432_v60, 0.0  ;;  %v512_v0 = vmul.f32 0.1, %v432_v60  ;;  %vm488_vm7 = vcmp.ge.f32.partialorder %v452_v61, 0.0  ;;  %v520_v1 = vmul.f32 0.1, %v452_v61 }
  0xdb   : > { %v497_v14 = vmul.f32 0.1, %v395_v8  ;;  %v505_v15 = vmul.f32 0.1, %v415_v9  ;;  %vm465_vm8 = vcmp.ge.f32.partialorder %v395_v8, 0.0  ;;  %vm473_vm9 = vcmp.ge.f32.partialorder %v415_v9, 0.0 }
  0xdc   : > { %v544_v4 = vsel %vm480_vm6, %v432_v60, %v512_v0  ;;  %v552_v5 = vsel %vm488_vm7, %v452_v61, %v520_v1 }
  0xdd   : > { %v859_v6 = vpack.c.bf16 %v544_v4, %v543_v2  ;;  %v879_v7 = vpack.c.bf16 %v552_v5, %v551_v3  ;;  %v529_v22 = vsel %vm465_vm8, %v395_v8, %v497_v14  ;;  %v537_v23 = vsel %vm473_vm9, %v415_v9, %v505_v15 }
  0xdf   : > { %895 = vst [vmem:[%s1036_s13 + $0x50] sm:$0xff] %v859_v6   ;;  %v434_v10 = vpop.f32.mrf.mxu2  ;;  %v454_v11 = vpop.f32.mrf.mxu3 }
  0xe0   : > { %899 = vst [vmem:[%s1036_s13 + $0x70] sm:$0xff] %v879_v7   ;;  %v396_v12 = vpop.f32.mrf.mxu0  ;;  %v416_v13 = vpop.f32.mrf.mxu1  ;;  %v435_v20 = vadd.f32 %v1023_v26, %v434_v10  ;;  %v455_v21 = vadd.f32 %v1023_v26, %v454_v11 }
  0xe1   : > { %v397_v16 = vadd.f32 %v1023_v26, %v396_v12  ;;  %v417_v17 = vadd.f32 %v1023_v26, %v416_v13 }
  0xe2   : > { %v513_v31 = vmul.f32 0.1, %v435_v20  ;;  %v521_v32 = vmul.f32 0.1, %v455_v21  ;;  %vm481_vm12 = vcmp.ge.f32.partialorder %v435_v20, 0.0  ;;  %vm489_vm13 = vcmp.ge.f32.partialorder %v455_v21, 0.0 }
  0xe3   : > { %vm466_vm10 = vcmp.ge.f32.partialorder %v397_v16, 0.0  ;;  %v498_v18 = vmul.f32 0.1, %v397_v16  ;;  %vm474_vm11 = vcmp.ge.f32.partialorder %v417_v17, 0.0  ;;  %v506_v19 = vmul.f32 0.1, %v417_v17 }
  0xe4   : > { %v545_v37 = vsel %vm481_vm12, %v435_v20, %v513_v31  ;;  %v553_v38 = vsel %vm489_vm13, %v455_v21, %v521_v32 }
  0xe5   : > { %v530_v24 = vsel %vm466_vm10, %v397_v16, %v498_v18  ;;  %v538_v25 = vsel %vm474_vm11, %v417_v17, %v506_v19 }
  0xe6   : > { %v824_v27 = vpack.c.bf16 %v530_v24, %v529_v22  ;;  %v844_v28 = vpack.c.bf16 %v538_v25, %v537_v23 }
  0xe7   : > { %v436_v29 = vpop.f32.mrf.mxu2  ;;  %v456_v30 = vpop.f32.mrf.mxu3 }
  0xe8   : > { %888 = vst [vmem:[%s1036_s13 + $0x18] sm:$0xff] %v824_v27   ;;  %v437_v33 = vadd.f32 %v1023_v26, %v436_v29  ;;  %v457_v34 = vadd.f32 %v1023_v26, %v456_v30 }
  0xe9   : > { %892 = vst [vmem:[%s1036_s13 + $0x38] sm:$0xff] %v844_v28  }
  0xea   : > { %vm482_vm14 = vcmp.ge.f32.partialorder %v437_v33, 0.0  ;;  %v514_v35 = vmul.f32 0.1, %v437_v33  ;;  %vm490_vm15 = vcmp.ge.f32.partialorder %v457_v34, 0.0  ;;  %v522_v36 = vmul.f32 0.1, %v457_v34 }
  0xec   : > { %v546_v39 = vsel %vm482_vm14, %v437_v33, %v514_v35  ;;  %v554_v40 = vsel %vm490_vm15, %v457_v34, %v522_v36 }
  0xed   : > { %v864_v41 = vpack.c.bf16 %v546_v39, %v545_v37  ;;  %v884_v42 = vpack.c.bf16 %v554_v40, %v553_v38 }
  0xef   : > { %896 = vst [vmem:[%s1036_s13 + $0x58] sm:$0xff] %v864_v41  }
  0xf0   : > { %900 = vst [vmem:[%s1036_s13 + $0x78] sm:$0xff] %v884_v42  }
  0xf1 PF: > { %s13_s12 = sadd.s32 1, %s940_s12  }
  0xf2   : > { %p10_p4 = scmp.ge.s32.totalorder %s13_s12, 4  }
  0xf4   :  { %12 = sbr.rel (!%p10_p4) target bundleno = 1 (0x1), region = 62 }

// kernel: pallas_forward.11
= control target key start
LH: loop header
LB: loop body
LE: loop exit
PB: predicated region body
PF: predicated region fallthrough
CT: control target
= control target key end

     0   :  { %s1248_s12 = smov 0   ;;  %s1445_s0 = inlined_call_operand.vmem [shape: bf16[512,144], index: 0, kind: input, shape index: {}]   ;;  %s1446_s1 = inlined_call_operand.vmem [shape: bf16[144,128], index: 1, kind: input, shape index: {}]   ;;  %s1447_s2 = inlined_call_operand.vmem [shape: f32[1,128], index: 2, kind: input, shape index: {}]   ;;  %s1448_s3 = inlined_call_operand.vmem [shape: bf16[512,128], index: 3, kind: output, shape index: {}]  }
   0x1 LB: > { %s873_s13 = sadd.s32 4294967295, %s1226_s12   ;;  %p877_p0 = scmp.ge.s32.totalorder %s1226_s12, 1  ;;  %s1226_s12 = sphi %s1248_s12, %s13_s12  }
   0x2   : > { %p139_p1 = scmp.lt.s32.totalorder %s1226_s12, 3 }
   0x4   : > { %p140_p2 = pnand %p877_p0, %p139_p1 }
   0x5   : > { %s878_s18 = sshll.u32 (!%p140_p2), %s873_s13, 5 }
   0x6   : > { %143 = sbr.rel (%p140_p2) target bundleno = 305 (0x131), region = 32  ;;  %p165_p3 = scmp.lt.s32.totalorder (!%p140_p2), %s878_s18, 63 }
   0xb   : > { %v1105_v0 = vld [vmem:[%s1446_s1 + $0x38] sm:$0xff]  ;;  %v1106_v1 = vld [vmem:[%s1446_s1 + $0x40] sm:$0xff]  ;;  %v1104_v2 = vld [vmem:[%s1446_s1 + $0x30] sm:$0xff]  ;;  %s1450_s18 = smov (!%p165_p3, %s878_s18), 63  ;;  %vm430_vm0 = vcmask 130048  }
   0xc   : > { %479 = vmatpush.bf16.msra.mxu0 %v1105_v0  ;;  %1202 = vmatpush.bf16.msra.mxu2 %v1105_v0  ;;  %s1065_s21 = sshll.u32 %s1450_s18, 3  ;;  %v1103_v3 = vld [vmem:[%s1446_s1 + $0x28] sm:$0xff]  ;;  %v1102_v7 = vld [vmem:[%s1446_s1 + $0x20] sm:$0xff]  ;;  %v1101_v11 = vld [vmem:[%s1446_s1 + $0x18] sm:$0xff]  ;;  %s882_s13 = sshll.u32 %s1450_s18, 2 }
   0xd   : > { %575 = vmatpush.bf16.msra.mxu1 %v1106_v1  ;;  %1210 = vmatpush.bf16.msra.mxu3 %v1106_v1  ;;  %s1271_s24 = scalar_lea.vmem %s1445_s0, %s1065_s21  ;;  %v1100_v12 = vld [vmem:[%s1446_s1 + $0x10] sm:$0xff]  ;;  %v1099_v16 = vld [vmem:[%s1446_s1 + $0x8] sm:$0xff]  ;;  %v1098_v19 = vld [vmem:[%s1446_s1] sm:$0xff]  ;;  %s1384_s16 = scalar_lea.vmem %s1448_s3, %s882_s13 }
   0xe   : > { %v1066_v4 = vld [vmem:[%s1271_s24 + $0x4] sm:$0xf]  ;;  %v887_v5 = vld [vmem:[%s1271_s24 + $0x8] sm:$0xf0]  ;;  %v1084_v8 = vld [vmem:[%s1271_s24 + $0x94] sm:$0xf] }
   0xf   : > { %v890_v6 = vor.u32 %v1066_v4, %v887_v5  ;;  %v959_v9 = vld [vmem:[%s1271_s24 + $0x98] sm:$0xf0]  ;;  %v1068_v13 = vld [vmem:[%s1271_s24 + $0x14] sm:$0xf]  ;;  %v1086_v17 = vld [vmem:[%s1271_s24 + $0xa4] sm:$0xf] }
  0x10   : > { %480 = vmatpush.bf16.msra.mxu0 %v1104_v2  ;;  %1203 = vmatpush.bf16.msra.mxu2 %v1104_v2  ;;  %v962_v10 = vor.u32 %v1084_v8, %v959_v9  ;;  %v895_v14 = vld [vmem:[%s1271_s24 + $0x18] sm:$0xf0]  ;;  %v967_v18 = vld [vmem:[%s1271_s24 + $0xa8] sm:$0xf0]  ;;  %v885_v20 = vld [vmem:[%s1271_s24] sm:$0xf] }
  0x11   : > { %1047 = vmatmul.msk.bf16.vlgmr.msra.gmra.mxu1 %vm430_vm0, %v890_v6  ;;  %v898_v15 = vor.u32 %v1068_v13, %v895_v14  ;;  %v1067_v21 = vld [vmem:[%s1271_s24 + $0x4] sm:$0xf0]  ;;  %v970_v22 = vor.u32 %v1086_v17, %v967_v18  ;;  %v949_v23 = vld [vmem:[%s1271_s24 + $0x80] sm:$0xf]  ;;  %v1070_v27 = vld [vmem:[%s1271_s24 + $0x24] sm:$0xf] }
  0x12   : > { %1056 = vmatmul.msk.bf16.vlgmr.msra.gmra.mxu3 %vm430_vm0, %v962_v10  ;;  %v1083_v24 = vld [vmem:[%s1271_s24 + $0x84] sm:$0xf0]  ;;  %v886_v25 = vor.u32 %v1067_v21, %v885_v20  ;;  %v903_v28 = vld [vmem:[%s1271_s24 + $0x28] sm:$0xf0]  ;;  %v1088_v30 = vld [vmem:[%s1271_s24 + $0xb4] sm:$0xf] }
  0x13   : > { %v950_v26 = vor.u32 %v1083_v24, %v949_v23  ;;  %v906_v29 = vor.u32 %v1070_v27, %v903_v28  ;;  %v975_v31 = vld [vmem:[%s1271_s24 + $0xb8] sm:$0xf0]  ;;  %v893_v32 = vld [vmem:[%s1271_s24 + $0x10] sm:$0xf]  ;;  %v1069_v33 = vld [vmem:[%s1271_s24 + $0x14] sm:$0xf0] }
  0x14   : > { %481 = vmatpush.bf16.msra.mxu0 %v1103_v3  ;;  %1204 = vmatpush.bf16.msra.mxu2 %v1103_v3  ;;  %v978_v34 = vor.u32 %v1088_v30, %v975_v31  ;;  %v957_v35 = vld [vmem:[%s1271_s24 + $0x90] sm:$0xf]  ;;  %v1085_v36 = vld [vmem:[%s1271_s24 + $0x94] sm:$0xf0]  ;;  %v894_v37 = vor.u32 %v1069_v33, %v893_v32  ;;  %v1072_v39 = vld [vmem:[%s1271_s24 + $0x34] sm:$0xf] }
  0x15   : > { %v958_v38 = vor.u32 %v1085_v36, %v957_v35  ;;  %v911_v40 = vld [vmem:[%s1271_s24 + $0x38] sm:$0xf0]  ;;  %v1090_v42 = vld [vmem:[%s1271_s24 + $0xc4] sm:$0xf]  ;;  %v983_v43 = vld [vmem:[%s1271_s24 + $0xc8] sm:$0xf0] }
  0x16   : > { %v914_v41 = vor.u32 %v1072_v39, %v911_v40  ;;  %v901_v44 = vld [vmem:[%s1271_s24 + $0x20] sm:$0xf]  ;;  %v1071_v45 = vld [vmem:[%s1271_s24 + $0x24] sm:$0xf0]  ;;  %v986_v46 = vor.u32 %v1090_v42, %v983_v43  ;;  %v1074_v51 = vld [vmem:[%s1271_s24 + $0x44] sm:$0xf] }
  0x17   : > { %v965_v47 = vld [vmem:[%s1271_s24 + $0xa0] sm:$0xf]  ;;  %v1087_v48 = vld [vmem:[%s1271_s24 + $0xa4] sm:$0xf0]  ;;  %v902_v49 = vor.u32 %v1071_v45, %v901_v44  ;;  %v919_v52 = vld [vmem:[%s1271_s24 + $0x48] sm:$0xf0] }
  0x18   : > { %482 = vmatpush.bf16.msra.mxu0 %v1102_v7  ;;  %1205 = vmatpush.bf16.msra.mxu2 %v1102_v7  ;;  %v966_v50 = vor.u32 %v1087_v48, %v965_v47  ;;  %v922_v53 = vor.u32 %v1074_v51, %v919_v52  ;;  %v1092_v54 = vld [vmem:[%s1271_s24 + $0xd4] sm:$0xf]  ;;  %v991_v55 = vld [vmem:[%s1271_s24 + $0xd8] sm:$0xf0]  ;;  %v909_v56 = vld [vmem:[%s1271_s24 + $0x30] sm:$0xf] }
  0x19   : > { %v1073_v57 = vld [vmem:[%s1271_s24 + $0x34] sm:$0xf0]  ;;  %v994_v58 = vor.u32 %v1092_v54, %v991_v55  ;;  %v973_v59 = vld [vmem:[%s1271_s24 + $0xb0] sm:$0xf]  ;;  %v1076_v63 = vld [vmem:[%s1271_s24 + $0x54] sm:$0xf] }
  0x1a   : > { %v1089_v60 = vld [vmem:[%s1271_s24 + $0xb4] sm:$0xf0]  ;;  %v910_v61 = vor.u32 %v1073_v57, %v909_v56  ;;  %v927_v0 = vld [vmem:[%s1271_s24 + $0x58] sm:$0xf0]  ;;  %v1094_v2 = vld [vmem:[%s1271_s24 + $0xe4] sm:$0xf] }
  0x1b   : > { %v974_v62 = vor.u32 %v1089_v60, %v973_v59  ;;  %v930_v1 = vor.u32 %v1076_v63, %v927_v0  ;;  %v999_v3 = vld [vmem:[%s1271_s24 + $0xe8] sm:$0xf0]  ;;  %v917_v4 = vld [vmem:[%s1271_s24 + $0x40] sm:$0xf]  ;;  %v1075_v5 = vld [vmem:[%s1271_s24 + $0x44] sm:$0xf0] }
  0x1c   : > { %483 = vmatpush.bf16.msra.mxu0 %v1101_v11  ;;  %1206 = vmatpush.bf16.msra.mxu2 %v1101_v11  ;;  %v1002_v6 = vor.u32 %v1094_v2, %v999_v3  ;;  %v981_v7 = vld [vmem:[%s1271_s24 + $0xc0] sm:$0xf]  ;;  %v1091_v8 = vld [vmem:[%s1271_s24 + $0xc4] sm:$0xf0]  ;;  %v918_v9 = vor.u32 %v1075_v5, %v917_v4  ;;  %v1078_v11 = vld [vmem:[%s1271_s24 + $0x64] sm:$0xf] }
  0x1d   : > { %v982_v10 = vor.u32 %v1091_v8, %v981_v7  ;;  %v1096_v14 = vld [vmem:[%s1271_s24 + $0xf4] sm:$0xf]  ;;  %v1077_v17 = vld [vmem:[%s1271_s24 + $0x54] sm:$0xf0]  ;;  %v943_v24 = vld [vmem:[%s1271_s24 + $0x78] sm:$0xf0] }
  0x1e   : > { %v1093_v20 = vld [vmem:[%s1271_s24 + $0xd4] sm:$0xf0]  ;;  %v1080_v23 = vld [vmem:[%s1271_s24 + $0x74] sm:$0xf]  ;;  %v1079_v27 = vld [vmem:[%s1271_s24 + $0x64] sm:$0xf0] }
  0x1f   : > { %v997_v28 = vld [vmem:[%s1271_s24 + $0xe0] sm:$0xf]  ;;  %v1082_v32 = vld [vmem:[%s1271_s24 + $0x84] sm:$0xf]  ;;  %v951_v33 = vld [vmem:[%s1271_s24 + $0x88] sm:$0xf0] }
  0x20   : > { %484 = vmatpush.bf16.msra.mxu0 %v1100_v12  ;;  %1207 = vmatpush.bf16.msra.mxu2 %v1100_v12  ;;  %v935_v12 = vld [vmem:[%s1271_s24 + $0x68] sm:$0xf0]  ;;  %v941_v36 = vld [vmem:[%s1271_s24 + $0x70] sm:$0xf]  ;;  %v1097_v39 = vld [vmem:[%s1271_s24 + $0xf4] sm:$0xf0] }
  0x21   : > { %1048 = vmatmul.msk.bf16.gmra.mxu1 %vm430_vm0, %v898_v15  ;;  %v938_v13 = vor.u32 %v1078_v11, %v935_v12  ;;  %v1007_v15 = vld [vmem:[%s1271_s24 + $0xf8] sm:$0xf0]  ;;  %v1374_v44 = vld [vmem:[%s1447_s2] ss:$0 sm:$0xff] }
  0x22   : > { %1057 = vmatmul.msk.bf16.gmra.mxu3 %vm430_vm0, %v970_v22  ;;  %v1010_v18 = vor.u32 %v1096_v14, %v1007_v15 }
  0x24   : > { %485 = vmatpush.bf16.msra.mxu0 %v1099_v16  ;;  %1208 = vmatpush.bf16.msra.mxu2 %v1099_v16  ;;  %v925_v16 = vld [vmem:[%s1271_s24 + $0x50] sm:$0xf] }
  0x25   : > { %v926_v21 = vor.u32 %v1077_v17, %v925_v16 }
  0x28   : > { %486 = vmatpush.bf16.msra.mxu0 %v1098_v19  ;;  %1209 = vmatpush.bf16.msra.mxu2 %v1098_v19  ;;  %v989_v19 = vld [vmem:[%s1271_s24 + $0xd0] sm:$0xf] }
  0x29   : > { %v990_v22 = vor.u32 %v1093_v20, %v989_v19 }
  0x2b   : > { %487 = vmatmul.bf16.vlgmr.msra.gmra.mxu0 %v886_v25  ;;  %527 = vmatmul.bf16.vlgmr.msra.gmra.mxu2 %v950_v26  ;;  %v946_v25 = vor.u32 %v1080_v23, %v943_v24  ;;  %v933_v26 = vld [vmem:[%s1271_s24 + $0x60] sm:$0xf] }
  0x2c   : > { %v934_v30 = vor.u32 %v1079_v27, %v933_v26 }
  0x31   : > { %1049 = vmatmul.msk.bf16.gmra.mxu1 %vm430_vm0, %v906_v29  ;;  %v1095_v29 = vld [vmem:[%s1271_s24 + $0xe4] sm:$0xf0] }
  0x32   : > { %1058 = vmatmul.msk.bf16.gmra.mxu3 %vm430_vm0, %v978_v34  ;;  %v998_v31 = vor.u32 %v1095_v29, %v997_v28  ;;  %v954_v34 = vor.u32 %v1082_v32, %v951_v33 }
  0x3b   : > { %492 = vmatmul.bf16.gmra.mxu0 %v894_v37  ;;  %532 = vmatmul.bf16.gmra.mxu2 %v958_v38  ;;  %v1081_v37 = vld [vmem:[%s1271_s24 + $0x74] sm:$0xf0]  ;;  %v1005_v38 = vld [vmem:[%s1271_s24 + $0xf0] sm:$0xf] }
  0x3c   : > { %v942_v40 = vor.u32 %v1081_v37, %v941_v36 }
  0x41   : > { %1050 = vmatmul.msk.bf16.gmra.mxu1 %vm430_vm0, %v914_v41  ;;  %v1006_v41 = vor.u32 %v1097_v39, %v1005_v38 }
  0x42   : > { %1059 = vmatmul.msk.bf16.gmra.mxu3 %vm430_vm0, %v986_v46 }
  0x4b   : > { %497 = vmatmul.bf16.gmra.mxu0 %v902_v49  ;;  %537 = vmatmul.bf16.gmra.mxu2 %v966_v50 }
  0x51   : > { %1051 = vmatmul.msk.bf16.gmra.mxu1 %vm430_vm0, %v922_v53 }
  0x52   : > { %1060 = vmatmul.msk.bf16.gmra.mxu3 %vm430_vm0, %v994_v58 }
  0x5b   : > { %502 = vmatmul.bf16.gmra.mxu0 %v910_v61  ;;  %542 = vmatmul.bf16.gmra.mxu2 %v974_v62 }
  0x61   : > { %1052 = vmatmul.msk.bf16.gmra.mxu1 %vm430_vm0, %v930_v1 }
  0x62   : > { %1061 = vmatmul.msk.bf16.gmra.mxu3 %vm430_vm0, %v1002_v6 }
  0x6b   : > { %507 = vmatmul.bf16.gmra.mxu0 %v918_v9  ;;  %547 = vmatmul.bf16.gmra.mxu2 %v982_v10 }
  0x71   : > { %1053 = vmatmul.msk.bf16.gmra.mxu1 %vm430_vm0, %v938_v13 }
  0x72   : > { %1062 = vmatmul.msk.bf16.gmra.mxu3 %vm430_vm0, %v1010_v18 }
  0x7b   : > { %512 = vmatmul.bf16.gmra.mxu0 %v926_v21  ;;  %552 = vmatmul.bf16.gmra.mxu2 %v990_v22 }
  0x81   : > { %1054 = vmatmul.msk.bf16.gmra.mxu1 %vm430_vm0, %v946_v25 }
  0x8b   : > { %517 = vmatmul.bf16.gmra.mxu0 %v934_v30  ;;  %557 = vmatmul.bf16.gmra.mxu2 %v998_v31 }
  0x8e   : > { %v577_v35 = vpop.f32.mrf.mxu1 }
  0x91   : > { %1055 = vmatmul.msk.bf16.gmra.mxu1 %vm430_vm0, %v954_v34 }
  0x95   : > { %v622_v45 = vpop.f32.mrf.mxu3 }
  0x96   : > { %v579_v42 = vpop.f32.mrf.mxu1 }
  0x9b   : > { %522 = vmatmul.bf16.gmra.mxu0 %v942_v40  ;;  %562 = vmatmul.bf16.gmra.mxu2 %v1006_v41 }
  0x9d   : > { %v624_v54 = vpop.f32.mrf.mxu3 }
  0x9e   : > { %v582_v43 = vpop.f32.mrf.mxu1 }
  0xa5   : > { %v627_v1 = vpop.f32.mrf.mxu3 }
  0xa6   : > { %v584_v47 = vpop.f32.mrf.mxu1 }
  0xa8   : > { %v488_v46 = vpop.f32.mrf.mxu0 }
  0xa9   : > { %v489_v48 = vadd.f32 %v1374_v44, %v488_v46 }
  0xab   : > { %v578_v49 = vadd.f32 %v577_v35, %v489_v48 }
  0xad   : > { %v689_v55 = vmul.f32 0.1, %v578_v49  ;;  %vm657_vm1 = vcmp.ge.f32.partialorder %v578_v49, 0.0  ;;  %v629_v11 = vpop.f32.mrf.mxu3 }
  0xae   : > { %v1377_v50 = vpop.f32.mrf.mxu2  ;;  %v587_v53 = vpop.f32.mrf.mxu1 }
  0xaf   : > { %v721_v58 = vsel %vm657_vm1, %v578_v49, %v689_v55 }
  0xb0   : > { %v490_v51 = vpop.f32.mrf.mxu0 }
  0xb1   : > { %v491_v52 = vadd.f32 %v1374_v44, %v490_v51 }
  0xb3   : > { %v580_v56 = vadd.f32 %v579_v42, %v491_v52 }
  0xb5   : > { %vm658_vm2 = vcmp.ge.f32.partialorder %v580_v56, 0.0  ;;  %v690_v57 = vmul.f32 0.1, %v580_v56  ;;  %v632_v29 = vpop.f32.mrf.mxu3 }
  0xb6   : > { %v1386_v60 = vpop.f32.mrf.mxu2  ;;  %v589_v63 = vpop.f32.mrf.mxu1 }
  0xb7   : > { %v722_v59 = vsel %vm658_vm2, %v580_v56, %v690_v57 }
  0xb8   : > { %v1110_v61 = vpack.c.bf16 %v722_v59, %v721_v58  ;;  %v493_v62 = vpop.f32.mrf.mxu0 }
  0xb9   : > { %v494_v0 = vadd.f32 %v1374_v44, %v493_v62 }
  0xba   : > { %1111 = vst [vmem:[%s1384_s16] sm:$0xff] %v1110_v61  }
  0xbb   : > { %v583_v2 = vadd.f32 %v582_v43, %v494_v0 }
  0xbd   : > { %v691_v8 = vmul.f32 0.1, %v583_v2  ;;  %vm659_vm3 = vcmp.ge.f32.partialorder %v583_v2, 0.0  ;;  %v634_v46 = vpop.f32.mrf.mxu3 }
  0xbe   : > { %v533_v3 = vpop.f32.mrf.mxu2  ;;  %v592_v6 = vpop.f32.mrf.mxu1 }
  0xbf   : > { %v534_v7 = vadd.f32 %v1374_v44, %v533_v3  ;;  %v723_v13 = vsel %vm659_vm3, %v583_v2, %v691_v8 }
  0xc0   : > { %v495_v4 = vpop.f32.mrf.mxu0 }
  0xc1   : > { %v496_v5 = vadd.f32 %v1374_v44, %v495_v4  ;;  %v623_v12 = vadd.f32 %v622_v45, %v534_v7 }
  0xc3   : > { %v585_v9 = vadd.f32 %v584_v47, %v496_v5  ;;  %v707_v20 = vmul.f32 0.1, %v623_v12  ;;  %vm675_vm5 = vcmp.ge.f32.partialorder %v623_v12, 0.0 }
  0xc5   : > { %vm660_vm4 = vcmp.ge.f32.partialorder %v585_v9, 0.0  ;;  %v692_v10 = vmul.f32 0.1, %v585_v9  ;;  %v739_v24 = vsel %vm675_vm5, %v623_v12, %v707_v20  ;;  %v637_v0 = vpop.f32.mrf.mxu3 }
  0xc6   : > { %v535_v15 = vpop.f32.mrf.mxu2  ;;  %v594_v19 = vpop.f32.mrf.mxu1 }
  0xc7   : > { %v724_v14 = vsel %vm660_vm4, %v585_v9, %v692_v10  ;;  %v536_v17 = vadd.f32 %v1374_v44, %v535_v15 }
  0xc8   : > { %v1115_v16 = vpack.c.bf16 %v724_v14, %v723_v13  ;;  %v498_v18 = vpop.f32.mrf.mxu0 }
  0xc9   : > { %v625_v21 = vadd.f32 %v624_v54, %v536_v17  ;;  %v499_v22 = vadd.f32 %v1374_v44, %v498_v18 }
  0xca   : > { %1187 = vst [vmem:[%s1384_s16 + $0x8] sm:$0xff] %v1115_v16  }
  0xcb   : > { %vm676_vm6 = vcmp.ge.f32.partialorder %v625_v21, 0.0  ;;  %v708_v23 = vmul.f32 0.1, %v625_v21  ;;  %v588_v27 = vadd.f32 %v587_v53, %v499_v22 }
  0xcd   : > { %v740_v25 = vsel %vm676_vm6, %v625_v21, %v708_v23  ;;  %v693_v34 = vmul.f32 0.1, %v588_v27  ;;  %vm661_vm7 = vcmp.ge.f32.partialorder %v588_v27, 0.0  ;;  %v639_v14 = vpop.f32.mrf.mxu3 }
  0xce   : > { %v1155_v26 = vpack.c.bf16 %v740_v25, %v739_v24  ;;  %v538_v28 = vpop.f32.mrf.mxu2  ;;  %v597_v32 = vpop.f32.mrf.mxu1 }
  0xcf   : > { %v539_v33 = vadd.f32 %v1374_v44, %v538_v28  ;;  %v725_v38 = vsel %vm661_vm7, %v588_v27, %v693_v34 }
  0xd0   : > { %v500_v30 = vpop.f32.mrf.mxu0  ;;  %1195 = vst [vmem:[%s1384_s16 + $0x48] sm:$0xff] %v1155_v26  }
  0xd1   : > { %v501_v31 = vadd.f32 %v1374_v44, %v500_v30  ;;  %v628_v37 = vadd.f32 %v627_v1, %v539_v33 }
  0xd3   : > { %v590_v35 = vadd.f32 %v589_v63, %v501_v31  ;;  %v709_v47 = vmul.f32 0.1, %v628_v37  ;;  %vm677_vm9 = vcmp.ge.f32.partialorder %v628_v37, 0.0 }
  0xd5   : > { %vm662_vm8 = vcmp.ge.f32.partialorder %v590_v35, 0.0  ;;  %v694_v36 = vmul.f32 0.1, %v590_v35  ;;  %v741_v52 = vsel %vm677_vm9, %v628_v37, %v709_v47  ;;  %v642_v31 = vpop.f32.mrf.mxu3 }
  0xd6   : > { %v540_v40 = vpop.f32.mrf.mxu2  ;;  %v599_v45 = vpop.f32.mrf.mxu1 }
  0xd7   : > { %v726_v39 = vsel %vm662_vm8, %v590_v35, %v694_v36  ;;  %v541_v42 = vadd.f32 %v1374_v44, %v540_v40 }
  0xd8   : > { %v1120_v41 = vpack.c.bf16 %v726_v39, %v725_v38  ;;  %v503_v43 = vpop.f32.mrf.mxu0 }
  0xd9   : > { %v630_v48 = vadd.f32 %v629_v11, %v541_v42  ;;  %v504_v49 = vadd.f32 %v1374_v44, %v503_v43 }
  0xda   : > { %1188 = vst [vmem:[%s1384_s16 + $0x10] sm:$0xff] %v1120_v41  }
  0xdb   : > { %vm678_vm10 = vcmp.ge.f32.partialorder %v630_v48, 0.0  ;;  %v710_v51 = vmul.f32 0.1, %v630_v48  ;;  %v593_v55 = vadd.f32 %v592_v6, %v504_v49 }
  0xdd   : > { %v742_v53 = vsel %vm678_vm10, %v630_v48, %v710_v51  ;;  %v695_v62 = vmul.f32 0.1, %v593_v55  ;;  %vm663_vm11 = vcmp.ge.f32.partialorder %v593_v55, 0.0  ;;  %v644_v49 = vpop.f32.mrf.mxu3 }
  0xde   : > { %v1160_v54 = vpack.c.bf16 %v742_v53, %v741_v52  ;;  %v543_v56 = vpop.f32.mrf.mxu2  ;;  %v602_v59 = vpop.f32.mrf.mxu1 }
  0xdf   : > { %v544_v61 = vadd.f32 %v1374_v44, %v543_v56  ;;  %v727_v3 = vsel %vm663_vm11, %v593_v55, %v695_v62 }
  0xe0   : > { %v505_v57 = vpop.f32.mrf.mxu0  ;;  %1196 = vst [vmem:[%s1384_s16 + $0x50] sm:$0xff] %v1160_v54  }
  0xe1   : > { %v506_v58 = vadd.f32 %v1374_v44, %v505_v57  ;;  %v633_v2 = vadd.f32 %v632_v29, %v544_v61 }
  0xe3   : > { %v595_v63 = vadd.f32 %v594_v19, %v506_v58  ;;  %v711_v10 = vmul.f32 0.1, %v633_v2  ;;  %vm679_vm13 = vcmp.ge.f32.partialorder %v633_v2, 0.0 }
  0xe5   : > { %vm664_vm12 = vcmp.ge.f32.partialorder %v595_v63, 0.0  ;;  %v696_v1 = vmul.f32 0.1, %v595_v63  ;;  %v743_v15 = vsel %vm679_vm13, %v633_v2, %v711_v10 }
  0xe6   : > { %v545_v5 = vpop.f32.mrf.mxu2  ;;  %v604_v9 = vpop.f32.mrf.mxu1 }
  0xe7   : > { %v728_v4 = vsel %vm664_vm12, %v595_v63, %v696_v1  ;;  %v546_v7 = vadd.f32 %v1374_v44, %v545_v5 }
  0xe8   : > { %v1125_v6 = vpack.c.bf16 %v728_v4, %v727_v3  ;;  %v508_v8 = vpop.f32.mrf.mxu0  ;;  %v647_v3 = vpop.f32.mrf.mxu3 }
  0xe9   : > { %v635_v11 = vadd.f32 %v634_v46, %v546_v7  ;;  %v509_v12 = vadd.f32 %v1374_v44, %v508_v8 }
  0xea   : > { %1189 = vst [vmem:[%s1384_s16 + $0x18] sm:$0xff] %v1125_v6  }
  0xeb   : > { %vm680_vm14 = vcmp.ge.f32.partialorder %v635_v11, 0.0  ;;  %v712_v13 = vmul.f32 0.1, %v635_v11  ;;  %v598_v18 = vadd.f32 %v597_v32, %v509_v12 }
  0xed   : > { %v744_v16 = vsel %vm680_vm14, %v635_v11, %v712_v13  ;;  %v697_v24 = vmul.f32 0.1, %v598_v18  ;;  %vm665_vm15 = vcmp.ge.f32.partialorder %v598_v18, 0.0 }
  0xee   : > { %v1165_v17 = vpack.c.bf16 %v744_v16, %v743_v15  ;;  %v548_v19 = vpop.f32.mrf.mxu2  ;;  %v607_v22 = vpop.f32.mrf.mxu1  ;;  %v529_v16 = vadd.f32 %v1374_v44, %v1377_v50 }
  0xef   : > { %v549_v23 = vadd.f32 %v1374_v44, %v548_v19  ;;  %v729_v28 = vsel %vm665_vm15, %v598_v18, %v697_v24  ;;  %v531_v24 = vadd.f32 %v1374_v44, %v1386_v60 }
  0xf0   : > { %v510_v20 = vpop.f32.mrf.mxu0  ;;  %1197 = vst [vmem:[%s1384_s16 + $0x58] sm:$0xff] %v1165_v17   ;;  %v649_v18 = vpop.f32.mrf.mxu3 }
  0xf1   : > { %v511_v21 = vadd.f32 %v1374_v44, %v510_v20  ;;  %v638_v27 = vadd.f32 %v637_v0, %v549_v23 }
  0xf3   : > { %v600_v25 = vadd.f32 %v599_v45, %v511_v21  ;;  %v713_v36 = vmul.f32 0.1, %v638_v27  ;;  %vm681_vm1 = vcmp.ge.f32.partialorder %v638_v27, 0.0 }
  0xf5   : > { %vm666_vm0 = vcmp.ge.f32.partialorder %v600_v25, 0.0  ;;  %v698_v26 = vmul.f32 0.1, %v600_v25  ;;  %v745_v40 = vsel %vm681_vm1, %v638_v27, %v713_v36 }
  0xf6   : > { %v550_v30 = vpop.f32.mrf.mxu2  ;;  %v609_v35 = vpop.f32.mrf.mxu1 }
  0xf7   : > { %v730_v29 = vsel %vm666_vm0, %v600_v25, %v698_v26  ;;  %v551_v33 = vadd.f32 %v1374_v44, %v550_v30 }
  0xf8   : > { %v1130_v32 = vpack.c.bf16 %v730_v29, %v729_v28  ;;  %v513_v34 = vpop.f32.mrf.mxu0 }
  0xf9   : > { %v640_v37 = vadd.f32 %v639_v14, %v551_v33  ;;  %v514_v38 = vadd.f32 %v1374_v44, %v513_v34 }
  0xfa   : > { %1190 = vst [vmem:[%s1384_s16 + $0x20] sm:$0xff] %v1130_v32  }
  0xfb   : > { %vm682_vm2 = vcmp.ge.f32.partialorder %v640_v37, 0.0  ;;  %v714_v39 = vmul.f32 0.1, %v640_v37  ;;  %v603_v43 = vadd.f32 %v602_v59, %v514_v38 }
  0xfd   : > { %v746_v41 = vsel %vm682_vm2, %v640_v37, %v714_v39  ;;  %v699_v52 = vmul.f32 0.1, %v603_v43  ;;  %vm667_vm3 = vcmp.ge.f32.partialorder %v603_v43, 0.0 }
  0xfe   : > { %v1170_v42 = vpack.c.bf16 %v746_v41, %v745_v40  ;;  %v553_v45 = vpop.f32.mrf.mxu2  ;;  %v1415_v48 = vpop.f32.mrf.mxu1 }
  0xff   : > { %v554_v51 = vadd.f32 %v1374_v44, %v553_v45  ;;  %v731_v56 = vsel %vm667_vm3, %v603_v43, %v699_v52  ;;  %v652_v41 = vpop.f32.mrf.mxu3 }
 0x100   : > { %v515_v46 = vpop.f32.mrf.mxu0  ;;  %1198 = vst [vmem:[%s1384_s16 + $0x60] sm:$0xff] %v1170_v42  }
 0x101   : > { %v516_v47 = vadd.f32 %v1374_v44, %v515_v46  ;;  %v643_v55 = vadd.f32 %v642_v31, %v554_v51 }
 0x103   : > { %v605_v53 = vadd.f32 %v604_v9, %v516_v47  ;;  %v715_v0 = vmul.f32 0.1, %v643_v55  ;;  %vm683_vm5 = vcmp.ge.f32.partialorder %v643_v55, 0.0 }
 0x105   : > { %vm668_vm4 = vcmp.ge.f32.partialorder %v605_v53, 0.0  ;;  %v700_v54 = vmul.f32 0.1, %v605_v53  ;;  %v747_v5 = vsel %vm683_vm5, %v643_v55, %v715_v0 }
 0x106   : > { %v555_v58 = vpop.f32.mrf.mxu2  ;;  %v1419_v63 = vpop.f32.mrf.mxu1 }
 0x107   : > { %v732_v57 = vsel %vm668_vm4, %v605_v53, %v700_v54  ;;  %v556_v61 = vadd.f32 %v1374_v44, %v555_v58 }
 0x108   : > { %v1135_v59 = vpack.c.bf16 %v732_v57, %v731_v56  ;;  %v518_v62 = vpop.f32.mrf.mxu0  ;;  %v654_v57 = vpop.f32.mrf.mxu3 }
 0x109   : > { %v645_v1 = vadd.f32 %v644_v49, %v556_v61  ;;  %v519_v2 = vadd.f32 %v1374_v44, %v518_v62 }
 0x10a   : > { %1191 = vst [vmem:[%s1384_s16 + $0x28] sm:$0xff] %v1135_v59  }
 0x10b   : > { %vm684_vm6 = vcmp.ge.f32.partialorder %v645_v1, 0.0  ;;  %v716_v4 = vmul.f32 0.1, %v645_v1  ;;  %v608_v8 = vadd.f32 %v607_v22, %v519_v2 }
 0x10d   : > { %v748_v6 = vsel %vm684_vm6, %v645_v1, %v716_v4  ;;  %v701_v14 = vmul.f32 0.1, %v608_v8  ;;  %vm669_vm7 = vcmp.ge.f32.partialorder %v608_v8, 0.0 }
 0x10e   : > { %v1175_v7 = vpack.c.bf16 %v748_v6, %v747_v5  ;;  %v558_v9 = vpop.f32.mrf.mxu2  ;;  %v617_v12 = vpop.f32.mrf.mxu1 }
 0x10f   : > { %v559_v13 = vadd.f32 %v1374_v44, %v558_v9  ;;  %v618_v20 = vadd.f32 %v617_v12, %v529_v16  ;;  %v733_v21 = vsel %vm669_vm7, %v608_v8, %v701_v14 }
 0x110   : > { %v520_v10 = vpop.f32.mrf.mxu0  ;;  %1199 = vst [vmem:[%s1384_s16 + $0x68] sm:$0xff] %v1175_v7  }
 0x111   : > { %v521_v11 = vadd.f32 %v1374_v44, %v520_v10  ;;  %v648_v19 = vadd.f32 %v647_v3, %v559_v13  ;;  %v705_v50 = vmul.f32 0.1, %v618_v20  ;;  %vm673_vm10 = vcmp.ge.f32.partialorder %v618_v20, 0.0 }
 0x113   : > { %v610_v15 = vadd.f32 %v609_v35, %v521_v11  ;;  %v717_v29 = vmul.f32 0.1, %v648_v19  ;;  %vm685_vm9 = vcmp.ge.f32.partialorder %v648_v19, 0.0  ;;  %v737_v35 = vsel %vm673_vm10, %v618_v20, %v705_v50 }
 0x115   : > { %vm670_vm8 = vcmp.ge.f32.partialorder %v610_v15, 0.0  ;;  %v702_v17 = vmul.f32 0.1, %v610_v15  ;;  %v749_v34 = vsel %vm685_vm9, %v648_v19, %v717_v29 }
 0x116   : > { %v560_v23 = vpop.f32.mrf.mxu2  ;;  %v619_v28 = vpop.f32.mrf.mxu1 }
 0x117   : > { %v734_v22 = vsel %vm670_vm8, %v610_v15, %v702_v17  ;;  %v561_v26 = vadd.f32 %v1374_v44, %v560_v23  ;;  %v620_v31 = vadd.f32 %v619_v28, %v531_v24 }
 0x118   : > { %v1140_v25 = vpack.c.bf16 %v734_v22, %v733_v21  ;;  %v523_v27 = vpop.f32.mrf.mxu0 }
 0x119   : > { %v650_v30 = vadd.f32 %v649_v18, %v561_v26  ;;  %v524_v32 = vadd.f32 %v1374_v44, %v523_v27  ;;  %vm674_vm12 = vcmp.ge.f32.partialorder %v620_v31, 0.0  ;;  %v706_v60 = vmul.f32 0.1, %v620_v31 }
 0x11a   : > { %1192 = vst [vmem:[%s1384_s16 + $0x30] sm:$0xff] %v1140_v25  }
 0x11b   : > { %vm686_vm11 = vcmp.ge.f32.partialorder %v650_v30, 0.0  ;;  %v718_v33 = vmul.f32 0.1, %v650_v30  ;;  %v738_v37 = vsel %vm674_vm12, %v620_v31, %v706_v60  ;;  %v613_v39 = vadd.f32 %v1415_v48, %v524_v32 }
 0x11c   : > { %v1150_v40 = vpack.c.bf16 %v738_v37, %v737_v35 }
 0x11d   : > { %v750_v36 = vsel %vm686_vm11, %v650_v30, %v718_v33  ;;  %v703_v47 = vmul.f32 0.1, %v613_v39  ;;  %vm671_vm13 = vcmp.ge.f32.partialorder %v613_v39, 0.0 }
 0x11e   : > { %v1180_v38 = vpack.c.bf16 %v750_v36, %v749_v34  ;;  %v563_v42 = vpop.f32.mrf.mxu2  ;;  %1194 = vst [vmem:[%s1384_s16 + $0x40] sm:$0xff] %v1150_v40  }
 0x11f   : > { %v564_v46 = vadd.f32 %v1374_v44, %v563_v42  ;;  %v735_v48 = vsel %vm671_vm13, %v613_v39, %v703_v47 }
 0x120   : > { %v525_v43 = vpop.f32.mrf.mxu0  ;;  %1200 = vst [vmem:[%s1384_s16 + $0x70] sm:$0xff] %v1180_v38  }
 0x121   : > { %v526_v45 = vadd.f32 %v1374_v44, %v525_v43  ;;  %v653_v52 = vadd.f32 %v652_v41, %v564_v46 }
 0x123   : > { %v615_v49 = vadd.f32 %v1419_v63, %v526_v45  ;;  %v719_v58 = vmul.f32 0.1, %v653_v52  ;;  %vm687_vm15 = vcmp.ge.f32.partialorder %v653_v52, 0.0 }
 0x125   : > { %vm672_vm14 = vcmp.ge.f32.partialorder %v615_v49, 0.0  ;;  %v704_v51 = vmul.f32 0.1, %v615_v49  ;;  %v751_v62 = vsel %vm687_vm15, %v653_v52, %v719_v58 }
 0x126   : > { %v565_v54 = vpop.f32.mrf.mxu2 }
 0x127   : > { %v736_v53 = vsel %vm672_vm14, %v615_v49, %v704_v51  ;;  %v566_v56 = vadd.f32 %v1374_v44, %v565_v54 }
 0x128   : > { %v1145_v55 = vpack.c.bf16 %v736_v53, %v735_v48 }
 0x129   : > { %v655_v59 = vadd.f32 %v654_v57, %v566_v56 }
 0x12a   : > { %1193 = vst [vmem:[%s1384_s16 + $0x38] sm:$0xff] %v1145_v55  }
 0x12b   : > { %vm688_vm0 = vcmp.ge.f32.partialorder %v655_v59, 0.0  ;;  %v720_v61 = vmul.f32 0.1, %v655_v59 }
 0x12d   : > { %v752_v63 = vsel %vm688_vm0, %v655_v59, %v720_v61 }
 0x12e   : > { %v1185_v0 = vpack.c.bf16 %v752_v63, %v751_v62 }
 0x130   : > { %1201 = vst [vmem:[%s1384_s16 + $0x78] sm:$0xff] %v1185_v0  }
 0x131 PF: > { %s13_s12 = sadd.s32 1, %s1226_s12  }
 0x132   : > { %p10_p4 = scmp.ge.s32.totalorder %s13_s12, 4  }
 0x134   :  { %12 = sbr.rel (!%p10_p4) target bundleno = 1 (0x1), region = 62 }

// kernel: pallas_forward.12
= control target key start
LH: loop header
LB: loop body
LE: loop exit
PB: predicated region body
PF: predicated region fallthrough
CT: control target
= control target key end

     0   :  { %s959_s12 = smov 0   ;;  %s1087_s0 = inlined_call_operand.vmem [shape: bf16[512,72], index: 0, kind: input, shape index: {}]   ;;  %s1088_s1 = inlined_call_operand.vmem [shape: bf16[72,128], index: 1, kind: input, shape index: {}]   ;;  %s1089_s2 = inlined_call_operand.vmem [shape: f32[1,128], index: 2, kind: input, shape index: {}]   ;;  %s1090_s3 = inlined_call_operand.vmem [shape: bf16[512,128], index: 3, kind: output, shape index: {}]  }
   0x1 LB: > { %s685_s13 = sadd.s32 4294967295, %s937_s12   ;;  %p689_p0 = scmp.ge.s32.totalorder %s937_s12, 1  ;;  %s937_s12 = sphi %s959_s12, %s13_s12  }
   0x2   : > { %p138_p1 = scmp.lt.s32.totalorder %s937_s12, 3 }
   0x4   : > { %p139_p2 = pnand %p689_p0, %p138_p1 }
   0x5   : > { %s690_s16 = sshll.u32 (!%p139_p2), %s685_s13, 5 }
   0x6   : > { %142 = sbr.rel (%p139_p2) target bundleno = 234 (0xea), region = 32  ;;  %p163_p3 = scmp.lt.s32.totalorder (!%p139_p2), %s690_s16, 63 }
   0xb   : > { %v215_v0 = vld [vmem:[%s1088_s1 + $0x20] sm:$0xf]  ;;  %vm376_vm0 = vcmask 1043456   ;;  %v811_v4 = vld [vmem:[%s1088_s1 + $0x18] sm:$0xff]  ;;  %v810_v5 = vld [vmem:[%s1088_s1 + $0x10] sm:$0xff]  ;;  %s1092_s16 = smov (!%p163_p3, %s690_s16), 63 }
   0xc   : > { %v317_v1 = vunpack.c.l.b16 %v215_v0  ;;  %v809_v6 = vld [vmem:[%s1088_s1 + $0x8] sm:$0xff]  ;;  %s691_s23 = sshll.u32 %s1092_s16, 2  ;;  %v808_v7 = vld [vmem:[%s1088_s1] sm:$0xff]  ;;  %vm327_vm1 = vcmask 588800  }
   0xd   : > { %s990_s28 = scalar_lea.vmem %s1087_s0, %s691_s23  ;;  %v1027_v26 = vld [vmem:[%s1089_s2] ss:$0 sm:$0xff]  ;;  %s1040_s6 = scalar_lea.vmem %s1090_s3, %s691_s23 }
   0xe   : > { %v322_v2 = vpack.c.b16 %v317_v1, %v317_v1  ;;  %v792_v8 = vld [vmem:[%s990_s28] sm:$0xff]  ;;  %v793_v12 = vld [vmem:[%s990_s28 + $0x8] sm:$0xff]  ;;  %v794_v16 = vld [vmem:[%s990_s28 + $0x10] sm:$0xff] }
   0xf   : > { %v796_v9 = vld [vmem:[%s990_s28 + $0x20] sm:$0xff]  ;;  %v797_v13 = vld [vmem:[%s990_s28 + $0x28] sm:$0xff]  ;;  %v798_v17 = vld [vmem:[%s990_s28 + $0x30] sm:$0xff] }
  0x10   : > { %v378_v3 = vsel %vm376_vm0, %v322_v2, 0  ;;  %v800_v10 = vld [vmem:[%s990_s28 + $0x40] sm:$0xff]  ;;  %v801_v14 = vld [vmem:[%s990_s28 + $0x48] sm:$0xff]  ;;  %v802_v18 = vld [vmem:[%s990_s28 + $0x50] sm:$0xff] }
  0x11   : > { %383 = vmatpush.bf16.msra.mxu0 %v378_v3  ;;  %907 = vmatpush.bf16.msra.mxu1 %v378_v3  ;;  %v804_v11 = vld [vmem:[%s990_s28 + $0x60] sm:$0xff]  ;;  %v805_v15 = vld [vmem:[%s990_s28 + $0x68] sm:$0xff]  ;;  %v806_v19 = vld [vmem:[%s990_s28 + $0x70] sm:$0xff] }
  0x12   : > { %908 = vmatpush.bf16.msra.mxu2 %v378_v3  ;;  %909 = vmatpush.bf16.msra.mxu3 %v378_v3  ;;  %v795_v20 = vld [vmem:[%s990_s28 + $0x18] sm:$0xff] }
  0x13   : > { %v799_v21 = vld [vmem:[%s990_s28 + $0x38] sm:$0xff] }
  0x14   : > { %v803_v22 = vld [vmem:[%s990_s28 + $0x58] sm:$0xff] }
  0x15   : > { %384 = vmatpush.bf16.msra.mxu0 %v811_v4  ;;  %910 = vmatpush.bf16.msra.mxu1 %v811_v4  ;;  %v807_v23 = vld [vmem:[%s990_s28 + $0x78] sm:$0xff] }
  0x16   : > { %911 = vmatpush.bf16.msra.mxu2 %v811_v4  ;;  %912 = vmatpush.bf16.msra.mxu3 %v811_v4 }
  0x19   : > { %385 = vmatpush.bf16.msra.mxu0 %v810_v5  ;;  %913 = vmatpush.bf16.msra.mxu1 %v810_v5 }
  0x1a   : > { %914 = vmatpush.bf16.msra.mxu2 %v810_v5  ;;  %915 = vmatpush.bf16.msra.mxu3 %v810_v5 }
  0x1d   : > { %386 = vmatpush.bf16.msra.mxu0 %v809_v6  ;;  %916 = vmatpush.bf16.msra.mxu1 %v809_v6 }
  0x1e   : > { %917 = vmatpush.bf16.msra.mxu2 %v809_v6  ;;  %918 = vmatpush.bf16.msra.mxu3 %v809_v6 }
  0x21   : > { %387 = vmatpush.bf16.msra.mxu0 %v808_v7  ;;  %919 = vmatpush.bf16.msra.mxu1 %v808_v7 }
  0x22   : > { %920 = vmatpush.bf16.msra.mxu2 %v808_v7  ;;  %921 = vmatpush.bf16.msra.mxu3 %v808_v7 }
  0x24   : > { %774 = vmatmul.msk.bf16.vlgmr.msra.gmra.mxu0 %vm327_vm1, %v792_v8  ;;  %778 = vmatmul.msk.bf16.vlgmr.msra.gmra.mxu1 %vm327_vm1, %v796_v9 }
  0x25   : > { %782 = vmatmul.msk.bf16.vlgmr.msra.gmra.mxu2 %vm327_vm1, %v800_v10  ;;  %786 = vmatmul.msk.bf16.vlgmr.msra.gmra.mxu3 %vm327_vm1, %v804_v11 }
  0x34   : > { %775 = vmatmul.msk.bf16.gmra.mxu0 %vm327_vm1, %v793_v12  ;;  %779 = vmatmul.msk.bf16.gmra.mxu1 %vm327_vm1, %v797_v13 }
  0x35   : > { %783 = vmatmul.msk.bf16.gmra.mxu2 %vm327_vm1, %v801_v14  ;;  %787 = vmatmul.msk.bf16.gmra.mxu3 %vm327_vm1, %v805_v15 }
  0x44   : > { %776 = vmatmul.msk.bf16.gmra.mxu0 %vm327_vm1, %v794_v16  ;;  %780 = vmatmul.msk.bf16.gmra.mxu1 %vm327_vm1, %v798_v17 }
  0x45   : > { %784 = vmatmul.msk.bf16.gmra.mxu2 %vm327_vm1, %v802_v18  ;;  %788 = vmatmul.msk.bf16.gmra.mxu3 %vm327_vm1, %v806_v19 }
  0x54   : > { %777 = vmatmul.msk.bf16.gmra.mxu0 %vm327_vm1, %v795_v20  ;;  %781 = vmatmul.msk.bf16.gmra.mxu1 %vm327_vm1, %v799_v21 }
  0x55   : > { %785 = vmatmul.msk.bf16.gmra.mxu2 %vm327_vm1, %v803_v22  ;;  %789 = vmatmul.msk.bf16.gmra.mxu3 %vm327_vm1, %v807_v23 }
  0xa1   : > { %v389_v24 = vpop.f32.mrf.mxu0  ;;  %v409_v25 = vpop.f32.mrf.mxu1 }
  0xa2   : > { %v390_v27 = vadd.f32 %v1027_v26, %v389_v24  ;;  %v410_v28 = vadd.f32 %v1027_v26, %v409_v25 }
  0xa4   : > { %v501_v33 = vmul.f32 0.1, %v390_v27  ;;  %v509_v34 = vmul.f32 0.1, %v410_v28  ;;  %vm469_vm2 = vcmp.ge.f32.partialorder %v390_v27, 0.0  ;;  %vm477_vm3 = vcmp.ge.f32.partialorder %v410_v28, 0.0 }
  0xa6   : > { %v533_v41 = vsel %vm469_vm2, %v390_v27, %v501_v33  ;;  %v541_v42 = vsel %vm477_vm3, %v410_v28, %v509_v34 }
  0xa8   : > { %v429_v29 = vpop.f32.mrf.mxu2  ;;  %v449_v30 = vpop.f32.mrf.mxu3 }
  0xa9   : > { %v391_v31 = vpop.f32.mrf.mxu0  ;;  %v411_v32 = vpop.f32.mrf.mxu1  ;;  %v430_v39 = vadd.f32 %v1027_v26, %v429_v29  ;;  %v450_v40 = vadd.f32 %v1027_v26, %v449_v30 }
  0xaa   : > { %v392_v35 = vadd.f32 %v1027_v26, %v391_v31  ;;  %v412_v36 = vadd.f32 %v1027_v26, %v411_v32 }
  0xab   : > { %v517_v49 = vmul.f32 0.1, %v430_v39  ;;  %v525_v50 = vmul.f32 0.1, %v450_v40  ;;  %vm485_vm6 = vcmp.ge.f32.partialorder %v430_v39, 0.0  ;;  %vm493_vm7 = vcmp.ge.f32.partialorder %v450_v40, 0.0 }
  0xac   : > { %vm470_vm4 = vcmp.ge.f32.partialorder %v392_v35, 0.0  ;;  %v502_v37 = vmul.f32 0.1, %v392_v35  ;;  %vm478_vm5 = vcmp.ge.f32.partialorder %v412_v36, 0.0  ;;  %v510_v38 = vmul.f32 0.1, %v412_v36 }
  0xad   : > { %v549_v57 = vsel %vm485_vm6, %v430_v39, %v517_v49  ;;  %v557_v58 = vsel %vm493_vm7, %v450_v40, %v525_v50 }
  0xae   : > { %v534_v43 = vsel %vm470_vm4, %v392_v35, %v502_v37  ;;  %v542_v44 = vsel %vm478_vm5, %v412_v36, %v510_v38 }
  0xaf   : > { %v815_v45 = vpack.c.bf16 %v534_v43, %v533_v41  ;;  %v835_v46 = vpack.c.bf16 %v542_v44, %v541_v42 }
  0xb0   : > { %v431_v47 = vpop.f32.mrf.mxu2  ;;  %v451_v48 = vpop.f32.mrf.mxu3 }
  0xb1   : > { %816 = vst [vmem:[%s1040_s6] sm:$0xff] %v815_v45   ;;  %v432_v51 = vadd.f32 %v1027_v26, %v431_v47  ;;  %v452_v52 = vadd.f32 %v1027_v26, %v451_v48  ;;  %v394_v53 = vpop.f32.mrf.mxu0  ;;  %v414_v54 = vpop.f32.mrf.mxu1 }
  0xb2   : > { %895 = vst [vmem:[%s1040_s6 + $0x20] sm:$0xff] %v835_v46   ;;  %v395_v63 = vadd.f32 %v1027_v26, %v394_v53  ;;  %v415_v0 = vadd.f32 %v1027_v26, %v414_v54 }
  0xb3   : > { %vm486_vm8 = vcmp.ge.f32.partialorder %v432_v51, 0.0  ;;  %v518_v55 = vmul.f32 0.1, %v432_v51  ;;  %vm494_vm9 = vcmp.ge.f32.partialorder %v452_v52, 0.0  ;;  %v526_v56 = vmul.f32 0.1, %v452_v52 }
  0xb4   : > { %v503_v5 = vmul.f32 0.1, %v395_v63  ;;  %v511_v6 = vmul.f32 0.1, %v415_v0  ;;  %vm471_vm10 = vcmp.ge.f32.partialorder %v395_v63, 0.0  ;;  %vm479_vm11 = vcmp.ge.f32.partialorder %v415_v0, 0.0 }
  0xb5   : > { %v550_v59 = vsel %vm486_vm8, %v432_v51, %v518_v55  ;;  %v558_v60 = vsel %vm494_vm9, %v452_v52, %v526_v56 }
  0xb6   : > { %v855_v61 = vpack.c.bf16 %v550_v59, %v549_v57  ;;  %v875_v62 = vpack.c.bf16 %v558_v60, %v557_v58  ;;  %v535_v13 = vsel %vm471_vm10, %v395_v63, %v503_v5  ;;  %v543_v14 = vsel %vm479_vm11, %v415_v0, %v511_v6 }
  0xb8   : > { %899 = vst [vmem:[%s1040_s6 + $0x40] sm:$0xff] %v855_v61   ;;  %v434_v1 = vpop.f32.mrf.mxu2  ;;  %v454_v2 = vpop.f32.mrf.mxu3 }
  0xb9   : > { %903 = vst [vmem:[%s1040_s6 + $0x60] sm:$0xff] %v875_v62   ;;  %v396_v3 = vpop.f32.mrf.mxu0  ;;  %v416_v4 = vpop.f32.mrf.mxu1  ;;  %v435_v11 = vadd.f32 %v1027_v26, %v434_v1  ;;  %v455_v12 = vadd.f32 %v1027_v26, %v454_v2 }
  0xba   : > { %v397_v7 = vadd.f32 %v1027_v26, %v396_v3  ;;  %v417_v8 = vadd.f32 %v1027_v26, %v416_v4 }
  0xbb   : > { %v519_v21 = vmul.f32 0.1, %v435_v11  ;;  %v527_v22 = vmul.f32 0.1, %v455_v12  ;;  %vm487_vm14 = vcmp.ge.f32.partialorder %v435_v11, 0.0  ;;  %vm495_vm15 = vcmp.ge.f32.partialorder %v455_v12, 0.0 }
  0xbc   : > { %vm472_vm12 = vcmp.ge.f32.partialorder %v397_v7, 0.0  ;;  %v504_v9 = vmul.f32 0.1, %v397_v7  ;;  %vm480_vm13 = vcmp.ge.f32.partialorder %v417_v8, 0.0  ;;  %v512_v10 = vmul.f32 0.1, %v417_v8 }
  0xbd   : > { %v551_v30 = vsel %vm487_vm14, %v435_v11, %v519_v21  ;;  %v559_v31 = vsel %vm495_vm15, %v455_v12, %v527_v22 }
  0xbe   : > { %v536_v15 = vsel %vm472_vm12, %v397_v7, %v504_v9  ;;  %v544_v16 = vsel %vm480_vm13, %v417_v8, %v512_v10 }
  0xbf   : > { %v820_v17 = vpack.c.bf16 %v536_v15, %v535_v13  ;;  %v840_v18 = vpack.c.bf16 %v544_v16, %v543_v14 }
  0xc0   : > { %v436_v19 = vpop.f32.mrf.mxu2  ;;  %v456_v20 = vpop.f32.mrf.mxu3 }
  0xc1   : > { %892 = vst [vmem:[%s1040_s6 + $0x8] sm:$0xff] %v820_v17   ;;  %v437_v23 = vadd.f32 %v1027_v26, %v436_v19  ;;  %v457_v24 = vadd.f32 %v1027_v26, %v456_v20  ;;  %v399_v25 = vpop.f32.mrf.mxu0  ;;  %v419_v27 = vpop.f32.mrf.mxu1 }
  0xc2   : > { %896 = vst [vmem:[%s1040_s6 + $0x28] sm:$0xff] %v840_v18   ;;  %v400_v36 = vadd.f32 %v1027_v26, %v399_v25  ;;  %v420_v37 = vadd.f32 %v1027_v26, %v419_v27 }
  0xc3   : > { %vm488_vm0 = vcmp.ge.f32.partialorder %v437_v23, 0.0  ;;  %v520_v28 = vmul.f32 0.1, %v437_v23  ;;  %vm496_vm1 = vcmp.ge.f32.partialorder %v457_v24, 0.0  ;;  %v528_v29 = vmul.f32 0.1, %v457_v24 }
  0xc4   : > { %v505_v42 = vmul.f32 0.1, %v400_v36  ;;  %v513_v43 = vmul.f32 0.1, %v420_v37  ;;  %vm473_vm2 = vcmp.ge.f32.partialorder %v400_v36, 0.0  ;;  %vm481_vm3 = vcmp.ge.f32.partialorder %v420_v37, 0.0 }
  0xc5   : > { %v552_v32 = vsel %vm488_vm0, %v437_v23, %v520_v28  ;;  %v560_v33 = vsel %vm496_vm1, %v457_v24, %v528_v29 }
  0xc6   : > { %v860_v34 = vpack.c.bf16 %v552_v32, %v551_v30  ;;  %v880_v35 = vpack.c.bf16 %v560_v33, %v559_v31  ;;  %v537_v50 = vsel %vm473_vm2, %v400_v36, %v505_v42  ;;  %v545_v51 = vsel %vm481_vm3, %v420_v37, %v513_v43 }
  0xc8   : > { %900 = vst [vmem:[%s1040_s6 + $0x48] sm:$0xff] %v860_v34   ;;  %v439_v38 = vpop.f32.mrf.mxu2  ;;  %v459_v39 = vpop.f32.mrf.mxu3 }
  0xc9   : > { %904 = vst [vmem:[%s1040_s6 + $0x68] sm:$0xff] %v880_v35   ;;  %v401_v40 = vpop.f32.mrf.mxu0  ;;  %v421_v41 = vpop.f32.mrf.mxu1  ;;  %v440_v48 = vadd.f32 %v1027_v26, %v439_v38  ;;  %v460_v49 = vadd.f32 %v1027_v26, %v459_v39 }
  0xca   : > { %v402_v44 = vadd.f32 %v1027_v26, %v401_v40  ;;  %v422_v45 = vadd.f32 %v1027_v26, %v421_v41 }
  0xcb   : > { %v521_v58 = vmul.f32 0.1, %v440_v48  ;;  %v529_v59 = vmul.f32 0.1, %v460_v49  ;;  %vm489_vm6 = vcmp.ge.f32.partialorder %v440_v48, 0.0  ;;  %vm497_vm7 = vcmp.ge.f32.partialorder %v460_v49, 0.0 }
  0xcc   : > { %vm474_vm4 = vcmp.ge.f32.partialorder %v402_v44, 0.0  ;;  %v506_v46 = vmul.f32 0.1, %v402_v44  ;;  %vm482_vm5 = vcmp.ge.f32.partialorder %v422_v45, 0.0  ;;  %v514_v47 = vmul.f32 0.1, %v422_v45 }
  0xcd   : > { %v553_v2 = vsel %vm489_vm6, %v440_v48, %v521_v58  ;;  %v561_v3 = vsel %vm497_vm7, %v460_v49, %v529_v59 }
  0xce   : > { %v538_v52 = vsel %vm474_vm4, %v402_v44, %v506_v46  ;;  %v546_v53 = vsel %vm482_vm5, %v422_v45, %v514_v47 }
  0xcf   : > { %v825_v54 = vpack.c.bf16 %v538_v52, %v537_v50  ;;  %v845_v55 = vpack.c.bf16 %v546_v53, %v545_v51 }
  0xd0   : > { %v441_v56 = vpop.f32.mrf.mxu2  ;;  %v461_v57 = vpop.f32.mrf.mxu3 }
  0xd1   : > { %893 = vst [vmem:[%s1040_s6 + $0x10] sm:$0xff] %v825_v54   ;;  %v442_v60 = vadd.f32 %v1027_v26, %v441_v56  ;;  %v462_v61 = vadd.f32 %v1027_v26, %v461_v57  ;;  %v404_v62 = vpop.f32.mrf.mxu0  ;;  %v424_v63 = vpop.f32.mrf.mxu1 }
  0xd2   : > { %897 = vst [vmem:[%s1040_s6 + $0x30] sm:$0xff] %v845_v55   ;;  %v405_v8 = vadd.f32 %v1027_v26, %v404_v62  ;;  %v425_v9 = vadd.f32 %v1027_v26, %v424_v63 }
  0xd3   : > { %vm490_vm8 = vcmp.ge.f32.partialorder %v442_v60, 0.0  ;;  %v522_v0 = vmul.f32 0.1, %v442_v60  ;;  %vm498_vm9 = vcmp.ge.f32.partialorder %v462_v61, 0.0  ;;  %v530_v1 = vmul.f32 0.1, %v462_v61 }
  0xd4   : > { %v507_v14 = vmul.f32 0.1, %v405_v8  ;;  %v515_v15 = vmul.f32 0.1, %v425_v9  ;;  %vm475_vm10 = vcmp.ge.f32.partialorder %v405_v8, 0.0  ;;  %vm483_vm11 = vcmp.ge.f32.partialorder %v425_v9, 0.0 }
  0xd5   : > { %v554_v4 = vsel %vm490_vm8, %v442_v60, %v522_v0  ;;  %v562_v5 = vsel %vm498_vm9, %v462_v61, %v530_v1 }
  0xd6   : > { %v865_v6 = vpack.c.bf16 %v554_v4, %v553_v2  ;;  %v885_v7 = vpack.c.bf16 %v562_v5, %v561_v3  ;;  %v539_v22 = vsel %vm475_vm10, %v405_v8, %v507_v14  ;;  %v547_v23 = vsel %vm483_vm11, %v425_v9, %v515_v15 }
  0xd8   : > { %901 = vst [vmem:[%s1040_s6 + $0x50] sm:$0xff] %v865_v6   ;;  %v444_v10 = vpop.f32.mrf.mxu2  ;;  %v464_v11 = vpop.f32.mrf.mxu3 }
  0xd9   : > { %905 = vst [vmem:[%s1040_s6 + $0x70] sm:$0xff] %v885_v7   ;;  %v406_v12 = vpop.f32.mrf.mxu0  ;;  %v426_v13 = vpop.f32.mrf.mxu1  ;;  %v445_v20 = vadd.f32 %v1027_v26, %v444_v10  ;;  %v465_v21 = vadd.f32 %v1027_v26, %v464_v11 }
  0xda   : > { %v407_v16 = vadd.f32 %v1027_v26, %v406_v12  ;;  %v427_v17 = vadd.f32 %v1027_v26, %v426_v13 }
  0xdb   : > { %v523_v31 = vmul.f32 0.1, %v445_v20  ;;  %v531_v32 = vmul.f32 0.1, %v465_v21  ;;  %vm491_vm14 = vcmp.ge.f32.partialorder %v445_v20, 0.0  ;;  %vm499_vm15 = vcmp.ge.f32.partialorder %v465_v21, 0.0 }
  0xdc   : > { %vm476_vm12 = vcmp.ge.f32.partialorder %v407_v16, 0.0  ;;  %v508_v18 = vmul.f32 0.1, %v407_v16  ;;  %vm484_vm13 = vcmp.ge.f32.partialorder %v427_v17, 0.0  ;;  %v516_v19 = vmul.f32 0.1, %v427_v17 }
  0xdd   : > { %v555_v37 = vsel %vm491_vm14, %v445_v20, %v523_v31  ;;  %v563_v38 = vsel %vm499_vm15, %v465_v21, %v531_v32 }
  0xde   : > { %v540_v24 = vsel %vm476_vm12, %v407_v16, %v508_v18  ;;  %v548_v25 = vsel %vm484_vm13, %v427_v17, %v516_v19 }
  0xdf   : > { %v830_v27 = vpack.c.bf16 %v540_v24, %v539_v22  ;;  %v850_v28 = vpack.c.bf16 %v548_v25, %v547_v23 }
  0xe0   : > { %v446_v29 = vpop.f32.mrf.mxu2  ;;  %v466_v30 = vpop.f32.mrf.mxu3 }
  0xe1   : > { %894 = vst [vmem:[%s1040_s6 + $0x18] sm:$0xff] %v830_v27   ;;  %v447_v33 = vadd.f32 %v1027_v26, %v446_v29  ;;  %v467_v34 = vadd.f32 %v1027_v26, %v466_v30 }
  0xe2   : > { %898 = vst [vmem:[%s1040_s6 + $0x38] sm:$0xff] %v850_v28  }
  0xe3   : > { %vm492_vm0 = vcmp.ge.f32.partialorder %v447_v33, 0.0  ;;  %v524_v35 = vmul.f32 0.1, %v447_v33  ;;  %vm500_vm1 = vcmp.ge.f32.partialorder %v467_v34, 0.0  ;;  %v532_v36 = vmul.f32 0.1, %v467_v34 }
  0xe5   : > { %v556_v39 = vsel %vm492_vm0, %v447_v33, %v524_v35  ;;  %v564_v40 = vsel %vm500_vm1, %v467_v34, %v532_v36 }
  0xe6   : > { %v870_v41 = vpack.c.bf16 %v556_v39, %v555_v37  ;;  %v890_v42 = vpack.c.bf16 %v564_v40, %v563_v38 }
  0xe8   : > { %902 = vst [vmem:[%s1040_s6 + $0x58] sm:$0xff] %v870_v41  }
  0xe9   : > { %906 = vst [vmem:[%s1040_s6 + $0x78] sm:$0xff] %v890_v42  }
  0xea PF: > { %s13_s12 = sadd.s32 1, %s937_s12  }
  0xeb   : > { %p10_p4 = scmp.ge.s32.totalorder %s13_s12, 4  }
  0xed   :  { %12 = sbr.rel (!%p10_p4) target bundleno = 1 (0x1), region = 62 }

// kernel: pallas_forward.13
= control target key start
LH: loop header
LB: loop body
LE: loop exit
PB: predicated region body
PF: predicated region fallthrough
CT: control target
= control target key end

     0   :  { %s1533_s21 = smov 0   ;;  %s1928_s0 = inlined_call_operand.vmem [shape: bf16[512,216], index: 0, kind: input, shape index: {}]   ;;  %s1929_s1 = inlined_call_operand.vmem [shape: bf16[216,128], index: 1, kind: input, shape index: {}]   ;;  %s1930_s2 = inlined_call_operand.vmem [shape: f32[1,128], index: 2, kind: input, shape index: {}]   ;;  %s1931_s3 = inlined_call_operand.vmem [shape: f32[128,3], index: 3, kind: input, shape index: {}]   ;;  %s1932_s4 = inlined_call_operand.vmem [shape: f32[1,3], index: 4, kind: input, shape index: {}]   ;;  %s1933_s5 = inlined_call_operand.vmem [shape: f32[512,3], index: 5, kind: input, shape index: {}]   ;;  %s1934_s6 = inlined_call_operand.vmem [shape: f32[512,3], index: 6, kind: output, shape index: {}]  }
   0x1 LB: > { %s1194_s22 = sadd.s32 4294967295, %s1496_s21   ;;  %p1198_p0 = scmp.ge.s32.totalorder %s1496_s21, 1  ;;  %s1496_s21 = sphi %s1533_s21, %s16_s21  }
   0x2   : > { %p225_p1 = scmp.lt.s32.totalorder %s1496_s21, 3 }
   0x4   : > { %p226_p2 = pnand %p1198_p0, %p225_p1 }
   0x5   : > { %s1199_s29 = sshll.u32 (!%p226_p2), %s1194_s22, 5 }
   0x6   : > { %229 = sbr.rel (%p226_p2) target bundleno = 556 (0x22c), region = 44  ;;  %p262_p3 = scmp.lt.s32.totalorder (!%p226_p2), %s1199_s29, 63 }
   0xb   : > { %v1444_v0 = vld [vmem:[%s1929_s1 + $0x38] sm:$0xff]  ;;  %v339_v1 = vld [vmem:[%s1929_s1 + $0x68] sm:$0xf]  ;;  %vm618_vm0 = vcmask 1043456   ;;  %v1443_v3 = vld [vmem:[%s1929_s1 + $0x30] sm:$0xff]  ;;  %s1936_s29 = smov (!%p262_p3, %s1199_s29), 63 }
   0xc   : > { %v541_v2 = vunpack.c.l.b16 %v339_v1  ;;  %622 = vmatpush.bf16.msra.mxu0 %v1444_v0  ;;  %1450 = vmatpush.bf16.msra.mxu3 %v1444_v0  ;;  %v1449_v6 = vld [vmem:[%s1929_s1 + $0x60] sm:$0xff]  ;;  %v1442_v7 = vld [vmem:[%s1929_s1 + $0x28] sm:$0xff]  ;;  %v1448_v8 = vld [vmem:[%s1929_s1 + $0x58] sm:$0xff]  ;;  %s1568_s18 = sshll.u32 %s1936_s29, 3  ;;  %vm569_vm1 = vcmask 719872  }
   0xd   : > { %v1441_v9 = vld [vmem:[%s1929_s1 + $0x20] sm:$0xff]  ;;  %v1447_v10 = vld [vmem:[%s1929_s1 + $0x50] sm:$0xff]  ;;  %v1440_v11 = vld [vmem:[%s1929_s1 + $0x18] sm:$0xff]  ;;  %s1580_s26 = scalar_lea.vmem %s1928_s0, %s1568_s18  ;;  %s1751_s25 = scalar_lea.vmem %s1933_s5, %s1568_s18 }
   0xe   : > { %v555_v4 = vpack.c.b16 %v541_v2, %v541_v2  ;;  %v1446_v12 = vld [vmem:[%s1929_s1 + $0x48] sm:$0xff]  ;;  %v1439_v13 = vld [vmem:[%s1929_s1 + $0x10] sm:$0xff]  ;;  %v1445_v14 = vld [vmem:[%s1929_s1 + $0x40] sm:$0xff]  ;;  %s1767_s7 = scalar_lea.vmem %s1934_s6, %s1568_s18 }
   0xf   : > { %v1438_v15 = vld [vmem:[%s1929_s1 + $0x8] sm:$0xff]  ;;  %v1405_v16 = vld [vmem:[%s1580_s26 + $0x4] sm:$0xf]  ;;  %v1208_v20 = vld [vmem:[%s1580_s26] sm:$0xf] }
  0x10   : > { %v620_v5 = vsel %vm618_vm0, %v555_v4, 0  ;;  %623 = vmatpush.bf16.msra.mxu0 %v1443_v3  ;;  %1451 = vmatpush.bf16.msra.mxu3 %v1443_v3  ;;  %v1210_v17 = vld [vmem:[%s1580_s26 + $0x8] sm:$0xf0]  ;;  %v1437_v19 = vld [vmem:[%s1929_s1] sm:$0xff]  ;;  %v1406_v21 = vld [vmem:[%s1580_s26 + $0x4] sm:$0xf0] }
  0x11   : > { %713 = vmatpush.bf16.msra.mxu1 %v620_v5  ;;  %v1213_v18 = vor.u32 %v1405_v16, %v1210_v17  ;;  %v1209_v22 = vor.u32 %v1406_v21, %v1208_v20  ;;  %v1407_v23 = vld [vmem:[%s1580_s26 + $0x14] sm:$0xf]  ;;  %v1218_v24 = vld [vmem:[%s1580_s26 + $0x18] sm:$0xf0]  ;;  %v1216_v26 = vld [vmem:[%s1580_s26 + $0x10] sm:$0xf] }
  0x12   : > { %v1221_v25 = vor.u32 %v1407_v23, %v1218_v24  ;;  %v1408_v27 = vld [vmem:[%s1580_s26 + $0x14] sm:$0xf0]  ;;  %v1409_v29 = vld [vmem:[%s1580_s26 + $0x24] sm:$0xf]  ;;  %v1226_v30 = vld [vmem:[%s1580_s26 + $0x28] sm:$0xf0] }
  0x13   : > { %v1217_v28 = vor.u32 %v1408_v27, %v1216_v26  ;;  %v1229_v31 = vor.u32 %v1409_v29, %v1226_v30  ;;  %v1224_v32 = vld [vmem:[%s1580_s26 + $0x20] sm:$0xf]  ;;  %v1410_v33 = vld [vmem:[%s1580_s26 + $0x24] sm:$0xf0]  ;;  %v1411_v35 = vld [vmem:[%s1580_s26 + $0x34] sm:$0xf] }
  0x14   : > { %624 = vmatpush.bf16.msra.mxu0 %v1442_v7  ;;  %1452 = vmatpush.bf16.msra.mxu3 %v1442_v7  ;;  %v1225_v34 = vor.u32 %v1410_v33, %v1224_v32  ;;  %v1234_v36 = vld [vmem:[%s1580_s26 + $0x38] sm:$0xf0]  ;;  %v1232_v38 = vld [vmem:[%s1580_s26 + $0x30] sm:$0xf]  ;;  %v1412_v39 = vld [vmem:[%s1580_s26 + $0x34] sm:$0xf0] }
  0x15   : > { %714 = vmatpush.bf16.msra.mxu1 %v1449_v6  ;;  %v1237_v37 = vor.u32 %v1411_v35, %v1234_v36  ;;  %v1304_v40 = vld [vmem:[%s1580_s26 + $0xc0] sm:$0xf]  ;;  %v1430_v41 = vld [vmem:[%s1580_s26 + $0xc4] sm:$0xf0]  ;;  %v1233_v42 = vor.u32 %v1412_v39, %v1232_v38  ;;  %v1413_v44 = vld [vmem:[%s1580_s26 + $0x44] sm:$0xf] }
  0x16   : > { %v1305_v43 = vor.u32 %v1430_v41, %v1304_v40  ;;  %v1242_v45 = vld [vmem:[%s1580_s26 + $0x48] sm:$0xf0]  ;;  %v1240_v47 = vld [vmem:[%s1580_s26 + $0x40] sm:$0xf]  ;;  %v1414_v48 = vld [vmem:[%s1580_s26 + $0x44] sm:$0xf0] }
  0x17   : > { %v1245_v46 = vor.u32 %v1413_v44, %v1242_v45  ;;  %v1312_v49 = vld [vmem:[%s1580_s26 + $0xd0] sm:$0xf]  ;;  %v1432_v50 = vld [vmem:[%s1580_s26 + $0xd4] sm:$0xf0]  ;;  %v1241_v51 = vor.u32 %v1414_v48, %v1240_v47  ;;  %v909_v55 = vld [vmem:[%s1931_s3 + $0x68] sm:$0xff] }
  0x18   : > { %625 = vmatpush.bf16.msra.mxu0 %v1441_v9  ;;  %1453 = vmatpush.bf16.msra.mxu3 %v1441_v9  ;;  %v1313_v52 = vor.u32 %v1432_v50, %v1312_v49  ;;  %v911_v53 = vld [vmem:[%s1931_s3 + $0x78] sm:$0xff]  ;;  %v910_v54 = vld [vmem:[%s1931_s3 + $0x70] sm:$0xff]  ;;  %v908_v61 = vld [vmem:[%s1931_s3 + $0x60] sm:$0xff] }
  0x19   : > { %715 = vmatpush.bf16.msra.mxu1 %v1448_v8  ;;  %916 = vmatpush.msra.mxu2 %v911_v53  ;;  %v1415_v56 = vld [vmem:[%s1580_s26 + $0x54] sm:$0xf]  ;;  %v1250_v57 = vld [vmem:[%s1580_s26 + $0x58] sm:$0xf0]  ;;  %v1248_v59 = vld [vmem:[%s1580_s26 + $0x50] sm:$0xf] }
  0x1a   : > { %v1253_v58 = vor.u32 %v1415_v56, %v1250_v57  ;;  %v1416_v60 = vld [vmem:[%s1580_s26 + $0x54] sm:$0xf0]  ;;  %v1320_v62 = vld [vmem:[%s1580_s26 + $0xe0] sm:$0xf]  ;;  %v1434_v63 = vld [vmem:[%s1580_s26 + $0xe4] sm:$0xf0] }
  0x1b   : > { %917 = vmatpush.msra.mxu2 %v910_v54  ;;  %v1249_v0 = vor.u32 %v1416_v60, %v1248_v59  ;;  %v1321_v1 = vor.u32 %v1434_v63, %v1320_v62  ;;  %v907_v2 = vld [vmem:[%s1931_s3 + $0x58] sm:$0xff]  ;;  %v906_v3 = vld [vmem:[%s1931_s3 + $0x50] sm:$0xff]  ;;  %v905_v4 = vld [vmem:[%s1931_s3 + $0x48] sm:$0xff] }
  0x1c   : > { %626 = vmatpush.bf16.msra.mxu0 %v1440_v11  ;;  %1454 = vmatpush.bf16.msra.mxu3 %v1440_v11  ;;  %v1417_v7 = vld [vmem:[%s1580_s26 + $0x64] sm:$0xf]  ;;  %v902_v9 = vld [vmem:[%s1931_s3 + $0x30] sm:$0xff]  ;;  %v1256_v11 = vld [vmem:[%s1580_s26 + $0x60] sm:$0xf] }
  0x1d   : > { %716 = vmatpush.bf16.msra.mxu1 %v1447_v10  ;;  %918 = vmatpush.msra.mxu2 %v909_v55  ;;  %v1436_v16 = vld [vmem:[%s1580_s26 + $0xf4] sm:$0xf0]  ;;  %v898_v20 = vld [vmem:[%s1931_s3 + $0x10] sm:$0xff]  ;;  %v897_v21 = vld [vmem:[%s1931_s3 + $0x8] sm:$0xff] }
  0x1e   : > { %v1419_v23 = vld [vmem:[%s1580_s26 + $0x74] sm:$0xf]  ;;  %v1266_v24 = vld [vmem:[%s1580_s26 + $0x78] sm:$0xf0]  ;;  %v1264_v26 = vld [vmem:[%s1580_s26 + $0x70] sm:$0xf] }
  0x1f   : > { %919 = vmatpush.msra.mxu2 %v908_v61  ;;  %v1420_v27 = vld [vmem:[%s1580_s26 + $0x74] sm:$0xf0]  ;;  %v1314_v29 = vld [vmem:[%s1580_s26 + $0xd8] sm:$0xf0]  ;;  %v1421_v32 = vld [vmem:[%s1580_s26 + $0x84] sm:$0xf] }
  0x20   : > { %627 = vmatpush.bf16.msra.mxu0 %v1439_v13  ;;  %1455 = vmatpush.bf16.msra.mxu3 %v1439_v13  ;;  %v901_v13 = vld [vmem:[%s1931_s3 + $0x28] sm:$0xff]  ;;  %v1265_v30 = vor.u32 %v1420_v27, %v1264_v26  ;;  %v1272_v36 = vld [vmem:[%s1580_s26 + $0x80] sm:$0xf]  ;;  %v1433_v39 = vld [vmem:[%s1580_s26 + $0xe4] sm:$0xf] }
  0x21   : > { %717 = vmatpush.bf16.msra.mxu1 %v1446_v12  ;;  %920 = vmatpush.msra.mxu2 %v907_v2  ;;  %v1274_v33 = vld [vmem:[%s1580_s26 + $0x88] sm:$0xf0]  ;;  %v1697_v38 = vld [vmem:[%s1930_s2] ss:$0 sm:$0xff]  ;;  %v1423_v50 = vld [vmem:[%s1580_s26 + $0x94] sm:$0xf] }
  0x22   : > { %v1322_v40 = vld [vmem:[%s1580_s26 + $0xe8] sm:$0xf0]  ;;  %v1280_v56 = vld [vmem:[%s1580_s26 + $0x90] sm:$0xf]  ;;  %v1424_v57 = vld [vmem:[%s1580_s26 + $0x94] sm:$0xf0] }
  0x23   : > { %921 = vmatpush.msra.mxu2 %v906_v3  ;;  %v1435_v59 = vld [vmem:[%s1580_s26 + $0xf4] sm:$0xf]  ;;  %v1330_v60 = vld [vmem:[%s1580_s26 + $0xf8] sm:$0xf0]  ;;  %v1281_v62 = vor.u32 %v1424_v57, %v1280_v56 }
  0x24   : > { %628 = vmatpush.bf16.msra.mxu0 %v1438_v15  ;;  %1456 = vmatpush.bf16.msra.mxu3 %v1438_v15  ;;  %v1328_v15 = vld [vmem:[%s1580_s26 + $0xf0] sm:$0xf]  ;;  %v1333_v63 = vor.u32 %v1435_v59, %v1330_v60  ;;  %v1298_v26 = vld [vmem:[%s1580_s26 + $0xb8] sm:$0xf0] }
  0x25   : > { %718 = vmatpush.bf16.msra.mxu1 %v1445_v14  ;;  %922 = vmatpush.msra.mxu2 %v905_v4 }
  0x28   : > { %1386 = vmatmul.msk.bf16.vlgmr.msra.gmra.mxu1 %vm569_vm1, %v1213_v18  ;;  %629 = vmatpush.bf16.msra.mxu0 %v1437_v19  ;;  %v1329_v18 = vor.u32 %v1436_v16, %v1328_v15 }
  0x29   : > { %1457 = vmatpush.bf16.msra.mxu3 %v1437_v19  ;;  %v899_v19 = vld [vmem:[%s1931_s3 + $0x18] sm:$0xff] }
  0x2b   : > { %630 = vmatmul.bf16.vlgmr.msra.gmra.mxu0 %v1209_v22  ;;  %v896_v22 = vld [vmem:[%s1931_s3] sm:$0xff] }
  0x2c   : > { %690 = vmatmul.bf16.vlgmr.msra.gmra.mxu3 %v1305_v43 }
  0x2d   : > { %1458 = vmatpush.bf16.msrb.mxu3 %v620_v5  ;;  %v904_v5 = vld [vmem:[%s1931_s3 + $0x40] sm:$0xff] }
  0x2e   : > { %923 = vmatpush.msra.mxu2 %v904_v5 }
  0x31   : > { %1459 = vmatpush.bf16.msrb.mxu3 %v1449_v6  ;;  %v903_v6 = vld [vmem:[%s1931_s3 + $0x38] sm:$0xff] }
  0x32   : > { %924 = vmatpush.msra.mxu2 %v903_v6 }
  0x34   : > { %925 = vmatpush.msra.mxu2 %v902_v9 }
  0x35   : > { %1460 = vmatpush.bf16.msrb.mxu3 %v1448_v8  ;;  %v1258_v8 = vld [vmem:[%s1580_s26 + $0x68] sm:$0xf0] }
  0x36   : > { %926 = vmatpush.msra.mxu2 %v901_v13 }
  0x38   : > { %1387 = vmatmul.msk.bf16.gmra.mxu1 %vm569_vm1, %v1221_v25  ;;  %v1269_v25 = vor.u32 %v1419_v23, %v1266_v24 }
  0x39   : > { %1461 = vmatpush.bf16.msrb.mxu3 %v1447_v10  ;;  %v1261_v10 = vor.u32 %v1417_v7, %v1258_v8  ;;  %v1425_v7 = vld [vmem:[%s1580_s26 + $0xa4] sm:$0xf]  ;;  %v1290_v8 = vld [vmem:[%s1580_s26 + $0xa8] sm:$0xf0] }
  0x3b   : > { %635 = vmatmul.bf16.gmra.mxu0 %v1217_v28  ;;  %v1431_v28 = vld [vmem:[%s1580_s26 + $0xd4] sm:$0xf] }
  0x3c   : > { %695 = vmatmul.bf16.gmra.mxu3 %v1313_v52 }
  0x3d   : > { %1462 = vmatpush.bf16.msrb.mxu3 %v1446_v12  ;;  %v1418_v12 = vld [vmem:[%s1580_s26 + $0x64] sm:$0xf0] }
  0x3e   : > { %v1257_v17 = vor.u32 %v1418_v12, %v1256_v11  ;;  %v1293_v11 = vor.u32 %v1425_v7, %v1290_v8 }
  0x41   : > { %1463 = vmatpush.bf16.msrb.mxu3 %v1445_v14  ;;  %v900_v14 = vld [vmem:[%s1931_s3 + $0x20] sm:$0xff] }
  0x42   : > { %927 = vmatpush.msra.mxu2 %v900_v14 }
  0x44   : > { %928 = vmatpush.msra.mxu2 %v899_v19 }
  0x45   : > { %1464 = vmatpush.msra.mxu3 %v911_v53 }
  0x46   : > { %929 = vmatpush.msra.mxu2 %v898_v20 }
  0x47   : > { %1465 = vmatpush.msra.mxu3 %v910_v54 }
  0x48   : > { %1388 = vmatmul.msk.bf16.gmra.mxu1 %vm569_vm1, %v1229_v31  ;;  %930 = vmatpush.msra.mxu2 %v897_v21  ;;  %v1317_v31 = vor.u32 %v1431_v28, %v1314_v29 }
  0x49   : > { %1466 = vmatpush.msra.mxu3 %v909_v55 }
  0x4a   : > { %931 = vmatpush.msra.mxu2 %v896_v22 }
  0x4b   : > { %640 = vmatmul.bf16.gmra.mxu0 %v1225_v34  ;;  %1467 = vmatpush.msra.mxu3 %v908_v61  ;;  %v1277_v34 = vor.u32 %v1421_v32, %v1274_v33  ;;  %v1428_v32 = vld [vmem:[%s1580_s26 + $0xb4] sm:$0xf0] }
  0x4c   : > { %700 = vmatmul.bf16.gmra.mxu3 %v1321_v1 }
  0x4d   : > { %1468 = vmatpush.msra.mxu3 %v907_v2 }
  0x4f   : > { %1469 = vmatpush.msra.mxu3 %v906_v3 }
  0x51   : > { %1470 = vmatpush.msra.mxu3 %v905_v4 }
  0x53   : > { %1471 = vmatpush.msra.mxu3 %v904_v5 }
  0x55   : > { %1472 = vmatpush.msra.mxu3 %v903_v6 }
  0x57   : > { %1473 = vmatpush.msra.mxu3 %v902_v9 }
  0x58   : > { %1389 = vmatmul.msk.bf16.gmra.mxu1 %vm569_vm1, %v1237_v37  ;;  %v1422_v37 = vld [vmem:[%s1580_s26 + $0x84] sm:$0xf0] }
  0x59   : > { %1474 = vmatpush.msra.mxu3 %v901_v13  ;;  %v1273_v41 = vor.u32 %v1422_v37, %v1272_v36  ;;  %v1288_v13 = vld [vmem:[%s1580_s26 + $0xa0] sm:$0xf] }
  0x5b   : > { %645 = vmatmul.bf16.gmra.mxu0 %v1233_v42  ;;  %1475 = vmatpush.msra.mxu3 %v900_v14  ;;  %v1325_v42 = vor.u32 %v1433_v39, %v1322_v40  ;;  %v1426_v14 = vld [vmem:[%s1580_s26 + $0xa4] sm:$0xf0] }
  0x5c   : > { %705 = vmatmul.bf16.gmra.mxu3 %v1329_v18 }
  0x5d   : > { %1476 = vmatpush.msra.mxu3 %v899_v19 }
  0x5f   : > { %1477 = vmatpush.msra.mxu3 %v898_v20 }
  0x61   : > { %1478 = vmatpush.msra.mxu3 %v897_v21 }
  0x63   : > { %1479 = vmatpush.msra.mxu3 %v896_v22 }
  0x68   : > { %1390 = vmatmul.msk.bf16.gmra.mxu1 %vm569_vm1, %v1245_v46 }
  0x6b   : > { %650 = vmatmul.bf16.gmra.mxu0 %v1241_v51  ;;  %v1282_v51 = vld [vmem:[%s1580_s26 + $0x98] sm:$0xf0] }
  0x6c   : > { %1399 = vmatmul.msk.bf16.vlgmr.msrb.gmra.mxu3 %vm569_vm1, %v1317_v31  ;;  %v1285_v54 = vor.u32 %v1423_v50, %v1282_v51  ;;  %v1296_v31 = vld [vmem:[%s1580_s26 + $0xb0] sm:$0xf] }
  0x78   : > { %1391 = vmatmul.msk.bf16.gmra.mxu1 %vm569_vm1, %v1253_v58 }
  0x7b   : > { %655 = vmatmul.bf16.gmra.mxu0 %v1249_v0 }
  0x7c   : > { %1400 = vmatmul.msk.bf16.gmra.mxu3 %vm569_vm1, %v1325_v42 }
  0x88   : > { %1392 = vmatmul.msk.bf16.gmra.mxu1 %vm569_vm1, %v1261_v10 }
  0x8b   : > { %660 = vmatmul.bf16.gmra.mxu0 %v1257_v17  ;;  %v1289_v17 = vor.u32 %v1426_v14, %v1288_v13 }
  0x8c   : > { %1401 = vmatmul.msk.bf16.gmra.mxu3 %vm569_vm1, %v1333_v63 }
  0x98   : > { %1393 = vmatmul.msk.bf16.gmra.mxu1 %vm569_vm1, %v1269_v25  ;;  %v1427_v25 = vld [vmem:[%s1580_s26 + $0xb4] sm:$0xf] }
  0x99   : > { %v1301_v29 = vor.u32 %v1427_v25, %v1298_v26 }
  0x9b   : > { %665 = vmatmul.bf16.gmra.mxu0 %v1265_v30 }
  0xa5   : > { %v720_v35 = vpop.f32.mrf.mxu1 }
  0xa8   : > { %1394 = vmatmul.msk.bf16.gmra.mxu1 %vm569_vm1, %v1277_v34  ;;  %v631_v43 = vpop.f32.mrf.mxu0 }
  0xa9   : > { %v632_v44 = vadd.f32 %v1697_v38, %v631_v43 }
  0xab   : > { %v721_v45 = vadd.f32 %v720_v35, %v632_v44  ;;  %670 = vmatmul.bf16.gmra.mxu0 %v1273_v41  ;;  %v1297_v35 = vor.u32 %v1428_v32, %v1296_v31  ;;  %v1429_v44 = vld [vmem:[%s1580_s26 + $0xc4] sm:$0xf] }
  0xad   : > { %v722_v46 = vpop.f32.mrf.mxu1  ;;  %vm800_vm2 = vcmp.ge.f32.partialorder %v721_v45, 0.0  ;;  %v832_v47 = vmul.f32 0.1, %v721_v45 }
  0xaf   : > { %v864_v48 = vsel %vm800_vm2, %v721_v45, %v832_v47  ;;  %v1306_v45 = vld [vmem:[%s1580_s26 + $0xc8] sm:$0xf0] }
  0xb0   : > { %v633_v49 = vpop.f32.mrf.mxu0  ;;  %932 = vmatmul.f32.vlgmr.msra.gmra.mxu2 %v864_v48  ;;  %v1309_v48 = vor.u32 %v1429_v44, %v1306_v45 }
  0xb1   : > { %v634_v52 = vadd.f32 %v1697_v38, %v633_v49 }
  0xb3   : > { %v723_v53 = vadd.f32 %v722_v46, %v634_v52 }
  0xb5   : > { %v725_v55 = vpop.f32.mrf.mxu1  ;;  %vm801_vm3 = vcmp.ge.f32.partialorder %v723_v53, 0.0  ;;  %v833_v58 = vmul.f32 0.1, %v723_v53 }
  0xb7   : > { %v865_v61 = vsel %vm801_vm3, %v723_v53, %v833_v58  ;;  %vm1093_vm3 = vcmask 23552  }
  0xb8   : > { %1395 = vmatmul.msk.bf16.gmra.mxu1 %vm569_vm1, %v1285_v54  ;;  %v636_v0 = vpop.f32.mrf.mxu0  ;;  %935 = vmatmul.f32.gmra.mxu2 %v865_v61 }
  0xb9   : > { %v637_v1 = vadd.f32 %v1697_v38, %v636_v0 }
  0xbb   : > { %v726_v2 = vadd.f32 %v725_v55, %v637_v1  ;;  %675 = vmatmul.bf16.gmra.mxu0 %v1281_v62 }
  0xbd   : > { %v727_v3 = vpop.f32.mrf.mxu1  ;;  %vm802_vm4 = vcmp.ge.f32.partialorder %v726_v2, 0.0  ;;  %v834_v4 = vmul.f32 0.1, %v726_v2 }
  0xbf   : > { %v866_v5 = vsel %vm802_vm4, %v726_v2, %v834_v4 }
  0xc0   : > { %v638_v6 = vpop.f32.mrf.mxu0  ;;  %938 = vmatmul.f32.gmra.mxu2 %v866_v5 }
  0xc1   : > { %v639_v9 = vadd.f32 %v1697_v38, %v638_v6 }
  0xc3   : > { %v728_v10 = vadd.f32 %v727_v3, %v639_v9 }
  0xc5   : > { %v730_v12 = vpop.f32.mrf.mxu1  ;;  %vm803_vm5 = vcmp.ge.f32.partialorder %v728_v10, 0.0  ;;  %v835_v15 = vmul.f32 0.1, %v728_v10 }
  0xc7   : > { %v867_v16 = vsel %vm803_vm5, %v728_v10, %v835_v15 }
  0xc8   : > { %1396 = vmatmul.msk.bf16.gmra.mxu1 %vm569_vm1, %v1293_v11  ;;  %v641_v18 = vpop.f32.mrf.mxu0  ;;  %941 = vmatmul.f32.gmra.mxu2 %v867_v16 }
  0xc9   : > { %v642_v19 = vadd.f32 %v1697_v38, %v641_v18 }
  0xcb   : > { %v731_v20 = vadd.f32 %v730_v12, %v642_v19  ;;  %680 = vmatmul.bf16.gmra.mxu0 %v1289_v17 }
  0xcd   : > { %v732_v21 = vpop.f32.mrf.mxu1  ;;  %vm804_vm6 = vcmp.ge.f32.partialorder %v731_v20, 0.0  ;;  %v836_v22 = vmul.f32 0.1, %v731_v20 }
  0xcf   : > { %v868_v23 = vsel %vm804_vm6, %v731_v20, %v836_v22 }
  0xd0   : > { %v643_v24 = vpop.f32.mrf.mxu0  ;;  %944 = vmatmul.f32.gmra.mxu2 %v868_v23 }
  0xd1   : > { %v644_v27 = vadd.f32 %v1697_v38, %v643_v24 }
  0xd3   : > { %v733_v28 = vadd.f32 %v732_v21, %v644_v27  ;;  %v1738_v21 = vpop.f32.mrf.mxu3 }
  0xd5   : > { %v735_v30 = vpop.f32.mrf.mxu1  ;;  %vm805_vm7 = vcmp.ge.f32.partialorder %v733_v28, 0.0  ;;  %v837_v33 = vmul.f32 0.1, %v733_v28 }
  0xd7   : > { %v869_v34 = vsel %vm805_vm7, %v733_v28, %v837_v33 }
  0xd8   : > { %1397 = vmatmul.msk.bf16.gmra.mxu1 %vm569_vm1, %v1301_v29  ;;  %v646_v36 = vpop.f32.mrf.mxu0  ;;  %947 = vmatmul.f32.gmra.mxu2 %v869_v34 }
  0xd9   : > { %v647_v37 = vadd.f32 %v1697_v38, %v646_v36 }
  0xdb   : > { %v736_v39 = vadd.f32 %v735_v30, %v647_v37  ;;  %685 = vmatmul.bf16.gmra.mxu0 %v1297_v35  ;;  %v1741_v30 = vpop.f32.mrf.mxu3 }
  0xdd   : > { %v737_v40 = vpop.f32.mrf.mxu1  ;;  %vm806_vm8 = vcmp.ge.f32.partialorder %v736_v39, 0.0  ;;  %v838_v41 = vmul.f32 0.1, %v736_v39 }
  0xdf   : > { %v870_v42 = vsel %vm806_vm8, %v736_v39, %v838_v41 }
  0xe0   : > { %v648_v43 = vpop.f32.mrf.mxu0  ;;  %950 = vmatmul.f32.gmra.mxu2 %v870_v42 }
  0xe1   : > { %v649_v46 = vadd.f32 %v1697_v38, %v648_v43 }
  0xe3   : > { %v738_v47 = vadd.f32 %v737_v40, %v649_v46  ;;  %v1744_v39 = vpop.f32.mrf.mxu3 }
  0xe5   : > { %v740_v49 = vpop.f32.mrf.mxu1  ;;  %vm807_vm9 = vcmp.ge.f32.partialorder %v738_v47, 0.0  ;;  %v839_v50 = vmul.f32 0.1, %v738_v47 }
  0xe7   : > { %v871_v51 = vsel %vm807_vm9, %v738_v47, %v839_v50  ;;  %v1756_v47 = vld [vmem:[%s1932_s4] ss:$0 sm:$0xff] }
  0xe8   : > { %1398 = vmatmul.msk.bf16.gmra.mxu1 %vm569_vm1, %v1309_v48  ;;  %v651_v52 = vpop.f32.mrf.mxu0  ;;  %953 = vmatmul.f32.gmra.mxu2 %v871_v51 }
  0xe9   : > { %v652_v53 = vadd.f32 %v1697_v38, %v651_v52  ;;  %v1029_v52 = vld [vmem:[%s1751_s25] sm:$0xff] }
  0xeb   : > { %v741_v54 = vadd.f32 %v740_v49, %v652_v53  ;;  %v1759_v49 = vpop.f32.mrf.mxu3 }
  0xed   : > { %v742_v55 = vpop.f32.mrf.mxu1  ;;  %vm808_vm10 = vcmp.ge.f32.partialorder %v741_v54, 0.0  ;;  %v840_v56 = vmul.f32 0.1, %v741_v54 }
  0xef   : > { %v872_v57 = vsel %vm808_vm10, %v741_v54, %v840_v56 }
  0xf0   : > { %v653_v58 = vpop.f32.mrf.mxu0  ;;  %956 = vmatmul.f32.gmra.mxu2 %v872_v57 }
  0xf1   : > { %v654_v59 = vadd.f32 %v1697_v38, %v653_v58 }
  0xf3   : > { %v743_v60 = vadd.f32 %v742_v55, %v654_v59 }
  0xf5   : > { %v745_v61 = vpop.f32.mrf.mxu1  ;;  %vm809_vm11 = vcmp.ge.f32.partialorder %v743_v60, 0.0  ;;  %v841_v62 = vmul.f32 0.1, %v743_v60 }
  0xf7   : > { %v873_v63 = vsel %vm809_vm11, %v743_v60, %v841_v62  ;;  %v1030_v62 = vld [vmem:[%s1751_s25 + $0x8] sm:$0xff] }
  0xf8   : > { %v656_v0 = vpop.f32.mrf.mxu0  ;;  %959 = vmatmul.f32.gmra.mxu2 %v873_v63  ;;  %v1773_v63 = vpop.f32.mrf.mxu3 }
  0xf9   : > { %v657_v1 = vadd.f32 %v1697_v38, %v656_v0 }
  0xfb   : > { %v746_v2 = vadd.f32 %v745_v61, %v657_v1 }
  0xfd   : > { %v747_v3 = vpop.f32.mrf.mxu1  ;;  %vm810_vm12 = vcmp.ge.f32.partialorder %v746_v2, 0.0  ;;  %v842_v4 = vmul.f32 0.1, %v746_v2 }
  0xff   : > { %v874_v5 = vsel %vm810_vm12, %v746_v2, %v842_v4 }
 0x100   : > { %v658_v6 = vpop.f32.mrf.mxu0  ;;  %962 = vmatmul.f32.gmra.mxu2 %v874_v5 }
 0x101   : > { %v659_v7 = vadd.f32 %v1697_v38, %v658_v6 }
 0x103   : > { %v748_v8 = vadd.f32 %v747_v3, %v659_v7 }
 0x105   : > { %v750_v9 = vpop.f32.mrf.mxu1  ;;  %vm811_vm13 = vcmp.ge.f32.partialorder %v748_v8, 0.0  ;;  %v843_v10 = vmul.f32 0.1, %v748_v8 }
 0x107   : > { %v875_v11 = vsel %vm811_vm13, %v748_v8, %v843_v10 }
 0x108   : > { %v661_v12 = vpop.f32.mrf.mxu0  ;;  %965 = vmatmul.f32.gmra.mxu2 %v875_v11 }
 0x109   : > { %v662_v13 = vadd.f32 %v1697_v38, %v661_v12 }
 0x10b   : > { %v751_v14 = vadd.f32 %v750_v9, %v662_v13  ;;  %v1031_v9 = vld [vmem:[%s1751_s25 + $0x10] sm:$0xff]  ;;  %v1781_v13 = vpop.f32.mrf.mxu3 }
 0x10d   : > { %v752_v15 = vpop.f32.mrf.mxu1  ;;  %vm812_vm14 = vcmp.ge.f32.partialorder %v751_v14, 0.0  ;;  %v844_v16 = vmul.f32 0.1, %v751_v14 }
 0x10f   : > { %v876_v17 = vsel %vm812_vm14, %v751_v14, %v844_v16 }
 0x110   : > { %v663_v18 = vpop.f32.mrf.mxu0  ;;  %968 = vmatmul.f32.gmra.mxu2 %v876_v17 }
 0x111   : > { %v664_v19 = vadd.f32 %v1697_v38, %v663_v18 }
 0x113   : > { %v753_v20 = vadd.f32 %v752_v15, %v664_v19 }
 0x115   : > { %v755_v22 = vpop.f32.mrf.mxu1  ;;  %vm813_vm15 = vcmp.ge.f32.partialorder %v753_v20, 0.0  ;;  %v845_v23 = vmul.f32 0.1, %v753_v20 }
 0x117   : > { %v877_v24 = vsel %vm813_vm15, %v753_v20, %v845_v23  ;;  %v1032_v20 = vld [vmem:[%s1751_s25 + $0x18] sm:$0xff] }
 0x118   : > { %v666_v25 = vpop.f32.mrf.mxu0  ;;  %971 = vmatmul.f32.gmra.mxu2 %v877_v24 }
 0x119   : > { %v667_v26 = vadd.f32 %v1697_v38, %v666_v25 }
 0x11b   : > { %v756_v27 = vadd.f32 %v755_v22, %v667_v26 }
 0x11d   : > { %v757_v28 = vpop.f32.mrf.mxu1  ;;  %vm814_vm0 = vcmp.ge.f32.partialorder %v756_v27, 0.0  ;;  %v846_v29 = vmul.f32 0.1, %v756_v27 }
 0x11f   : > { %v878_v31 = vsel %vm814_vm0, %v756_v27, %v846_v29  ;;  %v1788_v27 = vpop.f32.mrf.mxu3 }
 0x120   : > { %v668_v32 = vpop.f32.mrf.mxu0  ;;  %974 = vmatmul.f32.gmra.mxu2 %v878_v31 }
 0x121   : > { %v669_v33 = vadd.f32 %v1697_v38, %v668_v32 }
 0x123   : > { %v758_v34 = vadd.f32 %v757_v28, %v669_v33  ;;  %v1033_v33 = vld [vmem:[%s1751_s25 + $0x20] sm:$0xff] }
 0x125   : > { %v760_v35 = vpop.f32.mrf.mxu1  ;;  %vm815_vm1 = vcmp.ge.f32.partialorder %v758_v34, 0.0  ;;  %v847_v36 = vmul.f32 0.1, %v758_v34 }
 0x127   : > { %v879_v37 = vsel %vm815_vm1, %v758_v34, %v847_v36 }
 0x128   : > { %v671_v40 = vpop.f32.mrf.mxu0  ;;  %977 = vmatmul.f32.gmra.mxu2 %v879_v37 }
 0x129   : > { %v672_v41 = vadd.f32 %v1697_v38, %v671_v40 }
 0x12b   : > { %v761_v42 = vadd.f32 %v760_v35, %v672_v41 }
 0x12d   : > { %v762_v43 = vpop.f32.mrf.mxu1  ;;  %vm816_vm2 = vcmp.ge.f32.partialorder %v761_v42, 0.0  ;;  %v848_v44 = vmul.f32 0.1, %v761_v42 }
 0x12f   : > { %v880_v45 = vsel %vm816_vm2, %v761_v42, %v848_v44 }
 0x130   : > { %v673_v46 = vpop.f32.mrf.mxu0  ;;  %980 = vmatmul.f32.gmra.mxu2 %v880_v45 }
 0x131   : > { %v674_v48 = vadd.f32 %v1697_v38, %v673_v46  ;;  %v1034_v46 = vld [vmem:[%s1751_s25 + $0x28] sm:$0xff] }
 0x133   : > { %v763_v50 = vadd.f32 %v762_v43, %v674_v48  ;;  %v933_v51 = vpop.f32.mrf.mxu2  ;;  %v1798_v43 = vpop.f32.mrf.mxu3 }
 0x134   : > { %v934_v54 = vadd.f32 %v1756_v47, %v933_v51 }
 0x135   : > { %v765_v53 = vpop.f32.mrf.mxu1  ;;  %vm817_vm4 = vcmp.ge.f32.partialorder %v763_v50, 0.0  ;;  %v849_v55 = vmul.f32 0.1, %v763_v50 }
 0x136   : > { %v1061_v56 = vadd.f32 %v1029_v52, %v934_v54 }
 0x137   : > { %v881_v57 = vsel %vm817_vm4, %v763_v50, %v849_v55 }
 0x138   : > { %1094 = vst.msk [vmem:[%s1767_s7] sm:$0xff] %vm1093_vm3, %v1061_v56  ;;  %v676_v58 = vpop.f32.mrf.mxu0  ;;  %983 = vmatmul.f32.gmra.mxu2 %v881_v57  ;;  %v692_v56 = vadd.f32 %v1697_v38, %v1738_v21 }
 0x139   : > { %v677_v59 = vadd.f32 %v1697_v38, %v676_v58 }
 0x13b   : > { %v766_v60 = vadd.f32 %v765_v53, %v677_v59  ;;  %v936_v61 = vpop.f32.mrf.mxu2  ;;  %v1035_v59 = vld [vmem:[%s1751_s25 + $0x30] sm:$0xff] }
 0x13c   : > { %v937_v1 = vadd.f32 %v1756_v47, %v936_v61 }
 0x13d   : > { %v767_v0 = vpop.f32.mrf.mxu1  ;;  %vm818_vm5 = vcmp.ge.f32.partialorder %v766_v60, 0.0  ;;  %v850_v2 = vmul.f32 0.1, %v766_v60 }
 0x13e   : > { %v1062_v3 = vadd.f32 %v1030_v62, %v937_v1 }
 0x13f   : > { %v882_v4 = vsel %vm818_vm5, %v766_v60, %v850_v2  ;;  %v785_v60 = vpop.f32.mrf.mxu3 }
 0x140   : > { %1095 = vst.msk [vmem:[%s1767_s7 + $0x8] sm:$0xff] %vm1093_vm3, %v1062_v3  ;;  %v678_v5 = vpop.f32.mrf.mxu0  ;;  %986 = vmatmul.f32.gmra.mxu2 %v882_v4 }
 0x141   : > { %v679_v6 = vadd.f32 %v1697_v38, %v678_v5  ;;  %v694_v5 = vadd.f32 %v1697_v38, %v1741_v30 }
 0x143   : > { %v768_v7 = vadd.f32 %v767_v0, %v679_v6  ;;  %v939_v8 = vpop.f32.mrf.mxu2 }
 0x144   : > { %v940_v11 = vadd.f32 %v1756_v47, %v939_v8 }
 0x145   : > { %v770_v10 = vpop.f32.mrf.mxu1  ;;  %vm819_vm6 = vcmp.ge.f32.partialorder %v768_v7, 0.0  ;;  %v851_v12 = vmul.f32 0.1, %v768_v7 }
 0x146   : > { %v1063_v14 = vadd.f32 %v1031_v9, %v940_v11 }
 0x147   : > { %v883_v15 = vsel %vm819_vm6, %v768_v7, %v851_v12  ;;  %v1036_v7 = vld [vmem:[%s1751_s25 + $0x38] sm:$0xff]  ;;  %v787_v12 = vpop.f32.mrf.mxu3 }
 0x148   : > { %1096 = vst.msk [vmem:[%s1767_s7 + $0x10] sm:$0xff] %vm1093_vm3, %v1063_v14  ;;  %v681_v16 = vpop.f32.mrf.mxu0  ;;  %989 = vmatmul.f32.gmra.mxu2 %v883_v15 }
 0x149   : > { %v682_v17 = vadd.f32 %v1697_v38, %v681_v16 }
 0x14b   : > { %v771_v18 = vadd.f32 %v770_v10, %v682_v17  ;;  %v942_v19 = vpop.f32.mrf.mxu2  ;;  %v697_v10 = vadd.f32 %v1697_v38, %v1744_v39 }
 0x14c   : > { %v943_v23 = vadd.f32 %v1756_v47, %v942_v19 }
 0x14d   : > { %v772_v22 = vpop.f32.mrf.mxu1  ;;  %vm820_vm7 = vcmp.ge.f32.partialorder %v771_v18, 0.0  ;;  %v852_v24 = vmul.f32 0.1, %v771_v18  ;;  %v786_v16 = vadd.f32 %v785_v60, %v697_v10 }
 0x14e   : > { %v1064_v25 = vadd.f32 %v1032_v20, %v943_v23  ;;  %v699_v20 = vadd.f32 %v1697_v38, %v1759_v49 }
 0x14f   : > { %v884_v26 = vsel %vm820_vm7, %v771_v18, %v852_v24  ;;  %v1037_v18 = vld [vmem:[%s1751_s25 + $0x40] sm:$0xff]  ;;  %v858_v39 = vmul.f32 0.1, %v786_v16  ;;  %vm826_vm13 = vcmp.ge.f32.partialorder %v786_v16, 0.0  ;;  %v790_v23 = vpop.f32.mrf.mxu3 }
 0x150   : > { %1097 = vst.msk [vmem:[%s1767_s7 + $0x18] sm:$0xff] %vm1093_vm3, %v1064_v25  ;;  %v683_v28 = vpop.f32.mrf.mxu0  ;;  %992 = vmatmul.f32.gmra.mxu2 %v884_v26  ;;  %v788_v24 = vadd.f32 %v787_v12, %v699_v20 }
 0x151   : > { %v684_v29 = vadd.f32 %v1697_v38, %v683_v28  ;;  %v890_v25 = vsel %vm826_vm13, %v786_v16, %v858_v39  ;;  %v1038_v28 = vld [vmem:[%s1751_s25 + $0x48] sm:$0xff]  ;;  %v1047_v39 = vld [vmem:[%s1751_s25 + $0x90] sm:$0xff] }
 0x152   : > { %v859_v49 = vmul.f32 0.1, %v788_v24  ;;  %vm827_vm14 = vcmp.ge.f32.partialorder %v788_v24, 0.0 }
 0x153   : > { %v773_v31 = vadd.f32 %v772_v22, %v684_v29  ;;  %v945_v32 = vpop.f32.mrf.mxu2 }
 0x154   : > { %v946_v35 = vadd.f32 %v1756_v47, %v945_v32 }
 0x155   : > { %v775_v34 = vpop.f32.mrf.mxu1  ;;  %vm821_vm8 = vcmp.ge.f32.partialorder %v773_v31, 0.0  ;;  %v853_v36 = vmul.f32 0.1, %v773_v31 }
 0x156   : > { %v1065_v37 = vadd.f32 %v1033_v33, %v946_v35 }
 0x157   : > { %v885_v40 = vsel %vm821_vm8, %v773_v31, %v853_v36  ;;  %v702_v31 = vadd.f32 %v1697_v38, %v1773_v63  ;;  %v792_v35 = vpop.f32.mrf.mxu3 }
 0x158   : > { %1098 = vst.msk [vmem:[%s1767_s7 + $0x20] sm:$0xff] %vm1093_vm3, %v1065_v37  ;;  %v686_v41 = vpop.f32.mrf.mxu0  ;;  %995 = vmatmul.f32.gmra.mxu2 %v885_v40  ;;  %v1039_v37 = vld [vmem:[%s1751_s25 + $0x50] sm:$0xff] }
 0x159   : > { %v687_v42 = vadd.f32 %v1697_v38, %v686_v41  ;;  %v791_v33 = vadd.f32 %v790_v23, %v702_v31  ;;  %v704_v41 = vadd.f32 %v1697_v38, %v1781_v13  ;;  %v1049_v31 = vld [vmem:[%s1751_s25 + $0xa0] sm:$0xff] }
 0x15b   : > { %v776_v44 = vadd.f32 %v775_v34, %v687_v42  ;;  %v948_v45 = vpop.f32.mrf.mxu2  ;;  %v891_v34 = vsel %vm827_vm14, %v788_v24, %v859_v49  ;;  %v860_v63 = vmul.f32 0.1, %v791_v33  ;;  %vm828_vm15 = vcmp.ge.f32.partialorder %v791_v33, 0.0 }
 0x15c   : > { %v949_v50 = vadd.f32 %v1756_v47, %v948_v45 }
 0x15d   : > { %v777_v48 = vpop.f32.mrf.mxu1  ;;  %vm822_vm9 = vcmp.ge.f32.partialorder %v776_v44, 0.0  ;;  %v854_v51 = vmul.f32 0.1, %v776_v44  ;;  %v892_v45 = vsel %vm828_vm15, %v791_v33, %v860_v63 }
 0x15e   : > { %v1066_v52 = vadd.f32 %v1034_v46, %v949_v50 }
 0x15f   : > { %v886_v53 = vsel %vm822_vm9, %v776_v44, %v854_v51  ;;  %v793_v44 = vadd.f32 %v792_v35, %v704_v41  ;;  %v795_v50 = vpop.f32.mrf.mxu3 }
 0x160   : > { %1099 = vst.msk [vmem:[%s1767_s7 + $0x28] sm:$0xff] %vm1093_vm3, %v1066_v52  ;;  %v688_v54 = vpop.f32.mrf.mxu0  ;;  %998 = vmatmul.f32.gmra.mxu2 %v886_v53  ;;  %v707_v52 = vadd.f32 %v1697_v38, %v1788_v27 }
 0x161   : > { %v689_v55 = vadd.f32 %v1697_v38, %v688_v54  ;;  %v861_v13 = vmul.f32 0.1, %v793_v44  ;;  %vm829_vm0 = vcmp.ge.f32.partialorder %v793_v44, 0.0 }
 0x162   : > { %v796_v54 = vadd.f32 %v795_v50, %v707_v52 }
 0x163   : > { %v778_v57 = vadd.f32 %v777_v48, %v689_v55  ;;  %v951_v58 = vpop.f32.mrf.mxu2  ;;  %v1040_v48 = vld [vmem:[%s1751_s25 + $0x58] sm:$0xff]  ;;  %v893_v55 = vsel %vm829_vm0, %v793_v44, %v861_v13 }
 0x164   : > { %v952_v62 = vadd.f32 %v1756_v47, %v951_v58  ;;  %v862_v60 = vmul.f32 0.1, %v796_v54  ;;  %vm830_vm1 = vcmp.ge.f32.partialorder %v796_v54, 0.0  ;;  %v1052_v44 = vld [vmem:[%s1751_s25 + $0xb8] sm:$0xff] }
 0x165   : > { %v780_v61 = vpop.f32.mrf.mxu1  ;;  %vm823_vm10 = vcmp.ge.f32.partialorder %v778_v57, 0.0  ;;  %v855_v1 = vmul.f32 0.1, %v778_v57 }
 0x166   : > { %v781_v0 = vadd.f32 %v780_v61, %v692_v56  ;;  %v1067_v2 = vadd.f32 %v1035_v59, %v952_v62  ;;  %v709_v59 = vadd.f32 %v1697_v38, %v1798_v43 }
 0x167   : > { %v887_v4 = vsel %vm823_vm10, %v778_v57, %v855_v1  ;;  %v1041_v57 = vld [vmem:[%s1751_s25 + $0x60] sm:$0xff]  ;;  %v797_v27 = vpop.f32.mrf.mxu3 }
 0x168   : > { %vm824_vm11 = vcmp.ge.f32.partialorder %v781_v0, 0.0  ;;  %v856_v3 = vmul.f32 0.1, %v781_v0  ;;  %1100 = vst.msk [vmem:[%s1767_s7 + $0x30] sm:$0xff] %vm1093_vm3, %v1067_v2  ;;  %1001 = vmatmul.f32.gmra.mxu2 %v887_v4  ;;  %v798_v62 = vadd.f32 %v797_v27, %v709_v59  ;;  %v1042_v2 = vld [vmem:[%s1751_s25 + $0x68] sm:$0xff]  ;;  %v1056_v27 = vld [vmem:[%s1751_s25 + $0xd8] sm:$0xff] }
 0x16a   : > { %v888_v21 = vsel %vm824_vm11, %v781_v0, %v856_v3  ;;  %v894_v0 = vsel %vm830_vm1, %v796_v54, %v862_v60  ;;  %v863_v4 = vmul.f32 0.1, %v798_v62  ;;  %vm831_vm2 = vcmp.ge.f32.partialorder %v798_v62, 0.0 }
 0x16b   : > { %1004 = vmatmul.f32.vlgmr.msra.gmra.mxu3 %v888_v21  ;;  %v954_v6 = vpop.f32.mrf.mxu2 }
 0x16c   : > { %v955_v9 = vadd.f32 %v1756_v47, %v954_v6  ;;  %v895_v38 = vsel %vm831_vm2, %v798_v62, %v863_v4 }
 0x16d   : > { %v782_v8 = vpop.f32.mrf.mxu1 }
 0x16e   : > { %v783_v11 = vadd.f32 %v782_v8, %v694_v5  ;;  %v1068_v14 = vadd.f32 %v1036_v7, %v955_v9  ;;  %v1043_v5 = vld [vmem:[%s1751_s25 + $0x70] sm:$0xff]  ;;  %v1044_v9 = vld [vmem:[%s1751_s25 + $0x78] sm:$0xff] }
 0x170   : > { %vm825_vm12 = vcmp.ge.f32.partialorder %v783_v11, 0.0  ;;  %v857_v15 = vmul.f32 0.1, %v783_v11  ;;  %1101 = vst.msk [vmem:[%s1767_s7 + $0x38] sm:$0xff] %vm1093_vm3, %v1068_v14  ;;  %v1045_v14 = vld [vmem:[%s1751_s25 + $0x80] sm:$0xff] }
 0x172   : > { %v889_v30 = vsel %vm825_vm12, %v783_v11, %v857_v15 }
 0x173   : > { %1007 = vmatmul.f32.gmra.mxu3 %v889_v30  ;;  %v957_v17 = vpop.f32.mrf.mxu2 }
 0x174   : > { %v958_v19 = vadd.f32 %v1756_v47, %v957_v17  ;;  %v1046_v17 = vld [vmem:[%s1751_s25 + $0x88] sm:$0xff] }
 0x176   : > { %v1069_v22 = vadd.f32 %v1037_v18, %v958_v19 }
 0x178   : > { %1102 = vst.msk [vmem:[%s1767_s7 + $0x40] sm:$0xff] %vm1093_vm3, %v1069_v22 }
 0x17b   : > { %1010 = vmatmul.f32.gmra.mxu3 %v890_v25  ;;  %v960_v26 = vpop.f32.mrf.mxu2  ;;  %v1048_v25 = vld [vmem:[%s1751_s25 + $0x98] sm:$0xff] }
 0x17c   : > { %v961_v29 = vadd.f32 %v1756_v47, %v960_v26 }
 0x17e   : > { %v1070_v32 = vadd.f32 %v1038_v28, %v961_v29 }
 0x180   : > { %1103 = vst.msk [vmem:[%s1767_s7 + $0x48] sm:$0xff] %vm1093_vm3, %v1070_v32 }
 0x183   : > { %1013 = vmatmul.f32.gmra.mxu3 %v891_v34  ;;  %v963_v36 = vpop.f32.mrf.mxu2  ;;  %v1050_v34 = vld [vmem:[%s1751_s25 + $0xa8] sm:$0xff] }
 0x184   : > { %v964_v40 = vadd.f32 %v1756_v47, %v963_v36 }
 0x186   : > { %v1071_v42 = vadd.f32 %v1039_v37, %v964_v40  ;;  %v1051_v40 = vld [vmem:[%s1751_s25 + $0xb0] sm:$0xff] }
 0x188   : > { %1104 = vst.msk [vmem:[%s1767_s7 + $0x50] sm:$0xff] %vm1093_vm3, %v1071_v42 }
 0x18b   : > { %1016 = vmatmul.f32.gmra.mxu3 %v892_v45  ;;  %v966_v46 = vpop.f32.mrf.mxu2 }
 0x18c   : > { %v967_v51 = vadd.f32 %v1756_v47, %v966_v46 }
 0x18e   : > { %v1072_v53 = vadd.f32 %v1040_v48, %v967_v51  ;;  %v1053_v48 = vld [vmem:[%s1751_s25 + $0xc0] sm:$0xff] }
 0x190   : > { %1105 = vst.msk [vmem:[%s1767_s7 + $0x58] sm:$0xff] %vm1093_vm3, %v1072_v53  ;;  %v1054_v53 = vld [vmem:[%s1751_s25 + $0xc8] sm:$0xff] }
 0x193   : > { %1019 = vmatmul.f32.gmra.mxu3 %v893_v55  ;;  %v969_v56 = vpop.f32.mrf.mxu2 }
 0x194   : > { %v970_v58 = vadd.f32 %v1756_v47, %v969_v56 }
 0x196   : > { %v1073_v61 = vadd.f32 %v1041_v57, %v970_v58  ;;  %v1055_v57 = vld [vmem:[%s1751_s25 + $0xd0] sm:$0xff] }
 0x198   : > { %1106 = vst.msk [vmem:[%s1767_s7 + $0x60] sm:$0xff] %vm1093_vm3, %v1073_v61 }
 0x19b   : > { %1022 = vmatmul.f32.gmra.mxu3 %v894_v0  ;;  %v972_v1 = vpop.f32.mrf.mxu2 }
 0x19c   : > { %v973_v3 = vadd.f32 %v1756_v47, %v972_v1  ;;  %v1057_v1 = vld [vmem:[%s1751_s25 + $0xe0] sm:$0xff] }
 0x19e   : > { %v1074_v21 = vadd.f32 %v1042_v2, %v973_v3 }
 0x1a0   : > { %1107 = vst.msk [vmem:[%s1767_s7 + $0x68] sm:$0xff] %vm1093_vm3, %v1074_v21  ;;  %v1058_v21 = vld [vmem:[%s1751_s25 + $0xe8] sm:$0xff] }
 0x1a3   : > { %1025 = vmatmul.f32.gmra.mxu3 %v895_v38  ;;  %v975_v43 = vpop.f32.mrf.mxu2 }
 0x1a4   : > { %v976_v6 = vadd.f32 %v1756_v47, %v975_v43 }
 0x1a6   : > { %v1075_v7 = vadd.f32 %v1043_v5, %v976_v6  ;;  %v1059_v6 = vld [vmem:[%s1751_s25 + $0xf0] sm:$0xff] }
 0x1a8   : > { %1108 = vst.msk [vmem:[%s1767_s7 + $0x70] sm:$0xff] %vm1093_vm3, %v1075_v7 }
 0x1ab   : > { %v978_v8 = vpop.f32.mrf.mxu2 }
 0x1ac   : > { %v979_v10 = vadd.f32 %v1756_v47, %v978_v8 }
 0x1ae   : > { %v1076_v11 = vadd.f32 %v1044_v9, %v979_v10  ;;  %v1060_v10 = vld [vmem:[%s1751_s25 + $0xf8] sm:$0xff] }
 0x1b0   : > { %1109 = vst.msk [vmem:[%s1767_s7 + $0x78] sm:$0xff] %vm1093_vm3, %v1076_v11 }
 0x1b3   : > { %v981_v12 = vpop.f32.mrf.mxu2 }
 0x1b4   : > { %v982_v15 = vadd.f32 %v1756_v47, %v981_v12 }
 0x1b6   : > { %v1077_v16 = vadd.f32 %v1045_v14, %v982_v15 }
 0x1b8   : > { %1110 = vst.msk [vmem:[%s1767_s7 + $0x80] sm:$0xff] %vm1093_vm3, %v1077_v16 }
 0x1bb   : > { %v984_v30 = vpop.f32.mrf.mxu2 }
 0x1bc   : > { %v985_v18 = vadd.f32 %v1756_v47, %v984_v30 }
 0x1be   : > { %v1078_v19 = vadd.f32 %v1046_v17, %v985_v18 }
 0x1c0   : > { %1111 = vst.msk [vmem:[%s1767_s7 + $0x88] sm:$0xff] %vm1093_vm3, %v1078_v19 }
 0x1c3   : > { %v987_v20 = vpop.f32.mrf.mxu2 }
 0x1c4   : > { %v988_v22 = vadd.f32 %v1756_v47, %v987_v20 }
 0x1c6   : > { %v1079_v23 = vadd.f32 %v1047_v39, %v988_v22 }
 0x1c8   : > { %1112 = vst.msk [vmem:[%s1767_s7 + $0x90] sm:$0xff] %vm1093_vm3, %v1079_v23 }
 0x1cb   : > { %v990_v24 = vpop.f32.mrf.mxu2 }
 0x1cc   : > { %v991_v26 = vadd.f32 %v1756_v47, %v990_v24 }
 0x1ce   : > { %v1080_v28 = vadd.f32 %v1048_v25, %v991_v26 }
 0x1d0   : > { %1113 = vst.msk [vmem:[%s1767_s7 + $0x98] sm:$0xff] %vm1093_vm3, %v1080_v28 }
 0x1d3   : > { %v993_v29 = vpop.f32.mrf.mxu2 }
 0x1d4   : > { %v994_v49 = vadd.f32 %v1756_v47, %v993_v29 }
 0x1d6   : > { %v1081_v32 = vadd.f32 %v1049_v31, %v994_v49 }
 0x1d8   : > { %1114 = vst.msk [vmem:[%s1767_s7 + $0xa0] sm:$0xff] %vm1093_vm3, %v1081_v32 }
 0x1db   : > { %v996_v33 = vpop.f32.mrf.mxu2 }
 0x1dc   : > { %v997_v35 = vadd.f32 %v1756_v47, %v996_v33 }
 0x1de   : > { %v1082_v36 = vadd.f32 %v1050_v34, %v997_v35 }
 0x1e0   : > { %1115 = vst.msk [vmem:[%s1767_s7 + $0xa8] sm:$0xff] %vm1093_vm3, %v1082_v36 }
 0x1e3   : > { %v999_v37 = vpop.f32.mrf.mxu2 }
 0x1e4   : > { %v1000_v41 = vadd.f32 %v1756_v47, %v999_v37 }
 0x1e6   : > { %v1083_v63 = vadd.f32 %v1051_v40, %v1000_v41 }
 0x1e8   : > { %1116 = vst.msk [vmem:[%s1767_s7 + $0xb0] sm:$0xff] %vm1093_vm3, %v1083_v63 }
 0x1eb   : > { %v1002_v42 = vpop.f32.mrf.mxu2 }
 0x1ec   : > { %v1003_v45 = vadd.f32 %v1756_v47, %v1002_v42 }
 0x1ee   : > { %v1005_v46 = vpop.f32.mrf.mxu3  ;;  %v1084_v50 = vadd.f32 %v1052_v44, %v1003_v45 }
 0x1ef   : > { %v1006_v51 = vadd.f32 %v1756_v47, %v1005_v46 }
 0x1f0   : > { %1117 = vst.msk [vmem:[%s1767_s7 + $0xb8] sm:$0xff] %vm1093_vm3, %v1084_v50 }
 0x1f1   : > { %v1085_v52 = vadd.f32 %v1053_v48, %v1006_v51 }
 0x1f3   : > { %1118 = vst.msk [vmem:[%s1767_s7 + $0xc0] sm:$0xff] %vm1093_vm3, %v1085_v52 }
 0x1f6   : > { %v1008_v13 = vpop.f32.mrf.mxu3 }
 0x1f7   : > { %v1009_v54 = vadd.f32 %v1756_v47, %v1008_v13 }
 0x1f9   : > { %v1086_v55 = vadd.f32 %v1054_v53, %v1009_v54 }
 0x1fb   : > { %1119 = vst.msk [vmem:[%s1767_s7 + $0xc8] sm:$0xff] %vm1093_vm3, %v1086_v55 }
 0x1fe   : > { %v1011_v56 = vpop.f32.mrf.mxu3 }
 0x1ff   : > { %v1012_v58 = vadd.f32 %v1756_v47, %v1011_v56 }
 0x201   : > { %v1087_v59 = vadd.f32 %v1055_v57, %v1012_v58 }
 0x203   : > { %1120 = vst.msk [vmem:[%s1767_s7 + $0xd0] sm:$0xff] %vm1093_vm3, %v1087_v59 }
 0x206   : > { %v1014_v60 = vpop.f32.mrf.mxu3 }
 0x207   : > { %v1015_v61 = vadd.f32 %v1756_v47, %v1014_v60 }
 0x209   : > { %v1088_v62 = vadd.f32 %v1056_v27, %v1015_v61 }
 0x20b   : > { %1121 = vst.msk [vmem:[%s1767_s7 + $0xd8] sm:$0xff] %vm1093_vm3, %v1088_v62 }
 0x20e   : > { %v1017_v0 = vpop.f32.mrf.mxu3 }
 0x20f   : > { %v1018_v2 = vadd.f32 %v1756_v47, %v1017_v0 }
 0x211   : > { %v1089_v3 = vadd.f32 %v1057_v1, %v1018_v2 }
 0x213   : > { %1122 = vst.msk [vmem:[%s1767_s7 + $0xe0] sm:$0xff] %vm1093_vm3, %v1089_v3 }
 0x216   : > { %v1020_v4 = vpop.f32.mrf.mxu3 }
 0x217   : > { %v1021_v38 = vadd.f32 %v1756_v47, %v1020_v4 }
 0x219   : > { %v1090_v43 = vadd.f32 %v1058_v21, %v1021_v38 }
 0x21b   : > { %1123 = vst.msk [vmem:[%s1767_s7 + $0xe8] sm:$0xff] %vm1093_vm3, %v1090_v43 }
 0x21e   : > { %v1023_v5 = vpop.f32.mrf.mxu3 }
 0x21f   : > { %v1024_v7 = vadd.f32 %v1756_v47, %v1023_v5 }
 0x221   : > { %v1091_v8 = vadd.f32 %v1059_v6, %v1024_v7 }
 0x223   : > { %1124 = vst.msk [vmem:[%s1767_s7 + $0xf0] sm:$0xff] %vm1093_vm3, %v1091_v8 }
 0x226   : > { %v1026_v9 = vpop.f32.mrf.mxu3 }
 0x227   : > { %v1027_v11 = vadd.f32 %v1756_v47, %v1026_v9 }
 0x229   : > { %v1092_v12 = vadd.f32 %v1060_v10, %v1027_v11 }
 0x22b   : > { %1125 = vst.msk [vmem:[%s1767_s7 + $0xf8] sm:$0xff] %vm1093_vm3, %v1092_v12 }
 0x22c PF: > { %s16_s21 = sadd.s32 1, %s1496_s21  }
 0x22d   : > { %p13_p4 = scmp.ge.s32.totalorder %s16_s21, 4  }
 0x22f   :  { %15 = sbr.rel (!%p13_p4) target bundleno = 1 (0x1), region = 77 }

</bundles_post_ra>
